<compile_context>
chip_gen: v7x
topology: tpu7x:2x2x1
jax: 0.10.0
libtpu: 0.0.40
codegen_flags: <defaults>
</compile_context>

<pallas_src>
import functools

import jax
import jax.numpy as jnp
from jax.experimental import pallas as pl
from jax.experimental.pallas import tpu as pltpu

NEG_SLOPE = 0.2
BN_EPS = 1e-5
TM_MAX = 1024                        # cap on rows per tile
TILE_VMEM_BUDGET = 8 * 1024 * 1024   # budget for double-buffered (patch+out) tiles


def _round_up(x, m):
    return (x + m - 1) // m * m


def _pick_tm(M, K, Np):
    """Largest M-tile (multiple of 16) whose double-buffered tiles fit the budget."""
    per_row = 2 * 2 * (K + Np)                      # bf16 bytes, x2 double-buffering
    tm = TILE_VMEM_BUDGET // per_row
    tm = max(16, min(TM_MAX, (tm // 16) * 16))
    return min(tm, _round_up(M, 16))


def _compiler_params():
    # Single grid axis over independent M-tiles -> "parallel" (v7x megacore).
    # 48 MiB scoped VMEM: above the 32 MiB default, below v7x's 64 MiB physical.
    return pltpu.CompilerParams(
        dimension_semantics=("parallel",),
        vmem_limit_bytes=48 * 1024 * 1024,
    )


# ----------------------------- kernels ------------------------------------


def _gemm_act_kernel(p_ref, w_ref, o_ref, *, act):
    y = jnp.dot(p_ref[...], w_ref[...], preferred_element_type=jnp.float32)
    if act == "leaky":
        y = jnp.where(y > 0, y, NEG_SLOPE * y)
    elif act == "sigmoid":
        y = 1.0 / (1.0 + jnp.exp(-y))
    o_ref[...] = y.astype(o_ref.dtype)


def _gemm_stats_kernel(p_ref, w_ref, y_ref, stat_ref):
    # GEMM tile + per-tile partial BatchNorm statistics (rows 0/1 of an 8-row
    # lane-dense slab; rows 2-7 are zero filler so the store stays unmasked).
    y = jnp.dot(p_ref[...], w_ref[...], preferred_element_type=jnp.float32)
    y_ref[...] = y.astype(y_ref.dtype)
    n = y.shape[1]
    s = jnp.sum(y, axis=0, keepdims=True)
    ss = jnp.sum(y * y, axis=0, keepdims=True)
    stat_ref[...] = jnp.concatenate(
        [s, ss, jnp.zeros((6, n), jnp.float32)], axis=0)


def _bn_act_kernel(y_ref, scale_ref, shift_ref, o_ref):
    y = y_ref[...].astype(jnp.float32)
    y = y * scale_ref[...] + shift_ref[...]
    y = jnp.where(y > 0, y, NEG_SLOPE * y)
    o_ref[...] = y.astype(o_ref.dtype)


# --------------------------- layer wrappers --------------------------------


def _im2col_nhwc(x, k, stride, pad):
    """x: (B, H, W, C) channel-last -> patches (B*OH*OW, k*k*C), tap-major."""
    B, H, W, C = x.shape
    if pad:
        x = jnp.pad(x, ((0, 0), (pad, pad), (pad, pad), (0, 0)))
    Hp, Wp = H + 2 * pad, W + 2 * pad
    OH = (Hp - k) // stride + 1
    OW = (Wp - k) // stride + 1
    taps = []
    for kh in range(k):
        for kw in range(k):
            taps.append(x[:, kh:kh + stride * OH:stride,
                          kw:kw + stride * OW:stride, :])
    # (B, OH, OW, k*k, C) -> (B*OH*OW, k*k*C): channel-last means no transpose
    # of the large activation tensor is needed (pure stack + reshape).
    p = jnp.stack(taps, axis=3).reshape(B * OH * OW, k * k * C)
    return p, (B, OH, OW)


def _prep_gemm(x, w, stride, pad):
    Cout, Cin, KH, KW = w.shape
    patches, (B, OH, OW) = _im2col_nhwc(x.astype(jnp.bfloat16), KH, stride, pad)
    M, K = patches.shape
    Np = _round_up(Cout, 128)                 # lane-dense output
    TM = _pick_tm(M, K, Np)
    Mp = _round_up(M, TM)
    patches = jnp.pad(patches, ((0, Mp - M), (0, 0)))
    w2d = w.transpose(2, 3, 1, 0).reshape(K, Cout).astype(jnp.bfloat16)
    w2d = jnp.pad(w2d, ((0, 0), (0, Np - Cout)))
    meta = dict(B=B, OH=OH, OW=OW, M=M, K=K, Cout=Cout, TM=TM, Mp=Mp, Np=Np)
    return patches, w2d, meta


def _conv_act(x, w, *, stride, pad, act, out_dtype=jnp.bfloat16):
    """Conv (bias=False) fused with an activation; no BatchNorm."""
    patches, w2d, m = _prep_gemm(x, w, stride, pad)
    TM, Mp, Np, K = m["TM"], m["Mp"], m["Np"], m["K"]
    ntiles = Mp // TM
    kern = functools.partial(_gemm_act_kernel, act=act)
    cost = pl.CostEstimate(
        flops=2 * Mp * K * Np,
        transcendentals=(Mp * Np if act == "sigmoid" else 0),
        bytes_accessed=2 * (Mp * K + K * Np + Mp * Np))
    y = pl.pallas_call(
        kern,
        out_shape=jax.ShapeDtypeStruct((Mp, Np), out_dtype),
        grid=(ntiles,),
        in_specs=[pl.BlockSpec((TM, K), lambda i: (i, 0)),
                  pl.BlockSpec((K, Np), lambda i: (0, 0))],
        out_specs=pl.BlockSpec((TM, Np), lambda i: (i, 0)),
        compiler_params=_compiler_params(),
        cost_estimate=cost,
    )(patches, w2d)
    y = y[:m["M"], :m["Cout"]]
    return y.reshape(m["B"], m["OH"], m["OW"], m["Cout"])


def _conv_bn_leaky(x, w, gamma, beta, *, stride, pad):
    """Conv (bias=False) + training-mode BatchNorm2d + LeakyReLU(0.2)."""
    patches, w2d, m = _prep_gemm(x, w, stride, pad)
    TM, Mp, Np, K, M, Cout = m["TM"], m["Mp"], m["Np"], m["K"], m["M"], m["Cout"]
    ntiles = Mp // TM

    # Pass 1: tiled GEMM + per-tile partial sums / sums-of-squares.
    cost1 = pl.CostEstimate(
        flops=2 * Mp * K * Np + 3 * Mp * Np,
        transcendentals=0,
        bytes_accessed=2 * (Mp * K + K * Np + Mp * Np) + ntiles * 8 * Np * 4)
    y, stats = pl.pallas_call(
        _gemm_stats_kernel,
        out_shape=(jax.ShapeDtypeStruct((Mp, Np), jnp.bfloat16),
                   jax.ShapeDtypeStruct((ntiles * 8, Np), jnp.float32)),
        grid=(ntiles,),
        in_specs=[pl.BlockSpec((TM, K), lambda i: (i, 0)),
                  pl.BlockSpec((K, Np), lambda i: (0, 0))],
        out_specs=(pl.BlockSpec((TM, Np), lambda i: (i, 0)),
                   pl.BlockSpec((8, Np), lambda i: (i, 0))),
        compiler_params=_compiler_params(),
        cost_estimate=cost1,
    )(patches, w2d)

    # Tiny cross-tile reduction + BN coefficient math in plain JAX (f32).
    stats = stats.reshape(ntiles, 8, Np)
    total = jnp.sum(stats[:, 0, :], axis=0)
    total_sq = jnp.sum(stats[:, 1, :], axis=0)
    count = jnp.float32(M)                       # true row count (padding is zero)
    mean = total / count
    var = jnp.maximum(total_sq / count - mean * mean, 0.0)   # biased, as in torch
    inv = jax.lax.rsqrt(var + BN_EPS)
    g = jnp.pad(gamma.astype(jnp.float32), (0, Np - Cout))
    b = jnp.pad(beta.astype(jnp.float32), (0, Np - Cout))
    scale = (g * inv).reshape(1, Np)
    shift = (b - mean * g * inv).reshape(1, Np)

    # Pass 2: tiled per-channel affine + LeakyReLU.
    cost2 = pl.CostEstimate(
        flops=3 * Mp * Np,
        transcendentals=0,
        bytes_accessed=2 * (2 * Mp * Np) + 2 * Np * 4)
    out = pl.pallas_call(
        _bn_act_kernel,
        out_shape=jax.ShapeDtypeStruct((Mp, Np), jnp.bfloat16),
        grid=(ntiles,),
        in_specs=[pl.BlockSpec((TM, Np), lambda i: (i, 0)),
                  pl.BlockSpec((1, Np), lambda i: (0, 0)),
                  pl.BlockSpec((1, Np), lambda i: (0, 0))],
        out_specs=pl.BlockSpec((TM, Np), lambda i: (i, 0)),
        compiler_params=_compiler_params(),
        cost_estimate=cost2,
    )(y, scale, shift)
    out = out[:M, :Cout]
    return out.reshape(m["B"], m["OH"], m["OW"], Cout)


# ------------------------------ model -------------------------------------


def discriminator_forward(x, params):
    # x: (B, nc, 64, 64) NCHW (PyTorch convention) -> NHWC once, then stay NHWC.
    h = jnp.transpose(x, (0, 2, 3, 1))
    h = _conv_act(h, params["w1"], stride=2, pad=1, act="leaky")
    h = _conv_bn_leaky(h, params["w2"], params["g2"], params["b2"], stride=2, pad=1)
    h = _conv_bn_leaky(h, params["w3"], params["g3"], params["b3"], stride=2, pad=1)
    h = _conv_bn_leaky(h, params["w4"], params["g4"], params["b4"], stride=2, pad=1)
    h = _conv_act(h, params["w5"], stride=1, pad=0, act="sigmoid",
                  out_dtype=jnp.float32)
    # PyTorch: output.view(-1, 1).squeeze(1) -> (B,)
    return h.reshape(-1)


def init_params(key, nc, ndf):
    ks = jax.random.split(key, 5)

    def w(k, cout, cin):
        # DCGAN-style N(0, 0.02) init, deterministic via PRNGKey.
        return 0.02 * jax.random.normal(k, (cout, cin, 4, 4), jnp.float32)

    return {
        "w1": w(ks[0], ndf, nc),
        "w2": w(ks[1], ndf * 2, ndf),
        "g2": jnp.ones((ndf * 2,), jnp.float32),
        "b2": jnp.zeros((ndf * 2,), jnp.float32),
        "w3": w(ks[2], ndf * 4, ndf * 2),
        "g3": jnp.ones((ndf * 4,), jnp.float32),
        "b3": jnp.zeros((ndf * 4,), jnp.float32),
        "w4": w(ks[3], ndf * 8, ndf * 4),
        "g4": jnp.ones((ndf * 8,), jnp.float32),
        "b4": jnp.zeros((ndf * 8,), jnp.float32),
        "w5": w(ks[4], 1, ndf * 8),
    }


def _reference_forward(x, params):
    # Pure-JAX f32 reference (training-mode BN), for a loose sanity check.
    def conv(h, w, stride, pad):
        return jax.lax.conv_general_dilated(
            h, w, (stride, stride), [(pad, pad), (pad, pad)],
            dimension_numbers=("NCHW", "OIHW", "NCHW"))

    def bn(h, g, b):
        mean = h.mean(axis=(0, 2, 3), keepdims=True)
        var = ((h - mean) ** 2).mean(axis=(0, 2, 3), keepdims=True)
        return ((h - mean) * jax.lax.rsqrt(var + BN_EPS)
                * g.reshape(1, -1, 1, 1) + b.reshape(1, -1, 1, 1))

    def lrelu(h):
        return jnp.where(h > 0, h, NEG_SLOPE * h)

    h = lrelu(conv(x, params["w1"], 2, 1))
    h = lrelu(bn(conv(h, params["w2"], 2, 1), params["g2"], params["b2"]))
    h = lrelu(bn(conv(h, params["w3"], 2, 1), params["g3"], params["b3"]))
    h = lrelu(bn(conv(h, params["w4"], 2, 1), params["g4"], params["b4"]))
    h = jax.nn.sigmoid(conv(h, params["w5"], 1, 0))
    return h.reshape(-1)


if __name__ == "__main__":
    # DCGAN discriminator architecturally requires 64x64 spatial input
    # (four stride-2 convs: 64->32->16->8->4, then a 4x4 valid conv -> 1x1).
    nc, ndf, B = 3, 8, 2
    key = jax.random.PRNGKey(0)
    kp, kx = jax.random.split(key)
    params = init_params(kp, nc, ndf)
    x = jax.random.normal(kx, (B, nc, 64, 64), jnp.float32)

    out = jax.jit(discriminator_forward)(x, params)
    out = jax.block_until_ready(out)

    assert out.shape == (B,), out.shape
    assert bool(jnp.all(jnp.isfinite(out)))
    assert bool(jnp.all((out >= 0.0) & (out <= 1.0)))  # sigmoid output

    # Loose tolerance: kernel runs the GEMM path in bf16, reference is f32.
    ref = _reference_forward(x, params)
    err = float(jnp.max(jnp.abs(out - ref)))
    assert err < 0.08, f"max abs err vs f32 reference: {err}"

    print("KERNEL_OK")
</pallas_src>

<mosaic_0001>
module attributes {stable_mosaic.version = 11 : i64} {
  func.func @_gemm_act_kernel(%arg0: i32, %arg1: memref<1024x48xbf16, #tpu.memory_space<vmem>>, %arg2: memref<48x128xbf16, #tpu.memory_space<vmem>>, %arg3: memref<1024x128xbf16, #tpu.memory_space<vmem>>) attributes {dimension_semantics = [#tpu.dimension_semantics<parallel>], iteration_bounds = array<i64: 2>, scalar_prefetch = 0 : i64, scratch_operands = 0 : i64, tpu.core_type = #tpu.core_type<tc>, window_params = [{transform_indices = @transform_0, window_bounds = array<i64: 1024, 48>}, {pipeline_mode = #tpu.pipeline_mode<synchronous>, transform_indices = @transform_1, window_bounds = array<i64: 48, 128>}, {transform_indices = @transform_2, window_bounds = array<i64: 1024, 128>}]} {
    %c0 = arith.constant 0 : index
    %c0_0 = arith.constant 0 : index
    %0 = vector.load %arg1[%c0, %c0_0] : memref<1024x48xbf16, #tpu.memory_space<vmem>>, vector<1024x48xbf16>
    %c0_1 = arith.constant 0 : index
    %c0_2 = arith.constant 0 : index
    %1 = vector.load %arg2[%c0_1, %c0_2] : memref<48x128xbf16, #tpu.memory_space<vmem>>, vector<48x128xbf16>
    %cst = arith.constant dense<0.000000e+00> : vector<1024x128xf32>
    %2 = tpu.matmul %0, %1, %cst {dimension_numbers = #tpu.dot_dimension_numbers<[1], [0], [0], [1], [0, 0, 1, 1], [], []>} : vector<1024x48xbf16>, vector<48x128xbf16>, vector<1024x128xf32> -> vector<1024x128xf32>
    %cst_3 = arith.constant 0.000000e+00 : f32
    %3 = vector.broadcast %cst_3 : f32 to vector<1024x128xf32>
    %4 = arith.cmpf ogt, %2, %3 : vector<1024x128xf32>
    %cst_4 = arith.constant 2.000000e-01 : f32
    %5 = vector.broadcast %cst_4 : f32 to vector<1024x128xf32>
    %6 = arith.mulf %5, %2 : vector<1024x128xf32>
    %7 = arith.select %4, %2, %6 : vector<1024x128xi1>, vector<1024x128xf32>
    %8 = arith.truncf %7 : vector<1024x128xf32> to vector<1024x128xbf16>
    %c0_5 = arith.constant 0 : index
    %c0_6 = arith.constant 0 : index
    %9 = vector.load %arg3[%c0_5, %c0_6] : memref<1024x128xbf16, #tpu.memory_space<vmem>>, vector<1024x128xbf16>
    tpu.vector_store %arg3[%c0_5, %c0_6], %8 {strides = array<i32>} : memref<1024x128xbf16, #tpu.memory_space<vmem>>, vector<1024x128xbf16>,
    return
  }
  func.func @transform_0(%arg0: i32) -> (i32, i32) {
    %c0_i32 = arith.constant 0 : i32
    %c0_i32_0 = arith.constant 0 : i32
    return %arg0, %c0_i32 : i32, i32
  }
  func.func @transform_1(%arg0: i32) -> (i32, i32) {
    %c0_i32 = arith.constant 0 : i32
    %c0_i32_0 = arith.constant 0 : i32
    %c0_i32_1 = arith.constant 0 : i32
    return %c0_i32, %c0_i32_0 : i32, i32
  }
  func.func @transform_2(%arg0: i32) -> (i32, i32) {
    %c0_i32 = arith.constant 0 : i32
    %c0_i32_0 = arith.constant 0 : i32
    return %arg0, %c0_i32 : i32, i32
  }
}

module attributes {stable_mosaic.version = 11 : i64} {
  func.func @_gemm_stats_kernel(%arg0: i32, %arg1: memref<512x128xbf16, #tpu.memory_space<vmem>>, %arg2: memref<128x128xbf16, #tpu.memory_space<vmem>>, %arg3: memref<512x128xbf16, #tpu.memory_space<vmem>>, %arg4: memref<8x128xf32, #tpu.memory_space<vmem>>) attributes {dimension_semantics = [#tpu.dimension_semantics<parallel>], iteration_bounds = array<i64: 1>, scalar_prefetch = 0 : i64, scratch_operands = 0 : i64, tpu.core_type = #tpu.core_type<tc>, window_params = [{transform_indices = @transform_0, window_bounds = array<i64: 512, 128>}, {pipeline_mode = #tpu.pipeline_mode<synchronous>, transform_indices = @transform_1, window_bounds = array<i64: 128, 128>}, {transform_indices = @transform_2, window_bounds = array<i64: 512, 128>}, {transform_indices = @transform_3, window_bounds = array<i64: 8, 128>}]} {
    %c0 = arith.constant 0 : index
    %c0_0 = arith.constant 0 : index
    %0 = vector.load %arg1[%c0, %c0_0] : memref<512x128xbf16, #tpu.memory_space<vmem>>, vector<512x128xbf16>
    %c0_1 = arith.constant 0 : index
    %c0_2 = arith.constant 0 : index
    %1 = vector.load %arg2[%c0_1, %c0_2] : memref<128x128xbf16, #tpu.memory_space<vmem>>, vector<128x128xbf16>
    %cst = arith.constant dense<0.000000e+00> : vector<512x128xf32>
    %2 = tpu.matmul %0, %1, %cst {dimension_numbers = #tpu.dot_dimension_numbers<[1], [0], [0], [1], [0, 0, 1, 1], [], []>} : vector<512x128xbf16>, vector<128x128xbf16>, vector<512x128xf32> -> vector<512x128xf32>
    %3 = arith.truncf %2 : vector<512x128xf32> to vector<512x128xbf16>
    %c0_3 = arith.constant 0 : index
    %c0_4 = arith.constant 0 : index
    %4 = vector.load %arg3[%c0_3, %c0_4] : memref<512x128xbf16, #tpu.memory_space<vmem>>, vector<512x128xbf16>
    tpu.vector_store %arg3[%c0_3, %c0_4], %3 {strides = array<i32>} : memref<512x128xbf16, #tpu.memory_space<vmem>>, vector<512x128xbf16>,
    %cst_5 = arith.constant dense<0.000000e+00> : vector<128xf32>
    %5 = vector.multi_reduction <add>, %2, %cst_5 [0] : vector<512x128xf32> to vector<128xf32>
    %6 = vector.shape_cast %5 : vector<128xf32> to vector<1x128xf32>
    %7 = arith.mulf %2, %2 : vector<512x128xf32>
    %cst_6 = arith.constant dense<0.000000e+00> : vector<128xf32>
    %8 = vector.multi_reduction <add>, %7, %cst_6 [0] : vector<512x128xf32> to vector<128xf32>
    %9 = vector.shape_cast %8 : vector<128xf32> to vector<1x128xf32>
    %cst_7 = arith.constant 0.000000e+00 : f32
    %10 = vector.broadcast %cst_7 : f32 to vector<6x128xf32>
    %11 = tpu.concatenate %6, %9, %10 in 0 : vector<1x128xf32>, vector<1x128xf32>, vector<6x128xf32> -> vector<8x128xf32>
    %c0_8 = arith.constant 0 : index
    %c0_9 = arith.constant 0 : index
    %12 = vector.load %arg4[%c0_8, %c0_9] : memref<8x128xf32, #tpu.memory_space<vmem>>, vector<8x128xf32>
    tpu.vector_store %arg4[%c0_8, %c0_9], %11 {strides = array<i32>} : memref<8x128xf32, #tpu.memory_space<vmem>>, vector<8x128xf32>,
    return
  }
  func.func @transform_0(%arg0: i32) -> (i32, i32) {
    %c0_i32 = arith.constant 0 : i32
    %c0_i32_0 = arith.constant 0 : i32
    return %arg0, %c0_i32 : i32, i32
  }
  func.func @transform_1(%arg0: i32) -> (i32, i32) {
    %c0_i32 = arith.constant 0 : i32
    %c0_i32_0 = arith.constant 0 : i32
    %c0_i32_1 = arith.constant 0 : i32
    return %c0_i32, %c0_i32_0 : i32, i32
  }
  func.func @transform_2(%arg0: i32) -> (i32, i32) {
    %c0_i32 = arith.constant 0 : i32
    %c0_i32_0 = arith.constant 0 : i32
    return %arg0, %c0_i32 : i32, i32
  }
  func.func @transform_3(%arg0: i32) -> (i32, i32) {
    %c0_i32 = arith.constant 0 : i32
    %c0_i32_0 = arith.constant 0 : i32
    return %arg0, %c0_i32 : i32, i32
  }
}

module attributes {stable_mosaic.version = 11 : i64} {
  func.func @_bn_act_kernel(%arg0: i32, %arg1: memref<512x128xbf16, #tpu.memory_space<vmem>>, %arg2: memref<1x128xf32, #tpu.memory_space<vmem>>, %arg3: memref<1x128xf32, #tpu.memory_space<vmem>>, %arg4: memref<512x128xbf16, #tpu.memory_space<vmem>>) attributes {dimension_semantics = [#tpu.dimension_semantics<parallel>], iteration_bounds = array<i64: 1>, scalar_prefetch = 0 : i64, scratch_operands = 0 : i64, tpu.core_type = #tpu.core_type<tc>, window_params = [{transform_indices = @transform_0, window_bounds = array<i64: 512, 128>}, {pipeline_mode = #tpu.pipeline_mode<synchronous>, transform_indices = @transform_1, window_bounds = array<i64: 1, 128>}, {pipeline_mode = #tpu.pipeline_mode<synchronous>, transform_indices = @transform_2, window_bounds = array<i64: 1, 128>}, {transform_indices = @transform_3, window_bounds = array<i64: 512, 128>}]} {
    %c0 = arith.constant 0 : index
    %c0_0 = arith.constant 0 : index
    %0 = vector.load %arg1[%c0, %c0_0] : memref<512x128xbf16, #tpu.memory_space<vmem>>, vector<512x128xbf16>
    %1 = arith.extf %0 : vector<512x128xbf16> to vector<512x128xf32>
    %c0_1 = arith.constant 0 : index
    %c0_2 = arith.constant 0 : index
    %2 = vector.load %arg2[%c0_1, %c0_2] : memref<1x128xf32, #tpu.memory_space<vmem>>, vector<1x128xf32>
    %3 = vector.broadcast %2 : vector<1x128xf32> to vector<512x128xf32>
    %4 = arith.mulf %1, %3 : vector<512x128xf32>
    %c0_3 = arith.constant 0 : index
    %c0_4 = arith.constant 0 : index
    %5 = vector.load %arg3[%c0_3, %c0_4] : memref<1x128xf32, #tpu.memory_space<vmem>>, vector<1x128xf32>
    %6 = vector.broadcast %5 : vector<1x128xf32> to vector<512x128xf32>
    %7 = arith.addf %4, %6 : vector<512x128xf32>
    %cst = arith.constant 0.000000e+00 : f32
    %8 = vector.broadcast %cst : f32 to vector<512x128xf32>
    %9 = arith.cmpf ogt, %7, %8 : vector<512x128xf32>
    %cst_5 = arith.constant 2.000000e-01 : f32
    %10 = vector.broadcast %cst_5 : f32 to vector<512x128xf32>
    %11 = arith.mulf %10, %7 : vector<512x128xf32>
    %12 = arith.select %9, %7, %11 : vector<512x128xi1>, vector<512x128xf32>
    %13 = arith.truncf %12 : vector<512x128xf32> to vector<512x128xbf16>
    %c0_6 = arith.constant 0 : index
    %c0_7 = arith.constant 0 : index
    %14 = vector.load %arg4[%c0_6, %c0_7] : memref<512x128xbf16, #tpu.memory_space<vmem>>, vector<512x128xbf16>
    tpu.vector_store %arg4[%c0_6, %c0_7], %13 {strides = array<i32>} : memref<512x128xbf16, #tpu.memory_space<vmem>>, vector<512x128xbf16>,
    return
  }
  func.func @transform_0(%arg0: i32) -> (i32, i32) {
    %c0_i32 = arith.constant 0 : i32
    %c0_i32_0 = arith.constant 0 : i32
    return %arg0, %c0_i32 : i32, i32
  }
  func.func @transform_1(%arg0: i32) -> (i32, i32) {
    %c0_i32 = arith.constant 0 : i32
    %c0_i32_0 = arith.constant 0 : i32
    %c0_i32_1 = arith.constant 0 : i32
    return %c0_i32, %c0_i32_0 : i32, i32
  }
  func.func @transform_2(%arg0: i32) -> (i32, i32) {
    %c0_i32 = arith.constant 0 : i32
    %c0_i32_0 = arith.constant 0 : i32
    %c0_i32_1 = arith.constant 0 : i32
    return %c0_i32, %c0_i32_0 : i32, i32
  }
  func.func @transform_3(%arg0: i32) -> (i32, i32) {
    %c0_i32 = arith.constant 0 : i32
    %c0_i32_0 = arith.constant 0 : i32
    return %arg0, %c0_i32 : i32, i32
  }
}

module attributes {stable_mosaic.version = 11 : i64} {
  func.func @_gemm_stats_kernel(%arg0: i32, %arg1: memref<128x256xbf16, #tpu.memory_space<vmem>>, %arg2: memref<256x128xbf16, #tpu.memory_space<vmem>>, %arg3: memref<128x128xbf16, #tpu.memory_space<vmem>>, %arg4: memref<8x128xf32, #tpu.memory_space<vmem>>) attributes {dimension_semantics = [#tpu.dimension_semantics<parallel>], iteration_bounds = array<i64: 1>, scalar_prefetch = 0 : i64, scratch_operands = 0 : i64, tpu.core_type = #tpu.core_type<tc>, window_params = [{transform_indices = @transform_0, window_bounds = array<i64: 128, 256>}, {pipeline_mode = #tpu.pipeline_mode<synchronous>, transform_indices = @transform_1, window_bounds = array<i64: 256, 128>}, {transform_indices = @transform_2, window_bounds = array<i64: 128, 128>}, {transform_indices = @transform_3, window_bounds = array<i64: 8, 128>}]} {
    %c0 = arith.constant 0 : index
    %c0_0 = arith.constant 0 : index
    %0 = vector.load %arg1[%c0, %c0_0] : memref<128x256xbf16, #tpu.memory_space<vmem>>, vector<128x256xbf16>
    %c0_1 = arith.constant 0 : index
    %c0_2 = arith.constant 0 : index
    %1 = vector.load %arg2[%c0_1, %c0_2] : memref<256x128xbf16, #tpu.memory_space<vmem>>, vector<256x128xbf16>
    %cst = arith.constant dense<0.000000e+00> : vector<128x128xf32>
    %2 = tpu.matmul %0, %1, %cst {dimension_numbers = #tpu.dot_dimension_numbers<[1], [0], [0], [1], [0, 0, 1, 1], [], []>} : vector<128x256xbf16>, vector<256x128xbf16>, vector<128x128xf32> -> vector<128x128xf32>
    %3 = arith.truncf %2 : vector<128x128xf32> to vector<128x128xbf16>
    %c0_3 = arith.constant 0 : index
    %c0_4 = arith.constant 0 : index
    %4 = vector.load %arg3[%c0_3, %c0_4] : memref<128x128xbf16, #tpu.memory_space<vmem>>, vector<128x128xbf16>
    tpu.vector_store %arg3[%c0_3, %c0_4], %3 {strides = array<i32>} : memref<128x128xbf16, #tpu.memory_space<vmem>>, vector<128x128xbf16>,
    %cst_5 = arith.constant dense<0.000000e+00> : vector<128xf32>
    %5 = vector.multi_reduction <add>, %2, %cst_5 [0] : vector<128x128xf32> to vector<128xf32>
    %6 = vector.shape_cast %5 : vector<128xf32> to vector<1x128xf32>
    %7 = arith.mulf %2, %2 : vector<128x128xf32>
    %cst_6 = arith.constant dense<0.000000e+00> : vector<128xf32>
    %8 = vector.multi_reduction <add>, %7, %cst_6 [0] : vector<128x128xf32> to vector<128xf32>
    %9 = vector.shape_cast %8 : vector<128xf32> to vector<1x128xf32>
    %cst_7 = arith.constant 0.000000e+00 : f32
    %10 = vector.broadcast %cst_7 : f32 to vector<6x128xf32>
    %11 = tpu.concatenate %6, %9, %10 in 0 : vector<1x128xf32>, vector<1x128xf32>, vector<6x128xf32> -> vector<8x128xf32>
    %c0_8 = arith.constant 0 : index
    %c0_9 = arith.constant 0 : index
    %12 = vector.load %arg4[%c0_8, %c0_9] : memref<8x128xf32, #tpu.memory_space<vmem>>, vector<8x128xf32>
    tpu.vector_store %arg4[%c0_8, %c0_9], %11 {strides = array<i32>} : memref<8x128xf32, #tpu.memory_space<vmem>>, vector<8x128xf32>,
    return
  }
  func.func @transform_0(%arg0: i32) -> (i32, i32) {
    %c0_i32 = arith.constant 0 : i32
    %c0_i32_0 = arith.constant 0 : i32
    return %arg0, %c0_i32 : i32, i32
  }
  func.func @transform_1(%arg0: i32) -> (i32, i32) {
    %c0_i32 = arith.constant 0 : i32
    %c0_i32_0 = arith.constant 0 : i32
    %c0_i32_1 = arith.constant 0 : i32
    return %c0_i32, %c0_i32_0 : i32, i32
  }
  func.func @transform_2(%arg0: i32) -> (i32, i32) {
    %c0_i32 = arith.constant 0 : i32
    %c0_i32_0 = arith.constant 0 : i32
    return %arg0, %c0_i32 : i32, i32
  }
  func.func @transform_3(%arg0: i32) -> (i32, i32) {
    %c0_i32 = arith.constant 0 : i32
    %c0_i32_0 = arith.constant 0 : i32
    return %arg0, %c0_i32 : i32, i32
  }
}

module attributes {stable_mosaic.version = 11 : i64} {
  func.func @_bn_act_kernel(%arg0: i32, %arg1: memref<128x128xbf16, #tpu.memory_space<vmem>>, %arg2: memref<1x128xf32, #tpu.memory_space<vmem>>, %arg3: memref<1x128xf32, #tpu.memory_space<vmem>>, %arg4: memref<128x128xbf16, #tpu.memory_space<vmem>>) attributes {dimension_semantics = [#tpu.dimension_semantics<parallel>], iteration_bounds = array<i64: 1>, scalar_prefetch = 0 : i64, scratch_operands = 0 : i64, tpu.core_type = #tpu.core_type<tc>, window_params = [{transform_indices = @transform_0, window_bounds = array<i64: 128, 128>}, {pipeline_mode = #tpu.pipeline_mode<synchronous>, transform_indices = @transform_1, window_bounds = array<i64: 1, 128>}, {pipeline_mode = #tpu.pipeline_mode<synchronous>, transform_indices = @transform_2, window_bounds = array<i64: 1, 128>}, {transform_indices = @transform_3, window_bounds = array<i64: 128, 128>}]} {
    %c0 = arith.constant 0 : index
    %c0_0 = arith.constant 0 : index
    %0 = vector.load %arg1[%c0, %c0_0] : memref<128x128xbf16, #tpu.memory_space<vmem>>, vector<128x128xbf16>
    %1 = arith.extf %0 : vector<128x128xbf16> to vector<128x128xf32>
    %c0_1 = arith.constant 0 : index
    %c0_2 = arith.constant 0 : index
    %2 = vector.load %arg2[%c0_1, %c0_2] : memref<1x128xf32, #tpu.memory_space<vmem>>, vector<1x128xf32>
    %3 = vector.broadcast %2 : vector<1x128xf32> to vector<128x128xf32>
    %4 = arith.mulf %1, %3 : vector<128x128xf32>
    %c0_3 = arith.constant 0 : index
    %c0_4 = arith.constant 0 : index
    %5 = vector.load %arg3[%c0_3, %c0_4] : memref<1x128xf32, #tpu.memory_space<vmem>>, vector<1x128xf32>
    %6 = vector.broadcast %5 : vector<1x128xf32> to vector<128x128xf32>
    %7 = arith.addf %4, %6 : vector<128x128xf32>
    %cst = arith.constant 0.000000e+00 : f32
    %8 = vector.broadcast %cst : f32 to vector<128x128xf32>
    %9 = arith.cmpf ogt, %7, %8 : vector<128x128xf32>
    %cst_5 = arith.constant 2.000000e-01 : f32
    %10 = vector.broadcast %cst_5 : f32 to vector<128x128xf32>
    %11 = arith.mulf %10, %7 : vector<128x128xf32>
    %12 = arith.select %9, %7, %11 : vector<128x128xi1>, vector<128x128xf32>
    %13 = arith.truncf %12 : vector<128x128xf32> to vector<128x128xbf16>
    %c0_6 = arith.constant 0 : index
    %c0_7 = arith.constant 0 : index
    %14 = vector.load %arg4[%c0_6, %c0_7] : memref<128x128xbf16, #tpu.memory_space<vmem>>, vector<128x128xbf16>
    tpu.vector_store %arg4[%c0_6, %c0_7], %13 {strides = array<i32>} : memref<128x128xbf16, #tpu.memory_space<vmem>>, vector<128x128xbf16>,
    return
  }
  func.func @transform_0(%arg0: i32) -> (i32, i32) {
    %c0_i32 = arith.constant 0 : i32
    %c0_i32_0 = arith.constant 0 : i32
    return %arg0, %c0_i32 : i32, i32
  }
  func.func @transform_1(%arg0: i32) -> (i32, i32) {
    %c0_i32 = arith.constant 0 : i32
    %c0_i32_0 = arith.constant 0 : i32
    %c0_i32_1 = arith.constant 0 : i32
    return %c0_i32, %c0_i32_0 : i32, i32
  }
  func.func @transform_2(%arg0: i32) -> (i32, i32) {
    %c0_i32 = arith.constant 0 : i32
    %c0_i32_0 = arith.constant 0 : i32
    %c0_i32_1 = arith.constant 0 : i32
    return %c0_i32, %c0_i32_0 : i32, i32
  }
  func.func @transform_3(%arg0: i32) -> (i32, i32) {
    %c0_i32 = arith.constant 0 : i32
    %c0_i32_0 = arith.constant 0 : i32
    return %arg0, %c0_i32 : i32, i32
  }
}

module attributes {stable_mosaic.version = 11 : i64} {
  func.func @_gemm_stats_kernel(%arg0: i32, %arg1: memref<32x512xbf16, #tpu.memory_space<vmem>>, %arg2: memref<512x128xbf16, #tpu.memory_space<vmem>>, %arg3: memref<32x128xbf16, #tpu.memory_space<vmem>>, %arg4: memref<8x128xf32, #tpu.memory_space<vmem>>) attributes {dimension_semantics = [#tpu.dimension_semantics<parallel>], iteration_bounds = array<i64: 1>, scalar_prefetch = 0 : i64, scratch_operands = 0 : i64, tpu.core_type = #tpu.core_type<tc>, window_params = [{transform_indices = @transform_0, window_bounds = array<i64: 32, 512>}, {pipeline_mode = #tpu.pipeline_mode<synchronous>, transform_indices = @transform_1, window_bounds = array<i64: 512, 128>}, {transform_indices = @transform_2, window_bounds = array<i64: 32, 128>}, {transform_indices = @transform_3, window_bounds = array<i64: 8, 128>}]} {
    %c0 = arith.constant 0 : index
    %c0_0 = arith.constant 0 : index
    %0 = vector.load %arg1[%c0, %c0_0] : memref<32x512xbf16, #tpu.memory_space<vmem>>, vector<32x512xbf16>
    %c0_1 = arith.constant 0 : index
    %c0_2 = arith.constant 0 : index
    %1 = vector.load %arg2[%c0_1, %c0_2] : memref<512x128xbf16, #tpu.memory_space<vmem>>, vector<512x128xbf16>
    %cst = arith.constant dense<0.000000e+00> : vector<32x128xf32>
    %2 = tpu.matmul %0, %1, %cst {dimension_numbers = #tpu.dot_dimension_numbers<[1], [0], [0], [1], [0, 0, 1, 1], [], []>} : vector<32x512xbf16>, vector<512x128xbf16>, vector<32x128xf32> -> vector<32x128xf32>
    %3 = arith.truncf %2 : vector<32x128xf32> to vector<32x128xbf16>
    %c0_3 = arith.constant 0 : index
    %c0_4 = arith.constant 0 : index
    %4 = vector.load %arg3[%c0_3, %c0_4] : memref<32x128xbf16, #tpu.memory_space<vmem>>, vector<32x128xbf16>
    tpu.vector_store %arg3[%c0_3, %c0_4], %3 {strides = array<i32>} : memref<32x128xbf16, #tpu.memory_space<vmem>>, vector<32x128xbf16>,
    %cst_5 = arith.constant dense<0.000000e+00> : vector<128xf32>
    %5 = vector.multi_reduction <add>, %2, %cst_5 [0] : vector<32x128xf32> to vector<128xf32>
    %6 = vector.shape_cast %5 : vector<128xf32> to vector<1x128xf32>
    %7 = arith.mulf %2, %2 : vector<32x128xf32>
    %cst_6 = arith.constant dense<0.000000e+00> : vector<128xf32>
    %8 = vector.multi_reduction <add>, %7, %cst_6 [0] : vector<32x128xf32> to vector<128xf32>
    %9 = vector.shape_cast %8 : vector<128xf32> to vector<1x128xf32>
    %cst_7 = arith.constant 0.000000e+00 : f32
    %10 = vector.broadcast %cst_7 : f32 to vector<6x128xf32>
    %11 = tpu.concatenate %6, %9, %10 in 0 : vector<1x128xf32>, vector<1x128xf32>, vector<6x128xf32> -> vector<8x128xf32>
    %c0_8 = arith.constant 0 : index
    %c0_9 = arith.constant 0 : index
    %12 = vector.load %arg4[%c0_8, %c0_9] : memref<8x128xf32, #tpu.memory_space<vmem>>, vector<8x128xf32>
    tpu.vector_store %arg4[%c0_8, %c0_9], %11 {strides = array<i32>} : memref<8x128xf32, #tpu.memory_space<vmem>>, vector<8x128xf32>,
    return
  }
  func.func @transform_0(%arg0: i32) -> (i32, i32) {
    %c0_i32 = arith.constant 0 : i32
    %c0_i32_0 = arith.constant 0 : i32
    return %arg0, %c0_i32 : i32, i32
  }
  func.func @transform_1(%arg0: i32) -> (i32, i32) {
    %c0_i32 = arith.constant 0 : i32
    %c0_i32_0 = arith.constant 0 : i32
    %c0_i32_1 = arith.constant 0 : i32
    return %c0_i32, %c0_i32_0 : i32, i32
  }
  func.func @transform_2(%arg0: i32) -> (i32, i32) {
    %c0_i32 = arith.constant 0 : i32
    %c0_i32_0 = arith.constant 0 : i32
    return %arg0, %c0_i32 : i32, i32
  }
  func.func @transform_3(%arg0: i32) -> (i32, i32) {
    %c0_i32 = arith.constant 0 : i32
    %c0_i32_0 = arith.constant 0 : i32
    return %arg0, %c0_i32 : i32, i32
  }
}

module attributes {stable_mosaic.version = 11 : i64} {
  func.func @_bn_act_kernel(%arg0: i32, %arg1: memref<32x128xbf16, #tpu.memory_space<vmem>>, %arg2: memref<1x128xf32, #tpu.memory_space<vmem>>, %arg3: memref<1x128xf32, #tpu.memory_space<vmem>>, %arg4: memref<32x128xbf16, #tpu.memory_space<vmem>>) attributes {dimension_semantics = [#tpu.dimension_semantics<parallel>], iteration_bounds = array<i64: 1>, scalar_prefetch = 0 : i64, scratch_operands = 0 : i64, tpu.core_type = #tpu.core_type<tc>, window_params = [{transform_indices = @transform_0, window_bounds = array<i64: 32, 128>}, {pipeline_mode = #tpu.pipeline_mode<synchronous>, transform_indices = @transform_1, window_bounds = array<i64: 1, 128>}, {pipeline_mode = #tpu.pipeline_mode<synchronous>, transform_indices = @transform_2, window_bounds = array<i64: 1, 128>}, {transform_indices = @transform_3, window_bounds = array<i64: 32, 128>}]} {
    %c0 = arith.constant 0 : index
    %c0_0 = arith.constant 0 : index
    %0 = vector.load %arg1[%c0, %c0_0] : memref<32x128xbf16, #tpu.memory_space<vmem>>, vector<32x128xbf16>
    %1 = arith.extf %0 : vector<32x128xbf16> to vector<32x128xf32>
    %c0_1 = arith.constant 0 : index
    %c0_2 = arith.constant 0 : index
    %2 = vector.load %arg2[%c0_1, %c0_2] : memref<1x128xf32, #tpu.memory_space<vmem>>, vector<1x128xf32>
    %3 = vector.broadcast %2 : vector<1x128xf32> to vector<32x128xf32>
    %4 = arith.mulf %1, %3 : vector<32x128xf32>
    %c0_3 = arith.constant 0 : index
    %c0_4 = arith.constant 0 : index
    %5 = vector.load %arg3[%c0_3, %c0_4] : memref<1x128xf32, #tpu.memory_space<vmem>>, vector<1x128xf32>
    %6 = vector.broadcast %5 : vector<1x128xf32> to vector<32x128xf32>
    %7 = arith.addf %4, %6 : vector<32x128xf32>
    %cst = arith.constant 0.000000e+00 : f32
    %8 = vector.broadcast %cst : f32 to vector<32x128xf32>
    %9 = arith.cmpf ogt, %7, %8 : vector<32x128xf32>
    %cst_5 = arith.constant 2.000000e-01 : f32
    %10 = vector.broadcast %cst_5 : f32 to vector<32x128xf32>
    %11 = arith.mulf %10, %7 : vector<32x128xf32>
    %12 = arith.select %9, %7, %11 : vector<32x128xi1>, vector<32x128xf32>
    %13 = arith.truncf %12 : vector<32x128xf32> to vector<32x128xbf16>
    %c0_6 = arith.constant 0 : index
    %c0_7 = arith.constant 0 : index
    %14 = vector.load %arg4[%c0_6, %c0_7] : memref<32x128xbf16, #tpu.memory_space<vmem>>, vector<32x128xbf16>
    tpu.vector_store %arg4[%c0_6, %c0_7], %13 {strides = array<i32>} : memref<32x128xbf16, #tpu.memory_space<vmem>>, vector<32x128xbf16>,
    return
  }
  func.func @transform_0(%arg0: i32) -> (i32, i32) {
    %c0_i32 = arith.constant 0 : i32
    %c0_i32_0 = arith.constant 0 : i32
    return %arg0, %c0_i32 : i32, i32
  }
  func.func @transform_1(%arg0: i32) -> (i32, i32) {
    %c0_i32 = arith.constant 0 : i32
    %c0_i32_0 = arith.constant 0 : i32
    %c0_i32_1 = arith.constant 0 : i32
    return %c0_i32, %c0_i32_0 : i32, i32
  }
  func.func @transform_2(%arg0: i32) -> (i32, i32) {
    %c0_i32 = arith.constant 0 : i32
    %c0_i32_0 = arith.constant 0 : i32
    %c0_i32_1 = arith.constant 0 : i32
    return %c0_i32, %c0_i32_0 : i32, i32
  }
  func.func @transform_3(%arg0: i32) -> (i32, i32) {
    %c0_i32 = arith.constant 0 : i32
    %c0_i32_0 = arith.constant 0 : i32
    return %arg0, %c0_i32 : i32, i32
  }
}

module attributes {stable_mosaic.version = 11 : i64} {
  func.func @_gemm_act_kernel(%arg0: i32, %arg1: memref<16x1024xbf16, #tpu.memory_space<vmem>>, %arg2: memref<1024x128xbf16, #tpu.memory_space<vmem>>, %arg3: memref<16x128xf32, #tpu.memory_space<vmem>>) attributes {dimension_semantics = [#tpu.dimension_semantics<parallel>], iteration_bounds = array<i64: 1>, scalar_prefetch = 0 : i64, scratch_operands = 0 : i64, tpu.core_type = #tpu.core_type<tc>, window_params = [{transform_indices = @transform_0, window_bounds = array<i64: 16, 1024>}, {pipeline_mode = #tpu.pipeline_mode<synchronous>, transform_indices = @transform_1, window_bounds = array<i64: 1024, 128>}, {transform_indices = @transform_2, window_bounds = array<i64: 16, 128>}]} {
    %c0 = arith.constant 0 : index
    %c0_0 = arith.constant 0 : index
    %0 = vector.load %arg1[%c0, %c0_0] : memref<16x1024xbf16, #tpu.memory_space<vmem>>, vector<16x1024xbf16>
    %c0_1 = arith.constant 0 : index
    %c0_2 = arith.constant 0 : index
    %1 = vector.load %arg2[%c0_1, %c0_2] : memref<1024x128xbf16, #tpu.memory_space<vmem>>, vector<1024x128xbf16>
    %cst = arith.constant dense<0.000000e+00> : vector<16x128xf32>
    %2 = tpu.matmul %0, %1, %cst {dimension_numbers = #tpu.dot_dimension_numbers<[1], [0], [0], [1], [0, 0, 1, 1], [], []>} : vector<16x1024xbf16>, vector<1024x128xbf16>, vector<16x128xf32> -> vector<16x128xf32>
    %cst_3 = arith.constant 0.000000e+00 : f32
    %3 = vector.broadcast %cst_3 : f32 to vector<16x128xf32>
    %4 = arith.subf %3, %2 : vector<16x128xf32>
    %5 = math.exp %4 : vector<16x128xf32>
    %cst_4 = arith.constant 1.000000e+00 : f32
    %6 = vector.broadcast %cst_4 : f32 to vector<16x128xf32>
    %7 = arith.addf %6, %5 : vector<16x128xf32>
    %cst_5 = arith.constant 1.000000e+00 : f32
    %8 = vector.broadcast %cst_5 : f32 to vector<16x128xf32>
    %9 = arith.divf %8, %7 : vector<16x128xf32>
    %c0_6 = arith.constant 0 : index
    %c0_7 = arith.constant 0 : index
    %10 = vector.load %arg3[%c0_6, %c0_7] : memref<16x128xf32, #tpu.memory_space<vmem>>, vector<16x128xf32>
    tpu.vector_store %arg3[%c0_6, %c0_7], %9 {strides = array<i32>} : memref<16x128xf32, #tpu.memory_space<vmem>>, vector<16x128xf32>,
    return
  }
  func.func @transform_0(%arg0: i32) -> (i32, i32) {
    %c0_i32 = arith.constant 0 : i32
    %c0_i32_0 = arith.constant 0 : i32
    return %arg0, %c0_i32 : i32, i32
  }
  func.func @transform_1(%arg0: i32) -> (i32, i32) {
    %c0_i32 = arith.constant 0 : i32
    %c0_i32_0 = arith.constant 0 : i32
    %c0_i32_1 = arith.constant 0 : i32
    return %c0_i32, %c0_i32_0 : i32, i32
  }
  func.func @transform_2(%arg0: i32) -> (i32, i32) {
    %c0_i32 = arith.constant 0 : i32
    %c0_i32_0 = arith.constant 0 : i32
    return %arg0, %c0_i32 : i32, i32
  }
}

</mosaic_0001>

<bundles_post_ra>
// kernel: discriminator_forward.8
= control target key start
LH: loop header
LB: loop body
LE: loop exit
PB: predicated region body
PF: predicated region fallthrough
CT: control target
= control target key end

     0   :  { %s3524_s9 = smov 0   ;;  %s3768_s0 = inlined_call_operand.vmem [shape: bf16[2048,48], index: 0, kind: input, shape index: {}]   ;;  %s3769_s1 = inlined_call_operand.vmem [shape: bf16[48,128], index: 1, kind: input, shape index: {}]   ;;  %s3770_s2 = inlined_call_operand.vmem [shape: bf16[2048,128], index: 2, kind: output, shape index: {}]  }
   0x1 LB: > { %s2438_s10 = sadd.s32 4294967295, %s3507_s9   ;;  %p2442_p0 = scmp.ge.s32.totalorder %s3507_s9, 1  ;;  %s3507_s9 = sphi %s3524_s9, %s12_s9  }
   0x2   : > { %p113_p1 = scmp.lt.s32.totalorder %s3507_s9, 3 }
   0x4   : > { %p114_p2 = pnand %p2442_p0, %p113_p1 }
   0x5   : > { %v3434_v0 = vld [vmem:[%s3769_s1] sm:$0xff] (!%p114_p2)   ;;  %s2443_s13 = sshll.u32 (!%p114_p2), %s2438_s10, 7  ;;  %v3435_v1 = vld [vmem:[%s3769_s1 + $0x8] sm:$0xff] (!%p114_p2)   ;;  %v3436_v2 = vld [vmem:[%s3769_s1 + $0x10] sm:$0xff] (!%p114_p2)   ;;  %vm620_vm0 = vcmask (!%p114_p2), 392192  }
   0x6   : > { %117 = sbr.rel (%p114_p2) target bundleno = 361 (0x169), region = 28  ;;  %p136_p3 = scmp.lt.s32.totalorder (!%p114_p2), %s2443_s13, 255  ;;  %3286 = vmatprep.subr.bf16.mxu0 (!%p114_p2), %v3434_v0  ;;  %3420 = vmatprep.subr.bf16.mxu1 (!%p114_p2), %v3434_v0 }
   0x7   : > { %3287 = vmatpush3.bf16.msra.mxu0 (!%p114_p2), %v3434_v0  ;;  %3423 = vmatpush3.bf16.msra.mxu1 (!%p114_p2), %v3434_v0 }
   0x8   : > { %3288 = vmatprep.subr.bf16.mxu0 (!%p114_p2), %v3435_v1  ;;  %3421 = vmatprep.subr.bf16.mxu1 (!%p114_p2), %v3435_v1 }
   0xb   : > { %3289 = vmatpush3.bf16.msra.mxu0 (!%p114_p2), %v3435_v1  ;;  %3424 = vmatpush3.bf16.msra.mxu1 (!%p114_p2), %v3435_v1 }
   0xc   : > { %3290 = vmatprep.subr.bf16.mxu0 (!%p114_p2), %v3436_v2  ;;  %3422 = vmatprep.subr.bf16.mxu1 (!%p114_p2), %v3436_v2 }
   0xd   : > { %s3772_s13 = smov (!%p136_p3, %s2443_s13), 255 }
   0xe   : > { %s2444_s18 = sshll.u32 %s3772_s13, 2 }
   0xf   : > { %s3549_s21 = scalar_lea.vmem %s3768_s0, %s2444_s18  ;;  %3291 = vmatpush3.bf16.msra.mxu0 %v3436_v2  ;;  %3425 = vmatpush3.bf16.msra.mxu1 %v3436_v2  ;;  %s3684_s24 = scalar_lea.vmem %s3770_s2, %s2444_s18 }
  0x10   : > { %v3437_v3 = vld [vmem:[%s3549_s21] sm:$0xff]   ;;  %v3439_v5 = vld [vmem:[%s3549_s21 + $0x8] sm:$0xff]   ;;  %v3441_v7 = vld [vmem:[%s3549_s21 + $0x10] sm:$0xff]  }
  0x11   : > { %v3438_v4 = vld [vmem:[%s3549_s21 + $0x100] sm:$0xff]   ;;  %3292 = vmatprep.mubr.msk.bf16.mxu0 %vm620_vm0, %v3437_v3  ;;  %v3440_v6 = vld [vmem:[%s3549_s21 + $0x108] sm:$0xff]   ;;  %v3442_v8 = vld [vmem:[%s3549_s21 + $0x110] sm:$0xff]  }
  0x12   : > { %3356 = vmatprep.mubr.msk.bf16.mxu1 %vm620_vm0, %v3438_v4  ;;  %3293 = vmatmul.mubr.msk.bf16.vlgmr.msra.gmra.mrb[0].mxu0 %vm620_vm0, %v3439_v5  ;;  %v3443_v9 = vld [vmem:[%s3549_s21 + $0x18] sm:$0xff]   ;;  %v3445_v11 = vld [vmem:[%s3549_s21 + $0x20] sm:$0xff]   ;;  %v3447_v13 = vld [vmem:[%s3549_s21 + $0x28] sm:$0xff]  }
  0x13   : > { %3357 = vmatmul.mubr.msk.bf16.vlgmr.msra.gmra.mrb[0].mxu1 %vm620_vm0, %v3440_v6  ;;  %3296 = vmatprep.mubr.msk.bf16.mxu0 %vm620_vm0, %v3441_v7  ;;  %v3444_v10 = vld [vmem:[%s3549_s21 + $0x118] sm:$0xff]   ;;  %v3446_v12 = vld [vmem:[%s3549_s21 + $0x120] sm:$0xff]   ;;  %v3448_v14 = vld [vmem:[%s3549_s21 + $0x128] sm:$0xff]  }
  0x14   : > { %3360 = vmatprep.mubr.msk.bf16.mxu1 %vm620_vm0, %v3442_v8  ;;  %v3449_v15 = vld [vmem:[%s3549_s21 + $0x30] sm:$0xff]   ;;  %v3451_v17 = vld [vmem:[%s3549_s21 + $0x38] sm:$0xff]   ;;  %v3453_v19 = vld [vmem:[%s3549_s21 + $0x40] sm:$0xff]  }
  0x15   : > { %v3450_v16 = vld [vmem:[%s3549_s21 + $0x130] sm:$0xff]   ;;  %v3452_v18 = vld [vmem:[%s3549_s21 + $0x138] sm:$0xff]   ;;  %v3454_v20 = vld [vmem:[%s3549_s21 + $0x140] sm:$0xff]  }
  0x16   : > { %v3455_v21 = vld [vmem:[%s3549_s21 + $0x48] sm:$0xff]   ;;  %v3457_v23 = vld [vmem:[%s3549_s21 + $0x50] sm:$0xff]   ;;  %v3459_v25 = vld [vmem:[%s3549_s21 + $0x58] sm:$0xff]  }
  0x17   : > { %v3456_v22 = vld [vmem:[%s3549_s21 + $0x148] sm:$0xff]   ;;  %v3458_v24 = vld [vmem:[%s3549_s21 + $0x150] sm:$0xff]   ;;  %v3460_v26 = vld [vmem:[%s3549_s21 + $0x158] sm:$0xff]  }
  0x18   : > { %v3461_v27 = vld [vmem:[%s3549_s21 + $0x60] sm:$0xff]   ;;  %v3463_v29 = vld [vmem:[%s3549_s21 + $0x68] sm:$0xff]   ;;  %v3465_v31 = vld [vmem:[%s3549_s21 + $0x70] sm:$0xff]  }
  0x19   : > { %v3462_v28 = vld [vmem:[%s3549_s21 + $0x160] sm:$0xff]   ;;  %v3464_v30 = vld [vmem:[%s3549_s21 + $0x168] sm:$0xff]   ;;  %v3466_v32 = vld [vmem:[%s3549_s21 + $0x170] sm:$0xff]  }
  0x1a   : > { %3297 = vmatmul.mubr.msk.bf16.gmra.mrb[4].mxu0 %vm620_vm0, %v3443_v9  ;;  %v3467_v33 = vld [vmem:[%s3549_s21 + $0x78] sm:$0xff]   ;;  %v3469_v35 = vld [vmem:[%s3549_s21 + $0x80] sm:$0xff]   ;;  %v3471_v37 = vld [vmem:[%s3549_s21 + $0x88] sm:$0xff]  }
  0x1b   : > { %3361 = vmatmul.mubr.msk.bf16.gmra.mrb[4].mxu1 %vm620_vm0, %v3444_v10  ;;  %3300 = vmatprep.mubr.msk.bf16.mxu0 %vm620_vm0, %v3445_v11  ;;  %v3468_v34 = vld [vmem:[%s3549_s21 + $0x178] sm:$0xff]   ;;  %v3470_v36 = vld [vmem:[%s3549_s21 + $0x180] sm:$0xff]   ;;  %v3472_v38 = vld [vmem:[%s3549_s21 + $0x188] sm:$0xff]  }
  0x1c   : > { %3364 = vmatprep.mubr.msk.bf16.mxu1 %vm620_vm0, %v3446_v12  ;;  %v3473_v39 = vld [vmem:[%s3549_s21 + $0x90] sm:$0xff]   ;;  %v3475_v41 = vld [vmem:[%s3549_s21 + $0x98] sm:$0xff]   ;;  %v3477_v43 = vld [vmem:[%s3549_s21 + $0xa0] sm:$0xff]  }
  0x1d   : > { %v3474_v40 = vld [vmem:[%s3549_s21 + $0x190] sm:$0xff]   ;;  %v3476_v42 = vld [vmem:[%s3549_s21 + $0x198] sm:$0xff]   ;;  %v3478_v44 = vld [vmem:[%s3549_s21 + $0x1a0] sm:$0xff]  }
  0x1e   : > { %v3479_v45 = vld [vmem:[%s3549_s21 + $0xa8] sm:$0xff]   ;;  %v3481_v47 = vld [vmem:[%s3549_s21 + $0xb0] sm:$0xff]   ;;  %v3483_v49 = vld [vmem:[%s3549_s21 + $0xb8] sm:$0xff]  }
  0x1f   : > { %v3480_v46 = vld [vmem:[%s3549_s21 + $0x1a8] sm:$0xff]   ;;  %v3482_v48 = vld [vmem:[%s3549_s21 + $0x1b0] sm:$0xff]   ;;  %v3484_v50 = vld [vmem:[%s3549_s21 + $0x1b8] sm:$0xff]  }
  0x20   : > { %v3485_v51 = vld [vmem:[%s3549_s21 + $0xc0] sm:$0xff]   ;;  %v3487_v53 = vld [vmem:[%s3549_s21 + $0xc8] sm:$0xff]   ;;  %v3489_v55 = vld [vmem:[%s3549_s21 + $0xd0] sm:$0xff]  }
  0x21   : > { %v3486_v52 = vld [vmem:[%s3549_s21 + $0x1c0] sm:$0xff]   ;;  %v3488_v54 = vld [vmem:[%s3549_s21 + $0x1c8] sm:$0xff]   ;;  %v3490_v56 = vld [vmem:[%s3549_s21 + $0x1d0] sm:$0xff]  }
  0x22   : > { %3301 = vmatmul.mubr.msk.bf16.gmra.mrb[8].mxu0 %vm620_vm0, %v3447_v13  ;;  %v3491_v57 = vld [vmem:[%s3549_s21 + $0xd8] sm:$0xff]   ;;  %v3493_v59 = vld [vmem:[%s3549_s21 + $0xe0] sm:$0xff]   ;;  %v3495_v61 = vld [vmem:[%s3549_s21 + $0xe8] sm:$0xff]  }
  0x23   : > { %3365 = vmatmul.mubr.msk.bf16.gmra.mrb[8].mxu1 %vm620_vm0, %v3448_v14  ;;  %3304 = vmatprep.mubr.msk.bf16.mxu0 %vm620_vm0, %v3449_v15  ;;  %v3492_v58 = vld [vmem:[%s3549_s21 + $0x1d8] sm:$0xff]   ;;  %v3494_v60 = vld [vmem:[%s3549_s21 + $0x1e0] sm:$0xff]   ;;  %v3496_v62 = vld [vmem:[%s3549_s21 + $0x1e8] sm:$0xff]  }
  0x24   : > { %3368 = vmatprep.mubr.msk.bf16.mxu1 %vm620_vm0, %v3450_v16  ;;  %v3497_v63 = vld [vmem:[%s3549_s21 + $0xf0] sm:$0xff]   ;;  %v3499_v1 = vld [vmem:[%s3549_s21 + $0xf8] sm:$0xff]  }
  0x25   : > { %v3498_v0 = vld [vmem:[%s3549_s21 + $0x1f0] sm:$0xff]   ;;  %v3500_v2 = vld [vmem:[%s3549_s21 + $0x1f8] sm:$0xff]  }
  0x2a   : > { %3305 = vmatmul.mubr.msk.bf16.gmra.mrb[12].mxu0 %vm620_vm0, %v3451_v17 }
  0x2b   : > { %3369 = vmatmul.mubr.msk.bf16.gmra.mrb[12].mxu1 %vm620_vm0, %v3452_v18  ;;  %3308 = vmatprep.mubr.msk.bf16.mxu0 %vm620_vm0, %v3453_v19 }
  0x2c   : > { %3372 = vmatprep.mubr.msk.bf16.mxu1 %vm620_vm0, %v3454_v20 }
  0x32   : > { %3309 = vmatmul.mubr.msk.bf16.gmra.mrb[16].mxu0 %vm620_vm0, %v3455_v21 }
  0x33   : > { %3373 = vmatmul.mubr.msk.bf16.gmra.mrb[16].mxu1 %vm620_vm0, %v3456_v22  ;;  %3312 = vmatprep.mubr.msk.bf16.mxu0 %vm620_vm0, %v3457_v23 }
  0x34   : > { %3376 = vmatprep.mubr.msk.bf16.mxu1 %vm620_vm0, %v3458_v24 }
  0x3a   : > { %3313 = vmatmul.mubr.msk.bf16.gmra.mrb[20].mxu0 %vm620_vm0, %v3459_v25 }
  0x3b   : > { %3377 = vmatmul.mubr.msk.bf16.gmra.mrb[20].mxu1 %vm620_vm0, %v3460_v26  ;;  %3316 = vmatprep.mubr.msk.bf16.mxu0 %vm620_vm0, %v3461_v27 }
  0x3c   : > { %3380 = vmatprep.mubr.msk.bf16.mxu1 %vm620_vm0, %v3462_v28 }
  0x42   : > { %3317 = vmatmul.mubr.msk.bf16.gmra.mrb[24].mxu0 %vm620_vm0, %v3463_v29 }
  0x43   : > { %3381 = vmatmul.mubr.msk.bf16.gmra.mrb[24].mxu1 %vm620_vm0, %v3464_v30  ;;  %3320 = vmatprep.mubr.msk.bf16.mxu0 %vm620_vm0, %v3465_v31 }
  0x44   : > { %3384 = vmatprep.mubr.msk.bf16.mxu1 %vm620_vm0, %v3466_v32 }
  0x4a   : > { %3321 = vmatmul.mubr.msk.bf16.gmra.mrb[28].mxu0 %vm620_vm0, %v3467_v33 }
  0x4b   : > { %3385 = vmatmul.mubr.msk.bf16.gmra.mrb[28].mxu1 %vm620_vm0, %v3468_v34  ;;  %3324 = vmatprep.mubr.msk.bf16.mxu0 %vm620_vm0, %v3469_v35 }
  0x4c   : > { %3388 = vmatprep.mubr.msk.bf16.mxu1 %vm620_vm0, %v3470_v36 }
  0x52   : > { %3325 = vmatmul.mubr.msk.bf16.gmra.mrb[32].mxu0 %vm620_vm0, %v3471_v37 }
  0x53   : > { %3389 = vmatmul.mubr.msk.bf16.gmra.mrb[32].mxu1 %vm620_vm0, %v3472_v38  ;;  %3328 = vmatprep.mubr.msk.bf16.mxu0 %vm620_vm0, %v3473_v39 }
  0x54   : > { %3392 = vmatprep.mubr.msk.bf16.mxu1 %vm620_vm0, %v3474_v40 }
  0x5a   : > { %3329 = vmatmul.mubr.msk.bf16.gmra.mrb[36].mxu0 %vm620_vm0, %v3475_v41 }
  0x5b   : > { %3393 = vmatmul.mubr.msk.bf16.gmra.mrb[36].mxu1 %vm620_vm0, %v3476_v42  ;;  %3332 = vmatprep.mubr.msk.bf16.mxu0 %vm620_vm0, %v3477_v43 }
  0x5c   : > { %3396 = vmatprep.mubr.msk.bf16.mxu1 %vm620_vm0, %v3478_v44 }
  0x62   : > { %3333 = vmatmul.mubr.msk.bf16.gmra.mrb[40].mxu0 %vm620_vm0, %v3479_v45 }
  0x63   : > { %3397 = vmatmul.mubr.msk.bf16.gmra.mrb[40].mxu1 %vm620_vm0, %v3480_v46  ;;  %3336 = vmatprep.mubr.msk.bf16.mxu0 %vm620_vm0, %v3481_v47 }
  0x64   : > { %3400 = vmatprep.mubr.msk.bf16.mxu1 %vm620_vm0, %v3482_v48 }
  0x6a   : > { %3337 = vmatmul.mubr.msk.bf16.gmra.mrb[44].mxu0 %vm620_vm0, %v3483_v49 }
  0x6b   : > { %3401 = vmatmul.mubr.msk.bf16.gmra.mrb[44].mxu1 %vm620_vm0, %v3484_v50  ;;  %3340 = vmatprep.mubr.msk.bf16.mxu0 %vm620_vm0, %v3485_v51 }
  0x6c   : > { %3404 = vmatprep.mubr.msk.bf16.mxu1 %vm620_vm0, %v3486_v52 }
  0x72   : > { %3341 = vmatmul.mubr.msk.bf16.gmra.mrb[48].mxu0 %vm620_vm0, %v3487_v53 }
  0x73   : > { %3405 = vmatmul.mubr.msk.bf16.gmra.mrb[48].mxu1 %vm620_vm0, %v3488_v54  ;;  %3344 = vmatprep.mubr.msk.bf16.mxu0 %vm620_vm0, %v3489_v55 }
  0x74   : > { %3408 = vmatprep.mubr.msk.bf16.mxu1 %vm620_vm0, %v3490_v56 }
  0x7a   : > { %3345 = vmatmul.mubr.msk.bf16.gmra.mrb[52].mxu0 %vm620_vm0, %v3491_v57 }
  0x7b   : > { %3409 = vmatmul.mubr.msk.bf16.gmra.mrb[52].mxu1 %vm620_vm0, %v3492_v58  ;;  %3348 = vmatprep.mubr.msk.bf16.mxu0 %vm620_vm0, %v3493_v59 }
  0x7c   : > { %3412 = vmatprep.mubr.msk.bf16.mxu1 %vm620_vm0, %v3494_v60 }
  0x82   : > { %3349 = vmatmul.mubr.msk.bf16.gmra.mrb[56].mxu0 %vm620_vm0, %v3495_v61 }
  0x83   : > { %3413 = vmatmul.mubr.msk.bf16.gmra.mrb[56].mxu1 %vm620_vm0, %v3496_v62  ;;  %3352 = vmatprep.mubr.msk.bf16.mxu0 %vm620_vm0, %v3497_v63 }
  0x84   : > { %3416 = vmatprep.mubr.msk.bf16.mxu1 %vm620_vm0, %v3498_v0 }
  0x8a   : > { %3353 = vmatmul.mubr.msk.bf16.gmra.mrb[60].mxu0 %vm620_vm0, %v3499_v1 }
  0x8b   : > { %3417 = vmatmul.mubr.msk.bf16.gmra.mrb[60].mxu1 %vm620_vm0, %v3500_v2 }
  0xe5   : > { %v3294_v3 = vpop.f32.mrb[0].mxu0 }
  0xe6   : > { %v3358_v4 = vpop.f32.mrb[0].mxu1  ;;  %vm1360_vm1 = vcmp.gt.f32.partialorder %v3294_v3, 0.0  ;;  %v1488_v5 = vmul.f32 0.2, %v3294_v3  ;;  %v847_v7 = vpop.f32.mrb[1].mxu0 }
  0xe7   : > { %v1552_v6 = vmul.f32 0.2, %v3358_v4  ;;  %vm1424_vm2 = vcmp.gt.f32.partialorder %v3358_v4, 0.0  ;;  %v1103_v8 = vpop.f32.mrb[1].mxu1  ;;  %v1486_v9 = vmul.f32 0.2, %v847_v7 }
  0xe8   : > { %v3295_v10 = vpop.f32.mrb[2].mxu0  ;;  %v3359_v11 = vpop.f32.mrb[2].mxu1  ;;  %v1616_v12 = vsel %vm1360_vm1, %v3294_v3, %v1488_v5  ;;  %v1550_v13 = vmul.f32 0.2, %v1103_v8  ;;  %vm1358_vm4 = vcmp.gt.f32.partialorder %v847_v7, 0.0  ;;  %vm1422_vm6 = vcmp.gt.f32.partialorder %v1103_v8, 0.0 }
  0xe9   : > { %vm1361_vm3 = vcmp.gt.f32.partialorder %v3295_v10, 0.0  ;;  %v1489_v14 = vmul.f32 0.2, %v3295_v10  ;;  %v1680_v15 = vsel %vm1424_vm2, %v3358_v4, %v1552_v6  ;;  %vm1425_vm5 = vcmp.gt.f32.partialorder %v3359_v11, 0.0  ;;  %v850_v17 = vpop.f32.mrb[3].mxu0  ;;  %v1106_v18 = vpop.f32.mrb[3].mxu1 }
  0xea   : > { %v1553_v16 = vmul.f32 0.2, %v3359_v11  ;;  %vm1359_vm7 = vcmp.gt.f32.partialorder %v850_v17, 0.0  ;;  %v1487_v20 = vmul.f32 0.2, %v850_v17  ;;  %vm1423_vm8 = vcmp.gt.f32.partialorder %v1106_v18, 0.0 }
  0xeb   : > { %v1617_v19 = vsel %vm1361_vm3, %v3295_v10, %v1489_v14  ;;  %v1551_v23 = vmul.f32 0.2, %v1106_v18  ;;  %v1614_v24 = vsel %vm1358_vm4, %v847_v7, %v1486_v9  ;;  %v1678_v29 = vsel %vm1422_vm6, %v1103_v8, %v1550_v13 }
  0xec   : > { %v2844_v21 = vpack.c.bf16 %v1617_v19, %v1616_v12  ;;  %v1681_v22 = vsel %vm1425_vm5, %v3359_v11, %v1553_v16  ;;  %v1615_v26 = vsel %vm1359_vm7, %v850_v17, %v1487_v20 }
  0xed   : > { %v3004_v25 = vpack.c.bf16 %v1681_v22, %v1680_v15  ;;  %v3298_v27 = vpop.f32.mrb[4].mxu0  ;;  %v2839_v30 = vpack.c.bf16 %v1615_v26, %v1614_v24  ;;  %v1679_v31 = vsel %vm1423_vm8, %v1106_v18, %v1551_v23 }
  0xee   : > { %v3362_v28 = vpop.f32.mrb[4].mxu1  ;;  %3156 = vst [vmem:[%s3684_s24 + $0x8] sm:$0xff] %v2844_v21   ;;  %v1492_v32 = vmul.f32 0.2, %v3298_v27  ;;  %v863_v33 = vpop.f32.mrb[5].mxu0  ;;  %v2999_v35 = vpack.c.bf16 %v1679_v31, %v1678_v29  ;;  %vm1364_vm9 = vcmp.gt.f32.partialorder %v3298_v27, 0.0 }
  0xef   : > { %v1119_v34 = vpop.f32.mrb[5].mxu1  ;;  %3188 = vst [vmem:[%s3684_s24 + $0x108] sm:$0xff] %v3004_v25   ;;  %v1556_v36 = vmul.f32 0.2, %v3362_v28  ;;  %v3299_v37 = vpop.f32.mrb[6].mxu0  ;;  %2840 = vst [vmem:[%s3684_s24] sm:$0xff] %v2839_v30   ;;  %vm1428_vm10 = vcmp.gt.f32.partialorder %v3362_v28, 0.0 }
  0xf0   : > { %v3363_v38 = vpop.f32.mrb[6].mxu1  ;;  %v1490_v39 = vmul.f32 0.2, %v863_v33  ;;  %v1554_v40 = vmul.f32 0.2, %v1119_v34  ;;  %v866_v41 = vpop.f32.mrb[7].mxu0  ;;  %v1620_v44 = vsel %vm1364_vm9, %v3298_v27, %v1492_v32 }
  0xf1   : > { %3187 = vst [vmem:[%s3684_s24 + $0x100] sm:$0xff] %v2999_v35   ;;  %vm1362_vm11 = vcmp.gt.f32.partialorder %v863_v33, 0.0  ;;  %vm1365_vm12 = vcmp.gt.f32.partialorder %v3299_v37, 0.0  ;;  %v1493_v42 = vmul.f32 0.2, %v3299_v37  ;;  %vm1429_vm13 = vcmp.gt.f32.partialorder %v3363_v38, 0.0 }
  0xf2   : > { %v1122_v43 = vpop.f32.mrb[7].mxu1  ;;  %vm1426_vm14 = vcmp.gt.f32.partialorder %v1119_v34, 0.0  ;;  %v1557_v45 = vmul.f32 0.2, %v3363_v38  ;;  %vm1363_vm15 = vcmp.gt.f32.partialorder %v866_v41, 0.0  ;;  %v1684_v49 = vsel %vm1428_vm10, %v3362_v28, %v1556_v36 }
  0xf3   : > { %v1621_v46 = vsel %vm1365_vm12, %v3299_v37, %v1493_v42  ;;  %v1491_v47 = vmul.f32 0.2, %v866_v41  ;;  %vm1427_vm0 = vcmp.gt.f32.partialorder %v1122_v43, 0.0  ;;  %v1555_v48 = vmul.f32 0.2, %v1122_v43 }
  0xf4   : > { %v1618_v50 = vsel %vm1362_vm11, %v863_v33, %v1490_v39  ;;  %v2854_v51 = vpack.c.bf16 %v1621_v46, %v1620_v44  ;;  %v1685_v52 = vsel %vm1429_vm13, %v3363_v38, %v1557_v45  ;;  %v1682_v53 = vsel %vm1426_vm14, %v1119_v34, %v1554_v40 }
  0xf5   : > { %v3014_v54 = vpack.c.bf16 %v1685_v52, %v1684_v49  ;;  %v1619_v55 = vsel %vm1363_vm15, %v866_v41, %v1491_v47  ;;  %v1683_v56 = vsel %vm1427_vm0, %v1122_v43, %v1555_v48  ;;  %v3302_v57 = vpop.f32.mrb[8].mxu0 }
  0xf6   : > { %v3366_v58 = vpop.f32.mrb[8].mxu1  ;;  %3158 = vst [vmem:[%s3684_s24 + $0x18] sm:$0xff] %v2854_v51   ;;  %v2849_v59 = vpack.c.bf16 %v1619_v55, %v1618_v50  ;;  %v3009_v60 = vpack.c.bf16 %v1683_v56, %v1682_v53  ;;  %vm1368_vm1 = vcmp.gt.f32.partialorder %v3302_v57, 0.0  ;;  %v1496_v61 = vmul.f32 0.2, %v3302_v57  ;;  %v879_v62 = vpop.f32.mrb[9].mxu0 }
  0xf7   : > { %v1135_v63 = vpop.f32.mrb[9].mxu1  ;;  %3190 = vst [vmem:[%s3684_s24 + $0x118] sm:$0xff] %v3014_v54   ;;  %vm1432_vm2 = vcmp.gt.f32.partialorder %v3366_v58, 0.0  ;;  %v1560_v0 = vmul.f32 0.2, %v3366_v58  ;;  %v3303_v3 = vpop.f32.mrb[10].mxu0 }
  0xf8   : > { %3157 = vst [vmem:[%s3684_s24 + $0x10] sm:$0xff] %v2849_v59   ;;  %3189 = vst [vmem:[%s3684_s24 + $0x110] sm:$0xff] %v3009_v60   ;;  %v1494_v1 = vmul.f32 0.2, %v879_v62  ;;  %v1558_v2 = vmul.f32 0.2, %v1135_v63  ;;  %v1624_v5 = vsel %vm1368_vm1, %v3302_v57, %v1496_v61 }
  0xf9   : > { %v3367_v4 = vpop.f32.mrb[10].mxu1  ;;  %vm1366_vm3 = vcmp.gt.f32.partialorder %v879_v62, 0.0  ;;  %vm1369_vm4 = vcmp.gt.f32.partialorder %v3303_v3, 0.0  ;;  %v1497_v6 = vmul.f32 0.2, %v3303_v3  ;;  %v882_v7 = vpop.f32.mrb[11].mxu0  ;;  %v1688_v13 = vsel %vm1432_vm2, %v3366_v58, %v1560_v0 }
  0xfa   : > { %v1138_v8 = vpop.f32.mrb[11].mxu1  ;;  %vm1430_vm5 = vcmp.gt.f32.partialorder %v1135_v63, 0.0  ;;  %vm1433_vm6 = vcmp.gt.f32.partialorder %v3367_v4, 0.0  ;;  %v1561_v9 = vmul.f32 0.2, %v3367_v4  ;;  %vm1367_vm7 = vcmp.gt.f32.partialorder %v882_v7, 0.0 }
  0xfb   : > { %v1625_v10 = vsel %vm1369_vm4, %v3303_v3, %v1497_v6  ;;  %v1495_v11 = vmul.f32 0.2, %v882_v7  ;;  %vm1431_vm8 = vcmp.gt.f32.partialorder %v1138_v8, 0.0  ;;  %v1559_v12 = vmul.f32 0.2, %v1138_v8 }
  0xfc   : > { %v1622_v14 = vsel %vm1366_vm3, %v879_v62, %v1494_v1  ;;  %v2864_v15 = vpack.c.bf16 %v1625_v10, %v1624_v5  ;;  %v1689_v16 = vsel %vm1433_vm6, %v3367_v4, %v1561_v9  ;;  %v1686_v17 = vsel %vm1430_vm5, %v1135_v63, %v1558_v2 }
  0xfd   : > { %v3024_v18 = vpack.c.bf16 %v1689_v16, %v1688_v13  ;;  %v1623_v19 = vsel %vm1367_vm7, %v882_v7, %v1495_v11  ;;  %v1687_v20 = vsel %vm1431_vm8, %v1138_v8, %v1559_v12  ;;  %v3306_v21 = vpop.f32.mrb[12].mxu0 }
  0xfe   : > { %v3370_v22 = vpop.f32.mrb[12].mxu1  ;;  %3160 = vst [vmem:[%s3684_s24 + $0x28] sm:$0xff] %v2864_v15   ;;  %v2859_v23 = vpack.c.bf16 %v1623_v19, %v1622_v14  ;;  %v3019_v24 = vpack.c.bf16 %v1687_v20, %v1686_v17  ;;  %vm1372_vm9 = vcmp.gt.f32.partialorder %v3306_v21, 0.0  ;;  %v1500_v25 = vmul.f32 0.2, %v3306_v21  ;;  %v895_v26 = vpop.f32.mrb[13].mxu0 }
  0xff   : > { %v1151_v27 = vpop.f32.mrb[13].mxu1  ;;  %3192 = vst [vmem:[%s3684_s24 + $0x128] sm:$0xff] %v3024_v18   ;;  %vm1436_vm10 = vcmp.gt.f32.partialorder %v3370_v22, 0.0  ;;  %v1564_v28 = vmul.f32 0.2, %v3370_v22  ;;  %v3307_v31 = vpop.f32.mrb[14].mxu0 }
 0x100   : > { %3159 = vst [vmem:[%s3684_s24 + $0x20] sm:$0xff] %v2859_v23   ;;  %3191 = vst [vmem:[%s3684_s24 + $0x120] sm:$0xff] %v3019_v24   ;;  %v1498_v29 = vmul.f32 0.2, %v895_v26  ;;  %v1562_v30 = vmul.f32 0.2, %v1151_v27  ;;  %v1628_v33 = vsel %vm1372_vm9, %v3306_v21, %v1500_v25 }
 0x101   : > { %v3371_v32 = vpop.f32.mrb[14].mxu1  ;;  %vm1370_vm11 = vcmp.gt.f32.partialorder %v895_v26, 0.0  ;;  %vm1373_vm12 = vcmp.gt.f32.partialorder %v3307_v31, 0.0  ;;  %v1501_v34 = vmul.f32 0.2, %v3307_v31  ;;  %v898_v35 = vpop.f32.mrb[15].mxu0  ;;  %v1692_v41 = vsel %vm1436_vm10, %v3370_v22, %v1564_v28 }
 0x102   : > { %v1154_v36 = vpop.f32.mrb[15].mxu1  ;;  %vm1434_vm13 = vcmp.gt.f32.partialorder %v1151_v27, 0.0  ;;  %vm1437_vm14 = vcmp.gt.f32.partialorder %v3371_v32, 0.0  ;;  %v1565_v37 = vmul.f32 0.2, %v3371_v32  ;;  %vm1371_vm15 = vcmp.gt.f32.partialorder %v898_v35, 0.0 }
 0x103   : > { %v1629_v38 = vsel %vm1373_vm12, %v3307_v31, %v1501_v34  ;;  %v1499_v39 = vmul.f32 0.2, %v898_v35  ;;  %vm1435_vm0 = vcmp.gt.f32.partialorder %v1154_v36, 0.0  ;;  %v1563_v40 = vmul.f32 0.2, %v1154_v36 }
 0x104   : > { %v1626_v42 = vsel %vm1370_vm11, %v895_v26, %v1498_v29  ;;  %v2874_v43 = vpack.c.bf16 %v1629_v38, %v1628_v33  ;;  %v1693_v44 = vsel %vm1437_vm14, %v3371_v32, %v1565_v37  ;;  %v1690_v45 = vsel %vm1434_vm13, %v1151_v27, %v1562_v30 }
 0x105   : > { %v3034_v46 = vpack.c.bf16 %v1693_v44, %v1692_v41  ;;  %v1627_v47 = vsel %vm1371_vm15, %v898_v35, %v1499_v39  ;;  %v1691_v48 = vsel %vm1435_vm0, %v1154_v36, %v1563_v40  ;;  %v3310_v49 = vpop.f32.mrb[16].mxu0 }
 0x106   : > { %v3374_v50 = vpop.f32.mrb[16].mxu1  ;;  %3162 = vst [vmem:[%s3684_s24 + $0x38] sm:$0xff] %v2874_v43   ;;  %v2869_v51 = vpack.c.bf16 %v1627_v47, %v1626_v42  ;;  %v3029_v52 = vpack.c.bf16 %v1691_v48, %v1690_v45  ;;  %vm1376_vm1 = vcmp.gt.f32.partialorder %v3310_v49, 0.0  ;;  %v1504_v53 = vmul.f32 0.2, %v3310_v49  ;;  %v911_v54 = vpop.f32.mrb[17].mxu0 }
 0x107   : > { %v1167_v55 = vpop.f32.mrb[17].mxu1  ;;  %3194 = vst [vmem:[%s3684_s24 + $0x138] sm:$0xff] %v3034_v46   ;;  %vm1440_vm2 = vcmp.gt.f32.partialorder %v3374_v50, 0.0  ;;  %v1568_v56 = vmul.f32 0.2, %v3374_v50  ;;  %v3311_v59 = vpop.f32.mrb[18].mxu0 }
 0x108   : > { %3161 = vst [vmem:[%s3684_s24 + $0x30] sm:$0xff] %v2869_v51   ;;  %3193 = vst [vmem:[%s3684_s24 + $0x130] sm:$0xff] %v3029_v52   ;;  %v1502_v57 = vmul.f32 0.2, %v911_v54  ;;  %v1566_v58 = vmul.f32 0.2, %v1167_v55  ;;  %v1632_v61 = vsel %vm1376_vm1, %v3310_v49, %v1504_v53 }
 0x109   : > { %v3375_v60 = vpop.f32.mrb[18].mxu1  ;;  %vm1374_vm3 = vcmp.gt.f32.partialorder %v911_v54, 0.0  ;;  %vm1377_vm4 = vcmp.gt.f32.partialorder %v3311_v59, 0.0  ;;  %v1505_v62 = vmul.f32 0.2, %v3311_v59  ;;  %v914_v63 = vpop.f32.mrb[19].mxu0  ;;  %v1696_v5 = vsel %vm1440_vm2, %v3374_v50, %v1568_v56 }
 0x10a   : > { %v1170_v0 = vpop.f32.mrb[19].mxu1  ;;  %vm1438_vm5 = vcmp.gt.f32.partialorder %v1167_v55, 0.0  ;;  %vm1441_vm6 = vcmp.gt.f32.partialorder %v3375_v60, 0.0  ;;  %v1569_v1 = vmul.f32 0.2, %v3375_v60  ;;  %vm1375_vm7 = vcmp.gt.f32.partialorder %v914_v63, 0.0 }
 0x10b   : > { %v1633_v2 = vsel %vm1377_vm4, %v3311_v59, %v1505_v62  ;;  %v1503_v3 = vmul.f32 0.2, %v914_v63  ;;  %vm1439_vm8 = vcmp.gt.f32.partialorder %v1170_v0, 0.0  ;;  %v1567_v4 = vmul.f32 0.2, %v1170_v0 }
 0x10c   : > { %v1630_v6 = vsel %vm1374_vm3, %v911_v54, %v1502_v57  ;;  %v2884_v7 = vpack.c.bf16 %v1633_v2, %v1632_v61  ;;  %v1697_v8 = vsel %vm1441_vm6, %v3375_v60, %v1569_v1  ;;  %v1694_v9 = vsel %vm1438_vm5, %v1167_v55, %v1566_v58 }
 0x10d   : > { %v3044_v10 = vpack.c.bf16 %v1697_v8, %v1696_v5  ;;  %v1631_v11 = vsel %vm1375_vm7, %v914_v63, %v1503_v3  ;;  %v1695_v12 = vsel %vm1439_vm8, %v1170_v0, %v1567_v4  ;;  %v3314_v13 = vpop.f32.mrb[20].mxu0 }
 0x10e   : > { %v3378_v14 = vpop.f32.mrb[20].mxu1  ;;  %3164 = vst [vmem:[%s3684_s24 + $0x48] sm:$0xff] %v2884_v7   ;;  %v2879_v15 = vpack.c.bf16 %v1631_v11, %v1630_v6  ;;  %v3039_v16 = vpack.c.bf16 %v1695_v12, %v1694_v9  ;;  %vm1380_vm9 = vcmp.gt.f32.partialorder %v3314_v13, 0.0  ;;  %v1508_v17 = vmul.f32 0.2, %v3314_v13  ;;  %v927_v18 = vpop.f32.mrb[21].mxu0 }
 0x10f   : > { %v1183_v19 = vpop.f32.mrb[21].mxu1  ;;  %3196 = vst [vmem:[%s3684_s24 + $0x148] sm:$0xff] %v3044_v10   ;;  %vm1444_vm10 = vcmp.gt.f32.partialorder %v3378_v14, 0.0  ;;  %v1572_v20 = vmul.f32 0.2, %v3378_v14  ;;  %v3315_v23 = vpop.f32.mrb[22].mxu0 }
 0x110   : > { %3163 = vst [vmem:[%s3684_s24 + $0x40] sm:$0xff] %v2879_v15   ;;  %3195 = vst [vmem:[%s3684_s24 + $0x140] sm:$0xff] %v3039_v16   ;;  %v1506_v21 = vmul.f32 0.2, %v927_v18  ;;  %v1570_v22 = vmul.f32 0.2, %v1183_v19  ;;  %v1636_v25 = vsel %vm1380_vm9, %v3314_v13, %v1508_v17 }
 0x111   : > { %v3379_v24 = vpop.f32.mrb[22].mxu1  ;;  %vm1378_vm11 = vcmp.gt.f32.partialorder %v927_v18, 0.0  ;;  %vm1381_vm12 = vcmp.gt.f32.partialorder %v3315_v23, 0.0  ;;  %v1509_v26 = vmul.f32 0.2, %v3315_v23  ;;  %v930_v27 = vpop.f32.mrb[23].mxu0  ;;  %v1700_v33 = vsel %vm1444_vm10, %v3378_v14, %v1572_v20 }
 0x112   : > { %v1186_v28 = vpop.f32.mrb[23].mxu1  ;;  %vm1442_vm13 = vcmp.gt.f32.partialorder %v1183_v19, 0.0  ;;  %vm1445_vm14 = vcmp.gt.f32.partialorder %v3379_v24, 0.0  ;;  %v1573_v29 = vmul.f32 0.2, %v3379_v24  ;;  %vm1379_vm15 = vcmp.gt.f32.partialorder %v930_v27, 0.0 }
 0x113   : > { %v1637_v30 = vsel %vm1381_vm12, %v3315_v23, %v1509_v26  ;;  %v1507_v31 = vmul.f32 0.2, %v930_v27  ;;  %vm1443_vm0 = vcmp.gt.f32.partialorder %v1186_v28, 0.0  ;;  %v1571_v32 = vmul.f32 0.2, %v1186_v28 }
 0x114   : > { %v1634_v34 = vsel %vm1378_vm11, %v927_v18, %v1506_v21  ;;  %v2894_v35 = vpack.c.bf16 %v1637_v30, %v1636_v25  ;;  %v1701_v36 = vsel %vm1445_vm14, %v3379_v24, %v1573_v29  ;;  %v1698_v37 = vsel %vm1442_vm13, %v1183_v19, %v1570_v22 }
 0x115   : > { %v3054_v38 = vpack.c.bf16 %v1701_v36, %v1700_v33  ;;  %v1635_v39 = vsel %vm1379_vm15, %v930_v27, %v1507_v31  ;;  %v1699_v40 = vsel %vm1443_vm0, %v1186_v28, %v1571_v32  ;;  %v3318_v41 = vpop.f32.mrb[24].mxu0 }
 0x116   : > { %v3382_v42 = vpop.f32.mrb[24].mxu1  ;;  %3166 = vst [vmem:[%s3684_s24 + $0x58] sm:$0xff] %v2894_v35   ;;  %v2889_v43 = vpack.c.bf16 %v1635_v39, %v1634_v34  ;;  %v3049_v44 = vpack.c.bf16 %v1699_v40, %v1698_v37  ;;  %vm1384_vm1 = vcmp.gt.f32.partialorder %v3318_v41, 0.0  ;;  %v1512_v45 = vmul.f32 0.2, %v3318_v41  ;;  %v943_v46 = vpop.f32.mrb[25].mxu0 }
 0x117   : > { %v1199_v47 = vpop.f32.mrb[25].mxu1  ;;  %3198 = vst [vmem:[%s3684_s24 + $0x158] sm:$0xff] %v3054_v38   ;;  %vm1448_vm2 = vcmp.gt.f32.partialorder %v3382_v42, 0.0  ;;  %v1576_v48 = vmul.f32 0.2, %v3382_v42  ;;  %v3319_v51 = vpop.f32.mrb[26].mxu0 }
 0x118   : > { %3165 = vst [vmem:[%s3684_s24 + $0x50] sm:$0xff] %v2889_v43   ;;  %3197 = vst [vmem:[%s3684_s24 + $0x150] sm:$0xff] %v3049_v44   ;;  %v1510_v49 = vmul.f32 0.2, %v943_v46  ;;  %v1574_v50 = vmul.f32 0.2, %v1199_v47  ;;  %v1640_v53 = vsel %vm1384_vm1, %v3318_v41, %v1512_v45 }
 0x119   : > { %v3383_v52 = vpop.f32.mrb[26].mxu1  ;;  %vm1382_vm3 = vcmp.gt.f32.partialorder %v943_v46, 0.0  ;;  %vm1385_vm4 = vcmp.gt.f32.partialorder %v3319_v51, 0.0  ;;  %v1513_v54 = vmul.f32 0.2, %v3319_v51  ;;  %v946_v55 = vpop.f32.mrb[27].mxu0  ;;  %v1704_v61 = vsel %vm1448_vm2, %v3382_v42, %v1576_v48 }
 0x11a   : > { %v1202_v56 = vpop.f32.mrb[27].mxu1  ;;  %vm1446_vm5 = vcmp.gt.f32.partialorder %v1199_v47, 0.0  ;;  %vm1449_vm6 = vcmp.gt.f32.partialorder %v3383_v52, 0.0  ;;  %v1577_v57 = vmul.f32 0.2, %v3383_v52  ;;  %vm1383_vm7 = vcmp.gt.f32.partialorder %v946_v55, 0.0 }
 0x11b   : > { %v1641_v58 = vsel %vm1385_vm4, %v3319_v51, %v1513_v54  ;;  %v1511_v59 = vmul.f32 0.2, %v946_v55  ;;  %vm1447_vm8 = vcmp.gt.f32.partialorder %v1202_v56, 0.0  ;;  %v1575_v60 = vmul.f32 0.2, %v1202_v56 }
 0x11c   : > { %v1638_v62 = vsel %vm1382_vm3, %v943_v46, %v1510_v49  ;;  %v2904_v63 = vpack.c.bf16 %v1641_v58, %v1640_v53  ;;  %v1705_v0 = vsel %vm1449_vm6, %v3383_v52, %v1577_v57  ;;  %v1702_v1 = vsel %vm1446_vm5, %v1199_v47, %v1574_v50 }
 0x11d   : > { %v3064_v2 = vpack.c.bf16 %v1705_v0, %v1704_v61  ;;  %v1639_v3 = vsel %vm1383_vm7, %v946_v55, %v1511_v59  ;;  %v1703_v4 = vsel %vm1447_vm8, %v1202_v56, %v1575_v60  ;;  %v3322_v5 = vpop.f32.mrb[28].mxu0 }
 0x11e   : > { %v3386_v6 = vpop.f32.mrb[28].mxu1  ;;  %3168 = vst [vmem:[%s3684_s24 + $0x68] sm:$0xff] %v2904_v63   ;;  %v2899_v7 = vpack.c.bf16 %v1639_v3, %v1638_v62  ;;  %v3059_v8 = vpack.c.bf16 %v1703_v4, %v1702_v1  ;;  %vm1388_vm9 = vcmp.gt.f32.partialorder %v3322_v5, 0.0  ;;  %v1516_v9 = vmul.f32 0.2, %v3322_v5  ;;  %v959_v10 = vpop.f32.mrb[29].mxu0 }
 0x11f   : > { %v1215_v11 = vpop.f32.mrb[29].mxu1  ;;  %3200 = vst [vmem:[%s3684_s24 + $0x168] sm:$0xff] %v3064_v2   ;;  %vm1452_vm10 = vcmp.gt.f32.partialorder %v3386_v6, 0.0  ;;  %v1580_v12 = vmul.f32 0.2, %v3386_v6  ;;  %v3323_v15 = vpop.f32.mrb[30].mxu0 }
 0x120   : > { %3167 = vst [vmem:[%s3684_s24 + $0x60] sm:$0xff] %v2899_v7   ;;  %3199 = vst [vmem:[%s3684_s24 + $0x160] sm:$0xff] %v3059_v8   ;;  %v1514_v13 = vmul.f32 0.2, %v959_v10  ;;  %v1578_v14 = vmul.f32 0.2, %v1215_v11  ;;  %v1644_v17 = vsel %vm1388_vm9, %v3322_v5, %v1516_v9 }
 0x121   : > { %v3387_v16 = vpop.f32.mrb[30].mxu1  ;;  %vm1386_vm11 = vcmp.gt.f32.partialorder %v959_v10, 0.0  ;;  %vm1389_vm12 = vcmp.gt.f32.partialorder %v3323_v15, 0.0  ;;  %v1517_v18 = vmul.f32 0.2, %v3323_v15  ;;  %v962_v19 = vpop.f32.mrb[31].mxu0  ;;  %v1708_v25 = vsel %vm1452_vm10, %v3386_v6, %v1580_v12 }
 0x122   : > { %v1218_v20 = vpop.f32.mrb[31].mxu1  ;;  %vm1450_vm13 = vcmp.gt.f32.partialorder %v1215_v11, 0.0  ;;  %vm1453_vm14 = vcmp.gt.f32.partialorder %v3387_v16, 0.0  ;;  %v1581_v21 = vmul.f32 0.2, %v3387_v16  ;;  %vm1387_vm15 = vcmp.gt.f32.partialorder %v962_v19, 0.0 }
 0x123   : > { %v1645_v22 = vsel %vm1389_vm12, %v3323_v15, %v1517_v18  ;;  %v1515_v23 = vmul.f32 0.2, %v962_v19  ;;  %vm1451_vm0 = vcmp.gt.f32.partialorder %v1218_v20, 0.0  ;;  %v1579_v24 = vmul.f32 0.2, %v1218_v20 }
 0x124   : > { %v1642_v26 = vsel %vm1386_vm11, %v959_v10, %v1514_v13  ;;  %v2914_v27 = vpack.c.bf16 %v1645_v22, %v1644_v17  ;;  %v1709_v28 = vsel %vm1453_vm14, %v3387_v16, %v1581_v21  ;;  %v1706_v29 = vsel %vm1450_vm13, %v1215_v11, %v1578_v14 }
 0x125   : > { %v3074_v30 = vpack.c.bf16 %v1709_v28, %v1708_v25  ;;  %v1643_v31 = vsel %vm1387_vm15, %v962_v19, %v1515_v23  ;;  %v1707_v32 = vsel %vm1451_vm0, %v1218_v20, %v1579_v24  ;;  %v3326_v33 = vpop.f32.mrb[32].mxu0 }
 0x126   : > { %v3390_v34 = vpop.f32.mrb[32].mxu1  ;;  %3170 = vst [vmem:[%s3684_s24 + $0x78] sm:$0xff] %v2914_v27   ;;  %v2909_v35 = vpack.c.bf16 %v1643_v31, %v1642_v26  ;;  %v3069_v36 = vpack.c.bf16 %v1707_v32, %v1706_v29  ;;  %vm1392_vm1 = vcmp.gt.f32.partialorder %v3326_v33, 0.0  ;;  %v1520_v37 = vmul.f32 0.2, %v3326_v33  ;;  %v975_v38 = vpop.f32.mrb[33].mxu0 }
 0x127   : > { %v1231_v39 = vpop.f32.mrb[33].mxu1  ;;  %3202 = vst [vmem:[%s3684_s24 + $0x178] sm:$0xff] %v3074_v30   ;;  %vm1456_vm2 = vcmp.gt.f32.partialorder %v3390_v34, 0.0  ;;  %v1584_v40 = vmul.f32 0.2, %v3390_v34  ;;  %v3327_v43 = vpop.f32.mrb[34].mxu0 }
 0x128   : > { %3169 = vst [vmem:[%s3684_s24 + $0x70] sm:$0xff] %v2909_v35   ;;  %3201 = vst [vmem:[%s3684_s24 + $0x170] sm:$0xff] %v3069_v36   ;;  %v1518_v41 = vmul.f32 0.2, %v975_v38  ;;  %v1582_v42 = vmul.f32 0.2, %v1231_v39  ;;  %v1648_v45 = vsel %vm1392_vm1, %v3326_v33, %v1520_v37 }
 0x129   : > { %v3391_v44 = vpop.f32.mrb[34].mxu1  ;;  %vm1390_vm3 = vcmp.gt.f32.partialorder %v975_v38, 0.0  ;;  %vm1393_vm4 = vcmp.gt.f32.partialorder %v3327_v43, 0.0  ;;  %v1521_v46 = vmul.f32 0.2, %v3327_v43  ;;  %v978_v47 = vpop.f32.mrb[35].mxu0  ;;  %v1712_v53 = vsel %vm1456_vm2, %v3390_v34, %v1584_v40 }
 0x12a   : > { %v1234_v48 = vpop.f32.mrb[35].mxu1  ;;  %vm1454_vm5 = vcmp.gt.f32.partialorder %v1231_v39, 0.0  ;;  %vm1457_vm6 = vcmp.gt.f32.partialorder %v3391_v44, 0.0  ;;  %v1585_v49 = vmul.f32 0.2, %v3391_v44  ;;  %vm1391_vm7 = vcmp.gt.f32.partialorder %v978_v47, 0.0 }
 0x12b   : > { %v1649_v50 = vsel %vm1393_vm4, %v3327_v43, %v1521_v46  ;;  %v1519_v51 = vmul.f32 0.2, %v978_v47  ;;  %vm1455_vm8 = vcmp.gt.f32.partialorder %v1234_v48, 0.0  ;;  %v1583_v52 = vmul.f32 0.2, %v1234_v48 }
 0x12c   : > { %v1646_v54 = vsel %vm1390_vm3, %v975_v38, %v1518_v41  ;;  %v2924_v55 = vpack.c.bf16 %v1649_v50, %v1648_v45  ;;  %v1713_v56 = vsel %vm1457_vm6, %v3391_v44, %v1585_v49  ;;  %v1710_v57 = vsel %vm1454_vm5, %v1231_v39, %v1582_v42 }
 0x12d   : > { %v3084_v58 = vpack.c.bf16 %v1713_v56, %v1712_v53  ;;  %v1647_v59 = vsel %vm1391_vm7, %v978_v47, %v1519_v51  ;;  %v1711_v60 = vsel %vm1455_vm8, %v1234_v48, %v1583_v52  ;;  %v3330_v61 = vpop.f32.mrb[36].mxu0 }
 0x12e   : > { %v3394_v62 = vpop.f32.mrb[36].mxu1  ;;  %3172 = vst [vmem:[%s3684_s24 + $0x88] sm:$0xff] %v2924_v55   ;;  %v2919_v63 = vpack.c.bf16 %v1647_v59, %v1646_v54  ;;  %v3079_v0 = vpack.c.bf16 %v1711_v60, %v1710_v57  ;;  %vm1396_vm9 = vcmp.gt.f32.partialorder %v3330_v61, 0.0  ;;  %v1524_v1 = vmul.f32 0.2, %v3330_v61  ;;  %v991_v2 = vpop.f32.mrb[37].mxu0 }
 0x12f   : > { %v1247_v3 = vpop.f32.mrb[37].mxu1  ;;  %3204 = vst [vmem:[%s3684_s24 + $0x188] sm:$0xff] %v3084_v58   ;;  %vm1460_vm10 = vcmp.gt.f32.partialorder %v3394_v62, 0.0  ;;  %v1588_v4 = vmul.f32 0.2, %v3394_v62  ;;  %v3331_v7 = vpop.f32.mrb[38].mxu0 }
 0x130   : > { %3171 = vst [vmem:[%s3684_s24 + $0x80] sm:$0xff] %v2919_v63   ;;  %3203 = vst [vmem:[%s3684_s24 + $0x180] sm:$0xff] %v3079_v0   ;;  %v1522_v5 = vmul.f32 0.2, %v991_v2  ;;  %v1586_v6 = vmul.f32 0.2, %v1247_v3  ;;  %v1652_v9 = vsel %vm1396_vm9, %v3330_v61, %v1524_v1 }
 0x131   : > { %v3395_v8 = vpop.f32.mrb[38].mxu1  ;;  %vm1394_vm11 = vcmp.gt.f32.partialorder %v991_v2, 0.0  ;;  %vm1397_vm12 = vcmp.gt.f32.partialorder %v3331_v7, 0.0  ;;  %v1525_v10 = vmul.f32 0.2, %v3331_v7  ;;  %v994_v11 = vpop.f32.mrb[39].mxu0  ;;  %v1716_v17 = vsel %vm1460_vm10, %v3394_v62, %v1588_v4 }
 0x132   : > { %v1250_v12 = vpop.f32.mrb[39].mxu1  ;;  %vm1458_vm13 = vcmp.gt.f32.partialorder %v1247_v3, 0.0  ;;  %vm1461_vm14 = vcmp.gt.f32.partialorder %v3395_v8, 0.0  ;;  %v1589_v13 = vmul.f32 0.2, %v3395_v8  ;;  %vm1395_vm15 = vcmp.gt.f32.partialorder %v994_v11, 0.0 }
 0x133   : > { %v1653_v14 = vsel %vm1397_vm12, %v3331_v7, %v1525_v10  ;;  %v1523_v15 = vmul.f32 0.2, %v994_v11  ;;  %vm1459_vm0 = vcmp.gt.f32.partialorder %v1250_v12, 0.0  ;;  %v1587_v16 = vmul.f32 0.2, %v1250_v12 }
 0x134   : > { %v1650_v18 = vsel %vm1394_vm11, %v991_v2, %v1522_v5  ;;  %v2934_v19 = vpack.c.bf16 %v1653_v14, %v1652_v9  ;;  %v1717_v20 = vsel %vm1461_vm14, %v3395_v8, %v1589_v13  ;;  %v1714_v21 = vsel %vm1458_vm13, %v1247_v3, %v1586_v6 }
 0x135   : > { %v3094_v22 = vpack.c.bf16 %v1717_v20, %v1716_v17  ;;  %v1651_v23 = vsel %vm1395_vm15, %v994_v11, %v1523_v15  ;;  %v1715_v24 = vsel %vm1459_vm0, %v1250_v12, %v1587_v16  ;;  %v3334_v25 = vpop.f32.mrb[40].mxu0 }
 0x136   : > { %v3398_v26 = vpop.f32.mrb[40].mxu1  ;;  %3174 = vst [vmem:[%s3684_s24 + $0x98] sm:$0xff] %v2934_v19   ;;  %v2929_v27 = vpack.c.bf16 %v1651_v23, %v1650_v18  ;;  %v3089_v28 = vpack.c.bf16 %v1715_v24, %v1714_v21  ;;  %vm1400_vm1 = vcmp.gt.f32.partialorder %v3334_v25, 0.0  ;;  %v1528_v29 = vmul.f32 0.2, %v3334_v25  ;;  %v1007_v30 = vpop.f32.mrb[41].mxu0 }
 0x137   : > { %v1263_v31 = vpop.f32.mrb[41].mxu1  ;;  %3206 = vst [vmem:[%s3684_s24 + $0x198] sm:$0xff] %v3094_v22   ;;  %vm1464_vm2 = vcmp.gt.f32.partialorder %v3398_v26, 0.0  ;;  %v1592_v32 = vmul.f32 0.2, %v3398_v26  ;;  %v3335_v35 = vpop.f32.mrb[42].mxu0 }
 0x138   : > { %3173 = vst [vmem:[%s3684_s24 + $0x90] sm:$0xff] %v2929_v27   ;;  %3205 = vst [vmem:[%s3684_s24 + $0x190] sm:$0xff] %v3089_v28   ;;  %v1526_v33 = vmul.f32 0.2, %v1007_v30  ;;  %v1590_v34 = vmul.f32 0.2, %v1263_v31  ;;  %v1656_v37 = vsel %vm1400_vm1, %v3334_v25, %v1528_v29 }
 0x139   : > { %v3399_v36 = vpop.f32.mrb[42].mxu1  ;;  %vm1398_vm3 = vcmp.gt.f32.partialorder %v1007_v30, 0.0  ;;  %vm1401_vm4 = vcmp.gt.f32.partialorder %v3335_v35, 0.0  ;;  %v1529_v38 = vmul.f32 0.2, %v3335_v35  ;;  %v1010_v39 = vpop.f32.mrb[43].mxu0  ;;  %v1720_v45 = vsel %vm1464_vm2, %v3398_v26, %v1592_v32 }
 0x13a   : > { %v1266_v40 = vpop.f32.mrb[43].mxu1  ;;  %vm1462_vm5 = vcmp.gt.f32.partialorder %v1263_v31, 0.0  ;;  %vm1465_vm6 = vcmp.gt.f32.partialorder %v3399_v36, 0.0  ;;  %v1593_v41 = vmul.f32 0.2, %v3399_v36  ;;  %vm1399_vm7 = vcmp.gt.f32.partialorder %v1010_v39, 0.0 }
 0x13b   : > { %v1657_v42 = vsel %vm1401_vm4, %v3335_v35, %v1529_v38  ;;  %v1527_v43 = vmul.f32 0.2, %v1010_v39  ;;  %vm1463_vm8 = vcmp.gt.f32.partialorder %v1266_v40, 0.0  ;;  %v1591_v44 = vmul.f32 0.2, %v1266_v40 }
 0x13c   : > { %v1654_v46 = vsel %vm1398_vm3, %v1007_v30, %v1526_v33  ;;  %v2944_v47 = vpack.c.bf16 %v1657_v42, %v1656_v37  ;;  %v1721_v48 = vsel %vm1465_vm6, %v3399_v36, %v1593_v41  ;;  %v1718_v49 = vsel %vm1462_vm5, %v1263_v31, %v1590_v34 }
 0x13d   : > { %v3104_v50 = vpack.c.bf16 %v1721_v48, %v1720_v45  ;;  %v1655_v51 = vsel %vm1399_vm7, %v1010_v39, %v1527_v43  ;;  %v1719_v52 = vsel %vm1463_vm8, %v1266_v40, %v1591_v44  ;;  %v3338_v53 = vpop.f32.mrb[44].mxu0 }
 0x13e   : > { %v3402_v54 = vpop.f32.mrb[44].mxu1  ;;  %3176 = vst [vmem:[%s3684_s24 + $0xa8] sm:$0xff] %v2944_v47   ;;  %v2939_v55 = vpack.c.bf16 %v1655_v51, %v1654_v46  ;;  %v3099_v56 = vpack.c.bf16 %v1719_v52, %v1718_v49  ;;  %vm1404_vm9 = vcmp.gt.f32.partialorder %v3338_v53, 0.0  ;;  %v1532_v57 = vmul.f32 0.2, %v3338_v53  ;;  %v1023_v58 = vpop.f32.mrb[45].mxu0 }
 0x13f   : > { %v1279_v59 = vpop.f32.mrb[45].mxu1  ;;  %3208 = vst [vmem:[%s3684_s24 + $0x1a8] sm:$0xff] %v3104_v50   ;;  %vm1468_vm10 = vcmp.gt.f32.partialorder %v3402_v54, 0.0  ;;  %v1596_v60 = vmul.f32 0.2, %v3402_v54  ;;  %v3339_v63 = vpop.f32.mrb[46].mxu0 }
 0x140   : > { %3175 = vst [vmem:[%s3684_s24 + $0xa0] sm:$0xff] %v2939_v55   ;;  %3207 = vst [vmem:[%s3684_s24 + $0x1a0] sm:$0xff] %v3099_v56   ;;  %v1530_v61 = vmul.f32 0.2, %v1023_v58  ;;  %v1594_v62 = vmul.f32 0.2, %v1279_v59  ;;  %v1660_v1 = vsel %vm1404_vm9, %v3338_v53, %v1532_v57 }
 0x141   : > { %v3403_v0 = vpop.f32.mrb[46].mxu1  ;;  %vm1402_vm11 = vcmp.gt.f32.partialorder %v1023_v58, 0.0  ;;  %vm1405_vm12 = vcmp.gt.f32.partialorder %v3339_v63, 0.0  ;;  %v1533_v2 = vmul.f32 0.2, %v3339_v63  ;;  %v1026_v3 = vpop.f32.mrb[47].mxu0  ;;  %v1724_v9 = vsel %vm1468_vm10, %v3402_v54, %v1596_v60 }
 0x142   : > { %v1282_v4 = vpop.f32.mrb[47].mxu1  ;;  %vm1466_vm13 = vcmp.gt.f32.partialorder %v1279_v59, 0.0  ;;  %vm1469_vm14 = vcmp.gt.f32.partialorder %v3403_v0, 0.0  ;;  %v1597_v5 = vmul.f32 0.2, %v3403_v0  ;;  %vm1403_vm15 = vcmp.gt.f32.partialorder %v1026_v3, 0.0 }
 0x143   : > { %v1661_v6 = vsel %vm1405_vm12, %v3339_v63, %v1533_v2  ;;  %v1531_v7 = vmul.f32 0.2, %v1026_v3  ;;  %vm1467_vm0 = vcmp.gt.f32.partialorder %v1282_v4, 0.0  ;;  %v1595_v8 = vmul.f32 0.2, %v1282_v4 }
 0x144   : > { %v1658_v10 = vsel %vm1402_vm11, %v1023_v58, %v1530_v61  ;;  %v2954_v11 = vpack.c.bf16 %v1661_v6, %v1660_v1  ;;  %v1725_v12 = vsel %vm1469_vm14, %v3403_v0, %v1597_v5  ;;  %v1722_v13 = vsel %vm1466_vm13, %v1279_v59, %v1594_v62 }
 0x145   : > { %v3114_v14 = vpack.c.bf16 %v1725_v12, %v1724_v9  ;;  %v1659_v15 = vsel %vm1403_vm15, %v1026_v3, %v1531_v7  ;;  %v1723_v16 = vsel %vm1467_vm0, %v1282_v4, %v1595_v8  ;;  %v3342_v17 = vpop.f32.mrb[48].mxu0 }
 0x146   : > { %v3406_v18 = vpop.f32.mrb[48].mxu1  ;;  %3178 = vst [vmem:[%s3684_s24 + $0xb8] sm:$0xff] %v2954_v11   ;;  %v2949_v19 = vpack.c.bf16 %v1659_v15, %v1658_v10  ;;  %v3109_v20 = vpack.c.bf16 %v1723_v16, %v1722_v13  ;;  %vm1408_vm1 = vcmp.gt.f32.partialorder %v3342_v17, 0.0  ;;  %v1536_v21 = vmul.f32 0.2, %v3342_v17  ;;  %v1039_v22 = vpop.f32.mrb[49].mxu0 }
 0x147   : > { %v1295_v23 = vpop.f32.mrb[49].mxu1  ;;  %3210 = vst [vmem:[%s3684_s24 + $0x1b8] sm:$0xff] %v3114_v14   ;;  %vm1472_vm2 = vcmp.gt.f32.partialorder %v3406_v18, 0.0  ;;  %v1600_v24 = vmul.f32 0.2, %v3406_v18  ;;  %v3343_v27 = vpop.f32.mrb[50].mxu0 }
 0x148   : > { %3177 = vst [vmem:[%s3684_s24 + $0xb0] sm:$0xff] %v2949_v19   ;;  %3209 = vst [vmem:[%s3684_s24 + $0x1b0] sm:$0xff] %v3109_v20   ;;  %v1534_v25 = vmul.f32 0.2, %v1039_v22  ;;  %v1598_v26 = vmul.f32 0.2, %v1295_v23  ;;  %v1664_v29 = vsel %vm1408_vm1, %v3342_v17, %v1536_v21 }
 0x149   : > { %v3407_v28 = vpop.f32.mrb[50].mxu1  ;;  %vm1406_vm3 = vcmp.gt.f32.partialorder %v1039_v22, 0.0  ;;  %vm1409_vm4 = vcmp.gt.f32.partialorder %v3343_v27, 0.0  ;;  %v1537_v30 = vmul.f32 0.2, %v3343_v27  ;;  %v1042_v31 = vpop.f32.mrb[51].mxu0  ;;  %v1728_v37 = vsel %vm1472_vm2, %v3406_v18, %v1600_v24 }
 0x14a   : > { %v1298_v32 = vpop.f32.mrb[51].mxu1  ;;  %vm1470_vm5 = vcmp.gt.f32.partialorder %v1295_v23, 0.0  ;;  %vm1473_vm6 = vcmp.gt.f32.partialorder %v3407_v28, 0.0  ;;  %v1601_v33 = vmul.f32 0.2, %v3407_v28  ;;  %vm1407_vm7 = vcmp.gt.f32.partialorder %v1042_v31, 0.0 }
 0x14b   : > { %v1665_v34 = vsel %vm1409_vm4, %v3343_v27, %v1537_v30  ;;  %v1535_v35 = vmul.f32 0.2, %v1042_v31  ;;  %vm1471_vm8 = vcmp.gt.f32.partialorder %v1298_v32, 0.0  ;;  %v1599_v36 = vmul.f32 0.2, %v1298_v32 }
 0x14c   : > { %v1662_v38 = vsel %vm1406_vm3, %v1039_v22, %v1534_v25  ;;  %v2964_v39 = vpack.c.bf16 %v1665_v34, %v1664_v29  ;;  %v1729_v40 = vsel %vm1473_vm6, %v3407_v28, %v1601_v33  ;;  %v1726_v41 = vsel %vm1470_vm5, %v1295_v23, %v1598_v26 }
 0x14d   : > { %v3124_v42 = vpack.c.bf16 %v1729_v40, %v1728_v37  ;;  %v1663_v43 = vsel %vm1407_vm7, %v1042_v31, %v1535_v35  ;;  %v1727_v44 = vsel %vm1471_vm8, %v1298_v32, %v1599_v36  ;;  %v3346_v45 = vpop.f32.mrb[52].mxu0 }
 0x14e   : > { %v3410_v46 = vpop.f32.mrb[52].mxu1  ;;  %3180 = vst [vmem:[%s3684_s24 + $0xc8] sm:$0xff] %v2964_v39   ;;  %v2959_v47 = vpack.c.bf16 %v1663_v43, %v1662_v38  ;;  %v3119_v48 = vpack.c.bf16 %v1727_v44, %v1726_v41  ;;  %vm1412_vm9 = vcmp.gt.f32.partialorder %v3346_v45, 0.0  ;;  %v1540_v49 = vmul.f32 0.2, %v3346_v45  ;;  %v1055_v50 = vpop.f32.mrb[53].mxu0 }
 0x14f   : > { %v1311_v51 = vpop.f32.mrb[53].mxu1  ;;  %3212 = vst [vmem:[%s3684_s24 + $0x1c8] sm:$0xff] %v3124_v42   ;;  %vm1476_vm10 = vcmp.gt.f32.partialorder %v3410_v46, 0.0  ;;  %v1604_v52 = vmul.f32 0.2, %v3410_v46  ;;  %v3347_v55 = vpop.f32.mrb[54].mxu0 }
 0x150   : > { %3179 = vst [vmem:[%s3684_s24 + $0xc0] sm:$0xff] %v2959_v47   ;;  %3211 = vst [vmem:[%s3684_s24 + $0x1c0] sm:$0xff] %v3119_v48   ;;  %v1538_v53 = vmul.f32 0.2, %v1055_v50  ;;  %v1602_v54 = vmul.f32 0.2, %v1311_v51  ;;  %v1668_v57 = vsel %vm1412_vm9, %v3346_v45, %v1540_v49 }
 0x151   : > { %v3411_v56 = vpop.f32.mrb[54].mxu1  ;;  %vm1410_vm11 = vcmp.gt.f32.partialorder %v1055_v50, 0.0  ;;  %vm1413_vm12 = vcmp.gt.f32.partialorder %v3347_v55, 0.0  ;;  %v1541_v58 = vmul.f32 0.2, %v3347_v55  ;;  %v1058_v59 = vpop.f32.mrb[55].mxu0  ;;  %v1732_v1 = vsel %vm1476_vm10, %v3410_v46, %v1604_v52 }
 0x152   : > { %v1314_v60 = vpop.f32.mrb[55].mxu1  ;;  %vm1474_vm13 = vcmp.gt.f32.partialorder %v1311_v51, 0.0  ;;  %vm1477_vm14 = vcmp.gt.f32.partialorder %v3411_v56, 0.0  ;;  %v1605_v61 = vmul.f32 0.2, %v3411_v56  ;;  %vm1411_vm15 = vcmp.gt.f32.partialorder %v1058_v59, 0.0 }
 0x153   : > { %v1669_v62 = vsel %vm1413_vm12, %v3347_v55, %v1541_v58  ;;  %v1539_v63 = vmul.f32 0.2, %v1058_v59  ;;  %vm1475_vm0 = vcmp.gt.f32.partialorder %v1314_v60, 0.0  ;;  %v1603_v0 = vmul.f32 0.2, %v1314_v60 }
 0x154   : > { %v1666_v2 = vsel %vm1410_vm11, %v1055_v50, %v1538_v53  ;;  %v2974_v3 = vpack.c.bf16 %v1669_v62, %v1668_v57  ;;  %v1733_v4 = vsel %vm1477_vm14, %v3411_v56, %v1605_v61  ;;  %v1730_v5 = vsel %vm1474_vm13, %v1311_v51, %v1602_v54 }
 0x155   : > { %v3134_v6 = vpack.c.bf16 %v1733_v4, %v1732_v1  ;;  %v1667_v7 = vsel %vm1411_vm15, %v1058_v59, %v1539_v63  ;;  %v1731_v8 = vsel %vm1475_vm0, %v1314_v60, %v1603_v0  ;;  %v3350_v9 = vpop.f32.mrb[56].mxu0 }
 0x156   : > { %v3414_v10 = vpop.f32.mrb[56].mxu1  ;;  %3182 = vst [vmem:[%s3684_s24 + $0xd8] sm:$0xff] %v2974_v3   ;;  %v2969_v11 = vpack.c.bf16 %v1667_v7, %v1666_v2  ;;  %v3129_v12 = vpack.c.bf16 %v1731_v8, %v1730_v5  ;;  %vm1416_vm1 = vcmp.gt.f32.partialorder %v3350_v9, 0.0  ;;  %v1544_v13 = vmul.f32 0.2, %v3350_v9  ;;  %v1071_v14 = vpop.f32.mrb[57].mxu0 }
 0x157   : > { %v1327_v15 = vpop.f32.mrb[57].mxu1  ;;  %3214 = vst [vmem:[%s3684_s24 + $0x1d8] sm:$0xff] %v3134_v6   ;;  %vm1480_vm2 = vcmp.gt.f32.partialorder %v3414_v10, 0.0  ;;  %v1608_v16 = vmul.f32 0.2, %v3414_v10  ;;  %v3351_v19 = vpop.f32.mrb[58].mxu0 }
 0x158   : > { %3181 = vst [vmem:[%s3684_s24 + $0xd0] sm:$0xff] %v2969_v11   ;;  %3213 = vst [vmem:[%s3684_s24 + $0x1d0] sm:$0xff] %v3129_v12   ;;  %v1542_v17 = vmul.f32 0.2, %v1071_v14  ;;  %v1606_v18 = vmul.f32 0.2, %v1327_v15  ;;  %v1672_v21 = vsel %vm1416_vm1, %v3350_v9, %v1544_v13 }
 0x159   : > { %v3415_v20 = vpop.f32.mrb[58].mxu1  ;;  %vm1414_vm3 = vcmp.gt.f32.partialorder %v1071_v14, 0.0  ;;  %vm1417_vm4 = vcmp.gt.f32.partialorder %v3351_v19, 0.0  ;;  %v1545_v22 = vmul.f32 0.2, %v3351_v19  ;;  %v1074_v23 = vpop.f32.mrb[59].mxu0  ;;  %v1736_v29 = vsel %vm1480_vm2, %v3414_v10, %v1608_v16 }
 0x15a   : > { %v1330_v24 = vpop.f32.mrb[59].mxu1  ;;  %vm1478_vm5 = vcmp.gt.f32.partialorder %v1327_v15, 0.0  ;;  %vm1481_vm6 = vcmp.gt.f32.partialorder %v3415_v20, 0.0  ;;  %v1609_v25 = vmul.f32 0.2, %v3415_v20  ;;  %vm1415_vm7 = vcmp.gt.f32.partialorder %v1074_v23, 0.0 }
 0x15b   : > { %v1673_v26 = vsel %vm1417_vm4, %v3351_v19, %v1545_v22  ;;  %v1543_v27 = vmul.f32 0.2, %v1074_v23  ;;  %vm1479_vm8 = vcmp.gt.f32.partialorder %v1330_v24, 0.0  ;;  %v1607_v28 = vmul.f32 0.2, %v1330_v24 }
 0x15c   : > { %v1670_v30 = vsel %vm1414_vm3, %v1071_v14, %v1542_v17  ;;  %v2984_v31 = vpack.c.bf16 %v1673_v26, %v1672_v21  ;;  %v1737_v32 = vsel %vm1481_vm6, %v3415_v20, %v1609_v25  ;;  %v1734_v33 = vsel %vm1478_vm5, %v1327_v15, %v1606_v18 }
 0x15d   : > { %v3144_v34 = vpack.c.bf16 %v1737_v32, %v1736_v29  ;;  %v1671_v35 = vsel %vm1415_vm7, %v1074_v23, %v1543_v27  ;;  %v1735_v36 = vsel %vm1479_vm8, %v1330_v24, %v1607_v28  ;;  %v3354_v37 = vpop.f32.mrb[60].mxu0 }
 0x15e   : > { %v3418_v38 = vpop.f32.mrb[60].mxu1  ;;  %3184 = vst [vmem:[%s3684_s24 + $0xe8] sm:$0xff] %v2984_v31   ;;  %v2979_v39 = vpack.c.bf16 %v1671_v35, %v1670_v30  ;;  %v3139_v40 = vpack.c.bf16 %v1735_v36, %v1734_v33  ;;  %vm1420_vm9 = vcmp.gt.f32.partialorder %v3354_v37, 0.0  ;;  %v1548_v41 = vmul.f32 0.2, %v3354_v37  ;;  %v1087_v42 = vpop.f32.mrb[61].mxu0 }
 0x15f   : > { %v1343_v43 = vpop.f32.mrb[61].mxu1  ;;  %3216 = vst [vmem:[%s3684_s24 + $0x1e8] sm:$0xff] %v3144_v34   ;;  %vm1484_vm10 = vcmp.gt.f32.partialorder %v3418_v38, 0.0  ;;  %v1612_v44 = vmul.f32 0.2, %v3418_v38  ;;  %v3355_v47 = vpop.f32.mrb[62].mxu0 }
 0x160   : > { %3183 = vst [vmem:[%s3684_s24 + $0xe0] sm:$0xff] %v2979_v39   ;;  %3215 = vst [vmem:[%s3684_s24 + $0x1e0] sm:$0xff] %v3139_v40   ;;  %v1546_v45 = vmul.f32 0.2, %v1087_v42  ;;  %v1610_v46 = vmul.f32 0.2, %v1343_v43  ;;  %v1676_v49 = vsel %vm1420_vm9, %v3354_v37, %v1548_v41 }
 0x161   : > { %v3419_v48 = vpop.f32.mrb[62].mxu1  ;;  %vm1418_vm11 = vcmp.gt.f32.partialorder %v1087_v42, 0.0  ;;  %vm1421_vm12 = vcmp.gt.f32.partialorder %v3355_v47, 0.0  ;;  %v1549_v50 = vmul.f32 0.2, %v3355_v47  ;;  %v1090_v51 = vpop.f32.mrb[63].mxu0  ;;  %v1740_v57 = vsel %vm1484_vm10, %v3418_v38, %v1612_v44 }
 0x162   : > { %v1346_v52 = vpop.f32.mrb[63].mxu1  ;;  %vm1482_vm13 = vcmp.gt.f32.partialorder %v1343_v43, 0.0  ;;  %vm1485_vm14 = vcmp.gt.f32.partialorder %v3419_v48, 0.0  ;;  %v1613_v53 = vmul.f32 0.2, %v3419_v48  ;;  %vm1419_vm15 = vcmp.gt.f32.partialorder %v1090_v51, 0.0 }
 0x163   : > { %v1677_v54 = vsel %vm1421_vm12, %v3355_v47, %v1549_v50  ;;  %v1547_v55 = vmul.f32 0.2, %v1090_v51  ;;  %vm1483_vm0 = vcmp.gt.f32.partialorder %v1346_v52, 0.0  ;;  %v1611_v56 = vmul.f32 0.2, %v1346_v52 }
 0x164   : > { %v1674_v58 = vsel %vm1418_vm11, %v1087_v42, %v1546_v45  ;;  %v2994_v59 = vpack.c.bf16 %v1677_v54, %v1676_v49  ;;  %v1741_v60 = vsel %vm1485_vm14, %v3419_v48, %v1613_v53  ;;  %v1738_v61 = vsel %vm1482_vm13, %v1343_v43, %v1610_v46 }
 0x165   : > { %v3154_v62 = vpack.c.bf16 %v1741_v60, %v1740_v57  ;;  %v1675_v63 = vsel %vm1419_vm15, %v1090_v51, %v1547_v55  ;;  %v1739_v0 = vsel %vm1483_vm0, %v1346_v52, %v1611_v56 }
 0x166   : > { %3186 = vst [vmem:[%s3684_s24 + $0xf8] sm:$0xff] %v2994_v59   ;;  %v2989_v1 = vpack.c.bf16 %v1675_v63, %v1674_v58  ;;  %v3149_v2 = vpack.c.bf16 %v1739_v0, %v1738_v61 }
 0x167   : > { %3218 = vst [vmem:[%s3684_s24 + $0x1f8] sm:$0xff] %v3154_v62  }
 0x168   : > { %3185 = vst [vmem:[%s3684_s24 + $0xf0] sm:$0xff] %v2989_v1   ;;  %3217 = vst [vmem:[%s3684_s24 + $0x1f0] sm:$0xff] %v3149_v2  }
 0x169 PF: > { %s12_s9 = sadd.s32 1, %s3507_s9  }
 0x16a   : > { %p9_p4 = scmp.ge.s32.totalorder %s12_s9, 4  }
 0x16c   :  { %11 = sbr.rel (!%p9_p4) target bundleno = 1 (0x1), region = 58 }

// kernel: discriminator_forward.9
= control target key start
LH: loop header
LB: loop body
LE: loop exit
PB: predicated region body
PF: predicated region fallthrough
CT: control target
= control target key end

     0   :  { %vm1145_vm0 = vcmask 1040384   ;;  %vm1147_vm1 = vcmask 1041408   ;;  %s2124_s1 = inlined_call_operand.vmem [shape: bf16[128,128], index: 1, kind: input, shape index: {}]   ;;  %s2125_s0 = inlined_call_operand.vmem [shape: bf16[512,128], index: 0, kind: input, shape index: {}]   ;;  %s2126_s2 = inlined_call_operand.vmem [shape: bf16[512,128], index: 2, kind: output, shape index: {0}]   ;;  %s2127_s3 = inlined_call_operand.vmem [shape: f32[8,128], index: 3, kind: output, shape index: {1}]  }
   0x1   :  { %v1653_v0 = vld [vmem:[%s2124_s1] sm:$0xff]   ;;  %v1654_v1 = vld [vmem:[%s2124_s1 + $0x8] sm:$0xff]   ;;  %v1655_v2 = vld [vmem:[%s2124_s1 + $0x10] sm:$0xff]  }
   0x2   :  { %1557 = vmatprep.subr.bf16.mxu0 %v1653_v0  ;;  %1637 = vmatprep.subr.bf16.mxu1 %v1653_v0  ;;  %v1656_v3 = vld [vmem:[%s2124_s1 + $0x18] sm:$0xff]   ;;  %v1661_v4 = vld [vmem:[%s2125_s0] sm:$0xff]   ;;  %v1658_v6 = vld [vmem:[%s2124_s1 + $0x28] sm:$0xff]  }
   0x3   :  { %1558 = vmatpush3.bf16.msra.mxu0 %v1653_v0  ;;  %1645 = vmatpush3.bf16.msra.mxu1 %v1653_v0  ;;  %v1657_v5 = vld [vmem:[%s2124_s1 + $0x20] sm:$0xff]   ;;  %v1659_v7 = vld [vmem:[%s2124_s1 + $0x30] sm:$0xff]   ;;  %v1660_v8 = vld [vmem:[%s2124_s1 + $0x38] sm:$0xff]  }
   0x4   :  { %1559 = vmatprep.subr.bf16.mxu0 %v1654_v1  ;;  %1638 = vmatprep.subr.bf16.mxu1 %v1654_v1  ;;  %v1677_v9 = vld [vmem:[%s2125_s0 + $0x80] sm:$0xff]   ;;  %v1662_v10 = vld [vmem:[%s2125_s0 + $0x8] sm:$0xff]   ;;  %v1663_v11 = vld [vmem:[%s2125_s0 + $0x10] sm:$0xff]  }
   0x5   :  { %1573 = vmatprep.mubr.bf16.mxu0 %v1661_v4  ;;  %1605 = vmatprep.mubr.bf16.mxu1 %v1677_v9  ;;  %v1678_v12 = vld [vmem:[%s2125_s0 + $0x88] sm:$0xff]   ;;  %v1679_v13 = vld [vmem:[%s2125_s0 + $0x90] sm:$0xff]   ;;  %v1664_v14 = vld [vmem:[%s2125_s0 + $0x18] sm:$0xff]  }
   0x6   :  { %v1665_v15 = vld [vmem:[%s2125_s0 + $0x20] sm:$0xff]   ;;  %v1680_v16 = vld [vmem:[%s2125_s0 + $0x98] sm:$0xff]   ;;  %v1666_v18 = vld [vmem:[%s2125_s0 + $0x28] sm:$0xff]  }
   0x7   :  { %1560 = vmatpush3.bf16.msra.mxu0 %v1654_v1  ;;  %1646 = vmatpush3.bf16.msra.mxu1 %v1654_v1  ;;  %v1681_v17 = vld [vmem:[%s2125_s0 + $0xa0] sm:$0xff]   ;;  %v1682_v19 = vld [vmem:[%s2125_s0 + $0xa8] sm:$0xff]   ;;  %v1667_v20 = vld [vmem:[%s2125_s0 + $0x30] sm:$0xff]  }
   0x8   :  { %1561 = vmatprep.subr.bf16.mxu0 %v1655_v2  ;;  %1639 = vmatprep.subr.bf16.mxu1 %v1655_v2  ;;  %v1683_v21 = vld [vmem:[%s2125_s0 + $0xb0] sm:$0xff]   ;;  %v1668_v22 = vld [vmem:[%s2125_s0 + $0x38] sm:$0xff]   ;;  %v1669_v24 = vld [vmem:[%s2125_s0 + $0x40] sm:$0xff]  }
   0x9   :  { %v1684_v23 = vld [vmem:[%s2125_s0 + $0xb8] sm:$0xff]   ;;  %v1685_v25 = vld [vmem:[%s2125_s0 + $0xc0] sm:$0xff]   ;;  %v1670_v26 = vld [vmem:[%s2125_s0 + $0x48] sm:$0xff]  }
   0xa   :  { %v1686_v27 = vld [vmem:[%s2125_s0 + $0xc8] sm:$0xff]   ;;  %v1671_v28 = vld [vmem:[%s2125_s0 + $0x50] sm:$0xff]   ;;  %v1672_v30 = vld [vmem:[%s2125_s0 + $0x58] sm:$0xff]  }
   0xb   :  { %1562 = vmatpush3.bf16.msra.mxu0 %v1655_v2  ;;  %1647 = vmatpush3.bf16.msra.mxu1 %v1655_v2  ;;  %v1687_v29 = vld [vmem:[%s2125_s0 + $0xd0] sm:$0xff]   ;;  %v1688_v31 = vld [vmem:[%s2125_s0 + $0xd8] sm:$0xff]   ;;  %v1673_v32 = vld [vmem:[%s2125_s0 + $0x60] sm:$0xff]  }
   0xc   :  { %1563 = vmatprep.subr.bf16.mxu0 %v1656_v3  ;;  %1640 = vmatprep.subr.bf16.mxu1 %v1656_v3  ;;  %v1689_v33 = vld [vmem:[%s2125_s0 + $0xe0] sm:$0xff]   ;;  %v1674_v34 = vld [vmem:[%s2125_s0 + $0x68] sm:$0xff]   ;;  %v1675_v36 = vld [vmem:[%s2125_s0 + $0x70] sm:$0xff]  }
   0xd   :  { %v1690_v35 = vld [vmem:[%s2125_s0 + $0xe8] sm:$0xff]   ;;  %v1691_v37 = vld [vmem:[%s2125_s0 + $0xf0] sm:$0xff]   ;;  %v1676_v38 = vld [vmem:[%s2125_s0 + $0x78] sm:$0xff]  }
   0xe   :  { %v1692_v39 = vld [vmem:[%s2125_s0 + $0xf8] sm:$0xff]  }
   0xf   :  { %1564 = vmatpush3.bf16.msra.mxu0 %v1656_v3  ;;  %1648 = vmatpush3.bf16.msra.mxu1 %v1656_v3 }
  0x10   :  { %1565 = vmatprep.subr.bf16.mxu0 %v1657_v5  ;;  %1641 = vmatprep.subr.bf16.mxu1 %v1657_v5 }
  0x13   :  { %1566 = vmatpush3.bf16.msra.mxu0 %v1657_v5  ;;  %1649 = vmatpush3.bf16.msra.mxu1 %v1657_v5 }
  0x14   :  { %1567 = vmatprep.subr.bf16.mxu0 %v1658_v6  ;;  %1642 = vmatprep.subr.bf16.mxu1 %v1658_v6 }
  0x17   :  { %1568 = vmatpush3.bf16.msra.mxu0 %v1658_v6  ;;  %1650 = vmatpush3.bf16.msra.mxu1 %v1658_v6 }
  0x18   :  { %1569 = vmatprep.subr.bf16.mxu0 %v1659_v7  ;;  %1643 = vmatprep.subr.bf16.mxu1 %v1659_v7 }
  0x1b   :  { %1570 = vmatpush3.bf16.msra.mxu0 %v1659_v7  ;;  %1651 = vmatpush3.bf16.msra.mxu1 %v1659_v7 }
  0x1c   :  { %1571 = vmatprep.subr.bf16.mxu0 %v1660_v8  ;;  %1644 = vmatprep.subr.bf16.mxu1 %v1660_v8 }
  0x1f   :  { %1572 = vmatpush3.bf16.msra.mxu0 %v1660_v8  ;;  %1652 = vmatpush3.bf16.msra.mxu1 %v1660_v8 }
  0x22   :  { %1574 = vmatmul.mubr.bf16.vlgmr.msra.gmra.mrb[0].mxu0 %v1662_v10  ;;  %1606 = vmatmul.mubr.bf16.vlgmr.msra.gmra.mrb[0].mxu1 %v1678_v12 }
  0x23   :  { %1577 = vmatprep.mubr.bf16.mxu0 %v1663_v11  ;;  %1609 = vmatprep.mubr.bf16.mxu1 %v1679_v13 }
  0x2a   :  { %1578 = vmatmul.mubr.bf16.gmra.mrb[4].mxu0 %v1664_v14  ;;  %1610 = vmatmul.mubr.bf16.gmra.mrb[4].mxu1 %v1680_v16 }
  0x2b   :  { %1581 = vmatprep.mubr.bf16.mxu0 %v1665_v15  ;;  %1613 = vmatprep.mubr.bf16.mxu1 %v1681_v17 }
  0x32   :  { %1582 = vmatmul.mubr.bf16.gmra.mrb[8].mxu0 %v1666_v18  ;;  %1614 = vmatmul.mubr.bf16.gmra.mrb[8].mxu1 %v1682_v19 }
  0x33   :  { %1585 = vmatprep.mubr.bf16.mxu0 %v1667_v20  ;;  %1617 = vmatprep.mubr.bf16.mxu1 %v1683_v21 }
  0x3a   :  { %1586 = vmatmul.mubr.bf16.gmra.mrb[12].mxu0 %v1668_v22  ;;  %1618 = vmatmul.mubr.bf16.gmra.mrb[12].mxu1 %v1684_v23 }
  0x3b   :  { %1589 = vmatprep.mubr.bf16.mxu0 %v1669_v24  ;;  %1621 = vmatprep.mubr.bf16.mxu1 %v1685_v25 }
  0x42   :  { %1590 = vmatmul.mubr.bf16.gmra.mrb[16].mxu0 %v1670_v26  ;;  %1622 = vmatmul.mubr.bf16.gmra.mrb[16].mxu1 %v1686_v27 }
  0x43   :  { %1593 = vmatprep.mubr.bf16.mxu0 %v1671_v28  ;;  %1625 = vmatprep.mubr.bf16.mxu1 %v1687_v29 }
  0x4a   :  { %1594 = vmatmul.mubr.bf16.gmra.mrb[20].mxu0 %v1672_v30  ;;  %1626 = vmatmul.mubr.bf16.gmra.mrb[20].mxu1 %v1688_v31 }
  0x4b   :  { %1597 = vmatprep.mubr.bf16.mxu0 %v1673_v32  ;;  %1629 = vmatprep.mubr.bf16.mxu1 %v1689_v33 }
  0x52   :  { %1598 = vmatmul.mubr.bf16.gmra.mrb[24].mxu0 %v1674_v34  ;;  %1630 = vmatmul.mubr.bf16.gmra.mrb[24].mxu1 %v1690_v35 }
  0x53   :  { %1601 = vmatprep.mubr.bf16.mxu0 %v1675_v36  ;;  %1633 = vmatprep.mubr.bf16.mxu1 %v1691_v37 }
  0x5a   :  { %1602 = vmatmul.mubr.bf16.gmra.mrb[28].mxu0 %v1676_v38  ;;  %1634 = vmatmul.mubr.bf16.gmra.mrb[28].mxu1 %v1692_v39 }
  0xf5   :  { %v1575_v40 = vpop.f32.mrb[0].mxu0  ;;  %v1833_v41 = vpop.f32.mrb[0].mxu1 }
  0xf6   :  { %v368_v42 = vpop.f32.mrb[1].mxu0  ;;  %v1835_v43 = vpop.f32.mrb[1].mxu1  ;;  %v1014_v55 = vmul.f32 %v1575_v40, %v1575_v40 }
  0xf7   :  { %v1576_v44 = vpop.f32.mrb[2].mxu0  ;;  %v1837_v45 = vpop.f32.mrb[2].mxu1  ;;  %v1012_v46 = vmul.f32 %v368_v42, %v368_v42 }
  0xf8   :  { %v1334_v47 = vpack.c.bf16 %v1576_v44, %v1575_v40  ;;  %v371_v48 = vpop.f32.mrb[3].mxu0  ;;  %v1414_v49 = vpack.c.bf16 %v1837_v45, %v1833_v41  ;;  %v1841_v50 = vpop.f32.mrb[3].mxu1  ;;  %v1015_v58 = vmul.f32 %v1576_v44, %v1576_v44 }
  0xf9   :  { %v1329_v51 = vpack.c.bf16 %v371_v48, %v368_v42  ;;  %v943_v52 = vadd.f32 %v371_v48, %v368_v42  ;;  %v1013_v53 = vmul.f32 %v371_v48, %v371_v48  ;;  %v1409_v54 = vpack.c.bf16 %v1841_v50, %v1835_v43 }
  0xfa   :  { %1486 = vst [vmem:[%s2126_s2 + $0x8] sm:$0xff] %v1334_v47   ;;  %1502 = vst [vmem:[%s2126_s2 + $0x88] sm:$0xff] %v1414_v49  }
  0xfb   :  { %1330 = vst [vmem:[%s2126_s2] sm:$0xff] %v1329_v51   ;;  %v944_v56 = vadd.f32 %v1575_v40, %v943_v52  ;;  %v1076_v57 = vadd.f32 %v1013_v53, %v1012_v46  ;;  %1501 = vst [vmem:[%s2126_s2 + $0x80] sm:$0xff] %v1409_v54  }
  0xfd   :  { %v1077_v59 = vadd.f32 %v1076_v57, %v1014_v55  ;;  %v1579_v60 = vpop.f32.mrb[4].mxu0  ;;  %v945_v61 = vadd.f32 %v1576_v44, %v944_v56  ;;  %v1857_v62 = vpop.f32.mrb[4].mxu1 }
  0xfe   :  { %v384_v63 = vpop.f32.mrb[5].mxu0  ;;  %v1859_v0 = vpop.f32.mrb[5].mxu1  ;;  %v1018_v15 = vmul.f32 %v1579_v60, %v1579_v60 }
  0xff   :  { %v946_v1 = vadd.f32 %v945_v61, %v384_v63  ;;  %v1016_v2 = vmul.f32 %v384_v63, %v384_v63  ;;  %v1078_v3 = vadd.f32 %v1077_v59, %v1015_v58  ;;  %v1580_v4 = vpop.f32.mrb[6].mxu0  ;;  %v1861_v5 = vpop.f32.mrb[6].mxu1 }
 0x100   :  { %v1344_v6 = vpack.c.bf16 %v1580_v4, %v1579_v60  ;;  %v387_v7 = vpop.f32.mrb[7].mxu0  ;;  %v1424_v8 = vpack.c.bf16 %v1861_v5, %v1857_v62  ;;  %v1865_v9 = vpop.f32.mrb[7].mxu1  ;;  %v1019_v18 = vmul.f32 %v1580_v4, %v1580_v4 }
 0x101   :  { %v1079_v10 = vadd.f32 %v1078_v3, %v1016_v2  ;;  %v1339_v11 = vpack.c.bf16 %v387_v7, %v384_v63  ;;  %v947_v12 = vadd.f32 %v946_v1, %v387_v7  ;;  %v1017_v13 = vmul.f32 %v387_v7, %v387_v7 }
 0x102   :  { %1488 = vst [vmem:[%s2126_s2 + $0x18] sm:$0xff] %v1344_v6   ;;  %1504 = vst [vmem:[%s2126_s2 + $0x98] sm:$0xff] %v1424_v8   ;;  %v1419_v14 = vpack.c.bf16 %v1865_v9, %v1859_v0 }
 0x103   :  { %1487 = vst [vmem:[%s2126_s2 + $0x10] sm:$0xff] %v1339_v11   ;;  %v948_v16 = vadd.f32 %v1579_v60, %v947_v12  ;;  %v1080_v17 = vadd.f32 %v1079_v10, %v1017_v13 }
 0x104   :  { %1503 = vst [vmem:[%s2126_s2 + $0x90] sm:$0xff] %v1419_v14  }
 0x105   :  { %v1081_v19 = vadd.f32 %v1080_v17, %v1018_v15  ;;  %v1583_v20 = vpop.f32.mrb[8].mxu0  ;;  %v949_v21 = vadd.f32 %v1580_v4, %v948_v16  ;;  %v1881_v22 = vpop.f32.mrb[8].mxu1 }
 0x106   :  { %v400_v23 = vpop.f32.mrb[9].mxu0  ;;  %v1883_v24 = vpop.f32.mrb[9].mxu1  ;;  %v1022_v39 = vmul.f32 %v1583_v20, %v1583_v20 }
 0x107   :  { %v950_v25 = vadd.f32 %v949_v21, %v400_v23  ;;  %v1020_v26 = vmul.f32 %v400_v23, %v400_v23  ;;  %v1082_v27 = vadd.f32 %v1081_v19, %v1019_v18  ;;  %v1584_v28 = vpop.f32.mrb[10].mxu0  ;;  %v1885_v29 = vpop.f32.mrb[10].mxu1 }
 0x108   :  { %v1354_v30 = vpack.c.bf16 %v1584_v28, %v1583_v20  ;;  %v403_v31 = vpop.f32.mrb[11].mxu0  ;;  %v1434_v32 = vpack.c.bf16 %v1885_v29, %v1881_v22  ;;  %v1889_v33 = vpop.f32.mrb[11].mxu1  ;;  %v1023_v44 = vmul.f32 %v1584_v28, %v1584_v28 }
 0x109   :  { %v1083_v34 = vadd.f32 %v1082_v27, %v1020_v26  ;;  %v1349_v35 = vpack.c.bf16 %v403_v31, %v400_v23  ;;  %v951_v36 = vadd.f32 %v950_v25, %v403_v31  ;;  %v1021_v37 = vmul.f32 %v403_v31, %v403_v31 }
 0x10a   :  { %1490 = vst [vmem:[%s2126_s2 + $0x28] sm:$0xff] %v1354_v30   ;;  %1506 = vst [vmem:[%s2126_s2 + $0xa8] sm:$0xff] %v1434_v32   ;;  %v1429_v38 = vpack.c.bf16 %v1889_v33, %v1883_v24 }
 0x10b   :  { %1489 = vst [vmem:[%s2126_s2 + $0x20] sm:$0xff] %v1349_v35   ;;  %v952_v40 = vadd.f32 %v1583_v20, %v951_v36  ;;  %v1084_v42 = vadd.f32 %v1083_v34, %v1021_v37 }
 0x10c   :  { %1505 = vst [vmem:[%s2126_s2 + $0xa0] sm:$0xff] %v1429_v38  }
 0x10d   :  { %v1085_v46 = vadd.f32 %v1084_v42, %v1022_v39  ;;  %v1587_v47 = vpop.f32.mrb[12].mxu0  ;;  %v953_v48 = vadd.f32 %v1584_v28, %v952_v40  ;;  %v1905_v49 = vpop.f32.mrb[12].mxu1 }
 0x10e   :  { %v416_v51 = vpop.f32.mrb[13].mxu0  ;;  %v1907_v52 = vpop.f32.mrb[13].mxu1  ;;  %v1026_v6 = vmul.f32 %v1587_v47, %v1587_v47 }
 0x10f   :  { %v954_v53 = vadd.f32 %v953_v48, %v416_v51  ;;  %v1024_v54 = vmul.f32 %v416_v51, %v416_v51  ;;  %v1086_v55 = vadd.f32 %v1085_v46, %v1023_v44  ;;  %v1588_v56 = vpop.f32.mrb[14].mxu0  ;;  %v1909_v57 = vpop.f32.mrb[14].mxu1 }
 0x110   :  { %v1364_v58 = vpack.c.bf16 %v1588_v56, %v1587_v47  ;;  %v419_v59 = vpop.f32.mrb[15].mxu0  ;;  %v1444_v60 = vpack.c.bf16 %v1909_v57, %v1905_v49  ;;  %v1913_v61 = vpop.f32.mrb[15].mxu1  ;;  %v1027_v10 = vmul.f32 %v1588_v56, %v1588_v56 }
 0x111   :  { %v1087_v63 = vadd.f32 %v1086_v55, %v1024_v54  ;;  %v1359_v1 = vpack.c.bf16 %v419_v59, %v416_v51  ;;  %v955_v2 = vadd.f32 %v954_v53, %v419_v59  ;;  %v1025_v3 = vmul.f32 %v419_v59, %v419_v59 }
 0x112   :  { %1492 = vst [vmem:[%s2126_s2 + $0x38] sm:$0xff] %v1364_v58   ;;  %1508 = vst [vmem:[%s2126_s2 + $0xb8] sm:$0xff] %v1444_v60   ;;  %v1439_v4 = vpack.c.bf16 %v1913_v61, %v1907_v52 }
 0x113   :  { %1491 = vst [vmem:[%s2126_s2 + $0x30] sm:$0xff] %v1359_v1   ;;  %v956_v7 = vadd.f32 %v1587_v47, %v955_v2  ;;  %v1088_v8 = vadd.f32 %v1087_v63, %v1025_v3 }
 0x114   :  { %1507 = vst [vmem:[%s2126_s2 + $0xb0] sm:$0xff] %v1439_v4  }
 0x115   :  { %v1089_v11 = vadd.f32 %v1088_v8, %v1026_v6  ;;  %v1591_v12 = vpop.f32.mrb[16].mxu0  ;;  %v957_v13 = vadd.f32 %v1588_v56, %v956_v7  ;;  %v1929_v14 = vpop.f32.mrb[16].mxu1 }
 0x116   :  { %v432_v15 = vpop.f32.mrb[17].mxu0  ;;  %v1931_v16 = vpop.f32.mrb[17].mxu1  ;;  %v1030_v35 = vmul.f32 %v1591_v12, %v1591_v12 }
 0x117   :  { %v958_v17 = vadd.f32 %v957_v13, %v432_v15  ;;  %v1028_v18 = vmul.f32 %v432_v15, %v432_v15  ;;  %v1090_v19 = vadd.f32 %v1089_v11, %v1027_v10  ;;  %v1592_v20 = vpop.f32.mrb[18].mxu0  ;;  %v1933_v21 = vpop.f32.mrb[18].mxu1 }
 0x118   :  { %v1374_v23 = vpack.c.bf16 %v1592_v20, %v1591_v12  ;;  %v435_v25 = vpop.f32.mrb[19].mxu0  ;;  %v1454_v26 = vpack.c.bf16 %v1933_v21, %v1929_v14  ;;  %v1937_v27 = vpop.f32.mrb[19].mxu1  ;;  %v1031_v38 = vmul.f32 %v1592_v20, %v1592_v20 }
 0x119   :  { %v1091_v28 = vadd.f32 %v1090_v19, %v1028_v18  ;;  %v1369_v30 = vpack.c.bf16 %v435_v25, %v432_v15  ;;  %v959_v31 = vadd.f32 %v958_v17, %v435_v25  ;;  %v1029_v32 = vmul.f32 %v435_v25, %v435_v25 }
 0x11a   :  { %1494 = vst [vmem:[%s2126_s2 + $0x48] sm:$0xff] %v1374_v23   ;;  %1510 = vst [vmem:[%s2126_s2 + $0xc8] sm:$0xff] %v1454_v26   ;;  %v1449_v34 = vpack.c.bf16 %v1937_v27, %v1931_v16 }
 0x11b   :  { %1493 = vst [vmem:[%s2126_s2 + $0x40] sm:$0xff] %v1369_v30   ;;  %v960_v36 = vadd.f32 %v1591_v12, %v959_v31  ;;  %v1092_v37 = vadd.f32 %v1091_v28, %v1029_v32 }
 0x11c   :  { %1509 = vst [vmem:[%s2126_s2 + $0xc0] sm:$0xff] %v1449_v34  }
 0x11d   :  { %v1093_v39 = vadd.f32 %v1092_v37, %v1030_v35  ;;  %v1595_v40 = vpop.f32.mrb[20].mxu0  ;;  %v961_v42 = vadd.f32 %v1592_v20, %v960_v36  ;;  %v1953_v44 = vpop.f32.mrb[20].mxu1 }
 0x11e   :  { %v448_v46 = vpop.f32.mrb[21].mxu0  ;;  %v1955_v47 = vpop.f32.mrb[21].mxu1  ;;  %v1034_v6 = vmul.f32 %v1595_v40, %v1595_v40 }
 0x11f   :  { %v962_v48 = vadd.f32 %v961_v42, %v448_v46  ;;  %v1032_v51 = vmul.f32 %v448_v46, %v448_v46  ;;  %v1094_v53 = vadd.f32 %v1093_v39, %v1031_v38  ;;  %v1596_v54 = vpop.f32.mrb[22].mxu0  ;;  %v1957_v55 = vpop.f32.mrb[22].mxu1 }
 0x120   :  { %v1384_v56 = vpack.c.bf16 %v1596_v54, %v1595_v40  ;;  %v451_v58 = vpop.f32.mrb[23].mxu0  ;;  %v1464_v59 = vpack.c.bf16 %v1957_v55, %v1953_v44  ;;  %v1961_v60 = vpop.f32.mrb[23].mxu1  ;;  %v1035_v10 = vmul.f32 %v1596_v54, %v1596_v54 }
 0x121   :  { %v1095_v63 = vadd.f32 %v1094_v53, %v1032_v51  ;;  %v1379_v1 = vpack.c.bf16 %v451_v58, %v448_v46  ;;  %v963_v2 = vadd.f32 %v962_v48, %v451_v58  ;;  %v1033_v3 = vmul.f32 %v451_v58, %v451_v58 }
 0x122   :  { %1496 = vst [vmem:[%s2126_s2 + $0x58] sm:$0xff] %v1384_v56   ;;  %1512 = vst [vmem:[%s2126_s2 + $0xd8] sm:$0xff] %v1464_v59   ;;  %v1459_v4 = vpack.c.bf16 %v1961_v60, %v1955_v47 }
 0x123   :  { %1495 = vst [vmem:[%s2126_s2 + $0x50] sm:$0xff] %v1379_v1   ;;  %v964_v7 = vadd.f32 %v1595_v40, %v963_v2  ;;  %v1096_v8 = vadd.f32 %v1095_v63, %v1033_v3 }
 0x124   :  { %1511 = vst [vmem:[%s2126_s2 + $0xd0] sm:$0xff] %v1459_v4  }
 0x125   :  { %v1097_v11 = vadd.f32 %v1096_v8, %v1034_v6  ;;  %v1599_v12 = vpop.f32.mrb[24].mxu0  ;;  %v965_v13 = vadd.f32 %v1596_v54, %v964_v7  ;;  %v1977_v15 = vpop.f32.mrb[24].mxu1 }
 0x126   :  { %v464_v17 = vpop.f32.mrb[25].mxu0  ;;  %v1979_v18 = vpop.f32.mrb[25].mxu1  ;;  %v1038_v39 = vmul.f32 %v1599_v12, %v1599_v12 }
 0x127   :  { %v966_v19 = vadd.f32 %v965_v13, %v464_v17  ;;  %v1036_v20 = vmul.f32 %v464_v17, %v464_v17  ;;  %v1098_v23 = vadd.f32 %v1097_v11, %v1035_v10  ;;  %v1600_v25 = vpop.f32.mrb[26].mxu0  ;;  %v1981_v26 = vpop.f32.mrb[26].mxu1 }
 0x128   :  { %v1394_v28 = vpack.c.bf16 %v1600_v25, %v1599_v12  ;;  %v467_v30 = vpop.f32.mrb[27].mxu0  ;;  %v1474_v31 = vpack.c.bf16 %v1981_v26, %v1977_v15  ;;  %v1985_v32 = vpop.f32.mrb[27].mxu1  ;;  %v1039_v46 = vmul.f32 %v1600_v25, %v1600_v25 }
 0x129   :  { %v1099_v34 = vadd.f32 %v1098_v23, %v1036_v20  ;;  %v1389_v35 = vpack.c.bf16 %v467_v30, %v464_v17  ;;  %v967_v36 = vadd.f32 %v966_v19, %v467_v30  ;;  %v1037_v37 = vmul.f32 %v467_v30, %v467_v30 }
 0x12a   :  { %1498 = vst [vmem:[%s2126_s2 + $0x68] sm:$0xff] %v1394_v28   ;;  %1514 = vst [vmem:[%s2126_s2 + $0xe8] sm:$0xff] %v1474_v31   ;;  %v1469_v38 = vpack.c.bf16 %v1985_v32, %v1979_v18  ;;  %v1044_v31 = vmul.f32 %v1835_v43, %v1835_v43 }
 0x12b   :  { %1497 = vst [vmem:[%s2126_s2 + $0x60] sm:$0xff] %v1389_v35   ;;  %v968_v40 = vadd.f32 %v1599_v12, %v967_v36  ;;  %v1100_v42 = vadd.f32 %v1099_v34, %v1037_v37 }
 0x12c   :  { %1513 = vst [vmem:[%s2126_s2 + $0xe0] sm:$0xff] %v1469_v38   ;;  %v1045_v38 = vmul.f32 %v1841_v50, %v1841_v50 }
 0x12d   :  { %v1101_v48 = vadd.f32 %v1100_v42, %v1038_v39  ;;  %v1603_v51 = vpop.f32.mrb[28].mxu0  ;;  %v969_v53 = vadd.f32 %v1600_v25, %v968_v40  ;;  %v2001_v54 = vpop.f32.mrb[28].mxu1  ;;  %v1046_v39 = vmul.f32 %v1833_v41, %v1833_v41 }
 0x12e   :  { %v480_v56 = vpop.f32.mrb[29].mxu0  ;;  %v2003_v58 = vpop.f32.mrb[29].mxu1  ;;  %v1042_v19 = vmul.f32 %v1603_v51, %v1603_v51 }
 0x12f   :  { %v970_v59 = vadd.f32 %v969_v53, %v480_v56  ;;  %v1040_v63 = vmul.f32 %v480_v56, %v480_v56  ;;  %v1102_v1 = vadd.f32 %v1101_v48, %v1039_v46  ;;  %v1604_v2 = vpop.f32.mrb[30].mxu0  ;;  %v2005_v3 = vpop.f32.mrb[30].mxu1  ;;  %v1047_v46 = vmul.f32 %v1837_v45, %v1837_v45 }
 0x130   :  { %v1404_v4 = vpack.c.bf16 %v1604_v2, %v1603_v51  ;;  %v483_v6 = vpop.f32.mrb[31].mxu0  ;;  %v1484_v7 = vpack.c.bf16 %v2005_v3, %v2001_v54  ;;  %v2009_v8 = vpop.f32.mrb[31].mxu1  ;;  %v1043_v25 = vmul.f32 %v1604_v2, %v1604_v2 }
 0x131   :  { %v1103_v10 = vadd.f32 %v1102_v1, %v1040_v63  ;;  %v1399_v11 = vpack.c.bf16 %v483_v6, %v480_v56  ;;  %v971_v12 = vadd.f32 %v970_v59, %v483_v6  ;;  %v1041_v13 = vmul.f32 %v483_v6, %v483_v6 }
 0x132   :  { %1500 = vst [vmem:[%s2126_s2 + $0x78] sm:$0xff] %v1404_v4   ;;  %1516 = vst [vmem:[%s2126_s2 + $0xf8] sm:$0xff] %v1484_v7   ;;  %v1479_v17 = vpack.c.bf16 %v2009_v8, %v2003_v58  ;;  %v1049_v63 = vmul.f32 %v1865_v9, %v1865_v9 }
 0x133   :  { %1499 = vst [vmem:[%s2126_s2 + $0x70] sm:$0xff] %v1399_v11   ;;  %v972_v20 = vadd.f32 %v1603_v51, %v971_v12  ;;  %v1104_v23 = vadd.f32 %v1103_v10, %v1041_v13  ;;  %v1053_v12 = vmul.f32 %v1889_v33, %v1889_v33 }
 0x134   :  { %1515 = vst [vmem:[%s2126_s2 + $0xf0] sm:$0xff] %v1479_v17  }
 0x135   :  { %v1105_v28 = vadd.f32 %v1104_v23, %v1042_v19  ;;  %v973_v30 = vadd.f32 %v1604_v2, %v972_v20 }
 0x137   :  { %v974_v34 = vadd.f32 %v973_v30, %v1835_v43  ;;  %v1106_v35 = vadd.f32 %v1105_v28, %v1043_v25  ;;  %v1048_v43 = vmul.f32 %v1859_v0, %v1859_v0  ;;  %v1057_v30 = vmul.f32 %v1913_v61, %v1913_v61 }
 0x139   :  { %v1107_v36 = vadd.f32 %v1106_v35, %v1044_v31  ;;  %v975_v37 = vadd.f32 %v974_v34, %v1841_v50 }
 0x13b   :  { %v976_v40 = vadd.f32 %v1833_v41, %v975_v37  ;;  %v1108_v42 = vadd.f32 %v1107_v36, %v1045_v38  ;;  %v1050_v41 = vmul.f32 %v1857_v62, %v1857_v62 }
 0x13d   :  { %v1109_v48 = vadd.f32 %v1108_v42, %v1046_v39  ;;  %v977_v51 = vadd.f32 %v1837_v45, %v976_v40  ;;  %v1051_v45 = vmul.f32 %v1861_v5, %v1861_v5  ;;  %v1061_v40 = vmul.f32 %v1937_v27, %v1937_v27 }
 0x13f   :  { %v978_v53 = vadd.f32 %v977_v51, %v1859_v0  ;;  %v1110_v56 = vadd.f32 %v1109_v48, %v1047_v46  ;;  %v1052_v0 = vmul.f32 %v1883_v24, %v1883_v24 }
 0x141   :  { %v1111_v59 = vadd.f32 %v1110_v56, %v1048_v43  ;;  %v979_v50 = vadd.f32 %v978_v53, %v1865_v9 }
 0x143   :  { %v980_v1 = vadd.f32 %v1857_v62, %v979_v50  ;;  %v1112_v2 = vadd.f32 %v1111_v59, %v1049_v63  ;;  %v1054_v62 = vmul.f32 %v1881_v22, %v1881_v22  ;;  %v1065_v59 = vmul.f32 %v1961_v60, %v1961_v60 }
 0x145   :  { %v1113_v4 = vadd.f32 %v1112_v2, %v1050_v41  ;;  %v981_v6 = vadd.f32 %v1861_v5, %v980_v1  ;;  %v1055_v5 = vmul.f32 %v1885_v29, %v1885_v29 }
 0x147   :  { %v982_v7 = vadd.f32 %v981_v6, %v1883_v24  ;;  %v1114_v10 = vadd.f32 %v1113_v4, %v1051_v45  ;;  %v1056_v24 = vmul.f32 %v1907_v52, %v1907_v52  ;;  %v1069_v6 = vmul.f32 %v1985_v32, %v1985_v32 }
 0x149   :  { %v1115_v11 = vadd.f32 %v1114_v10, %v1052_v0  ;;  %v983_v9 = vadd.f32 %v982_v7, %v1889_v33 }
 0x14b   :  { %v984_v13 = vadd.f32 %v1881_v22, %v983_v9  ;;  %v1116_v17 = vadd.f32 %v1115_v11, %v1053_v12  ;;  %v1058_v22 = vmul.f32 %v1905_v49, %v1905_v49 }
 0x14d   :  { %v1117_v19 = vadd.f32 %v1116_v17, %v1054_v62  ;;  %v985_v20 = vadd.f32 %v1885_v29, %v984_v13  ;;  %v1059_v29 = vmul.f32 %v1909_v57, %v1909_v57  ;;  %v1073_v13 = vmul.f32 %v2009_v8, %v2009_v8 }
 0x14f   :  { %v986_v23 = vadd.f32 %v985_v20, %v1907_v52  ;;  %v1118_v25 = vadd.f32 %v1117_v19, %v1055_v5  ;;  %v1060_v52 = vmul.f32 %v1931_v16, %v1931_v16 }
 0x151   :  { %v1119_v28 = vadd.f32 %v1118_v25, %v1056_v24  ;;  %v987_v33 = vadd.f32 %v986_v23, %v1913_v61 }
 0x153   :  { %v988_v31 = vadd.f32 %v1905_v49, %v987_v33  ;;  %v1120_v34 = vadd.f32 %v1119_v28, %v1057_v30  ;;  %v1062_v49 = vmul.f32 %v1929_v14, %v1929_v14 }
 0x155   :  { %v1121_v35 = vadd.f32 %v1120_v34, %v1058_v22  ;;  %v989_v36 = vadd.f32 %v1909_v57, %v988_v31  ;;  %v1063_v57 = vmul.f32 %v1933_v21, %v1933_v21 }
 0x157   :  { %v990_v37 = vadd.f32 %v989_v36, %v1931_v16  ;;  %v1122_v38 = vadd.f32 %v1121_v35, %v1059_v29  ;;  %v1064_v16 = vmul.f32 %v1955_v47, %v1955_v47 }
 0x159   :  { %v1123_v39 = vadd.f32 %v1122_v38, %v1060_v52  ;;  %v991_v61 = vadd.f32 %v990_v37, %v1937_v27 }
 0x15b   :  { %v992_v42 = vadd.f32 %v1929_v14, %v991_v61  ;;  %v1124_v46 = vadd.f32 %v1123_v39, %v1061_v40  ;;  %v1066_v14 = vmul.f32 %v1953_v44, %v1953_v44 }
 0x15d   :  { %v1125_v48 = vadd.f32 %v1124_v46, %v1062_v49  ;;  %v993_v51 = vadd.f32 %v1933_v21, %v992_v42  ;;  %v1067_v21 = vmul.f32 %v1957_v55, %v1957_v55 }
 0x15f   :  { %v994_v43 = vadd.f32 %v993_v51, %v1955_v47  ;;  %v1126_v53 = vadd.f32 %v1125_v48, %v1063_v57  ;;  %v1068_v47 = vmul.f32 %v1979_v18, %v1979_v18 }
 0x161   :  { %v1127_v56 = vadd.f32 %v1126_v53, %v1064_v16  ;;  %v995_v27 = vadd.f32 %v994_v43, %v1961_v60 }
 0x163   :  { %v996_v50 = vadd.f32 %v1953_v44, %v995_v27  ;;  %v1128_v63 = vadd.f32 %v1127_v56, %v1065_v59  ;;  %v1070_v44 = vmul.f32 %v1977_v15, %v1977_v15 }
 0x165   :  { %v1129_v41 = vadd.f32 %v1128_v63, %v1066_v14  ;;  %v997_v1 = vadd.f32 %v1957_v55, %v996_v50  ;;  %v1071_v55 = vmul.f32 %v1981_v26, %v1981_v26 }
 0x167   :  { %v998_v2 = vadd.f32 %v997_v1, %v1979_v18  ;;  %v1130_v45 = vadd.f32 %v1129_v41, %v1067_v21  ;;  %v1072_v18 = vmul.f32 %v2003_v58, %v2003_v58 }
 0x169   :  { %v1131_v4 = vadd.f32 %v1130_v45, %v1068_v47  ;;  %v999_v60 = vadd.f32 %v998_v2, %v1985_v32 }
 0x16b   :  { %v1000_v0 = vadd.f32 %v1977_v15, %v999_v60  ;;  %v1132_v7 = vadd.f32 %v1131_v4, %v1069_v6  ;;  %v1074_v15 = vmul.f32 %v2001_v54, %v2001_v54 }
 0x16d   :  { %v1133_v10 = vadd.f32 %v1132_v7, %v1070_v44  ;;  %v1001_v11 = vadd.f32 %v1981_v26, %v1000_v0  ;;  %v1075_v26 = vmul.f32 %v2005_v3, %v2005_v3 }
 0x16f   :  { %v1002_v9 = vadd.f32 %v1001_v11, %v2003_v58  ;;  %v1134_v12 = vadd.f32 %v1133_v10, %v1071_v55 }
 0x171   :  { %v1135_v62 = vadd.f32 %v1134_v12, %v1072_v18  ;;  %v1003_v32 = vadd.f32 %v1002_v9, %v2009_v8 }
 0x173   :  { %v1004_v17 = vadd.f32 %v2001_v54, %v1003_v32  ;;  %v1136_v5 = vadd.f32 %v1135_v62, %v1073_v13 }
 0x175   :  { %v1005_v19 = vadd.f32 %v2005_v3, %v1004_v17  ;;  %v1137_v20 = vadd.f32 %v1136_v5, %v1074_v15 }
 0x177   :  { %v1006_v58 = vrot.slane %v1005_v19, 4  ;;  %v1138_v24 = vadd.f32 %v1137_v20, %v1075_v26 }
 0x179   :  { %v1007_v23 = vadd.f32 %v1006_v58, %v1005_v19  ;;  %v1139_v25 = vrot.slane %v1138_v24, 4 }
 0x17b   :  { %v1008_v28 = vrot.slane %v1007_v23, 2  ;;  %v1140_v33 = vadd.f32 %v1139_v25, %v1138_v24 }
 0x17d   :  { %v1009_v30 = vadd.f32 %v1008_v28, %v1007_v23  ;;  %v1141_v8 = vrot.slane %v1140_v33, 2 }
 0x17f   :  { %v1010_v22 = vrot.slane %v1009_v30, 1  ;;  %v1142_v31 = vadd.f32 %v1141_v8, %v1140_v33 }
 0x181   :  { %v1143_v34 = vrot.slane %v1142_v31, 1  ;;  %v1011_v54 = vadd.f32 %v1010_v22, %v1009_v30 }
 0x183   :  { %v1144_v29 = vadd.f32 %v1143_v34, %v1142_v31 }
 0x185   :  { %v1146_v35 = vsel %vm1145_vm0, %v1011_v54, %v1144_v29 }
 0x186   :  { %v1148_v36 = vsel %vm1147_vm1, %v1146_v35, 0.0 }
 0x187   :  { %1149 = vst [vmem:[%s2127_s3] sm:$0xff] %v1148_v36 }

// kernel: discriminator_forward.10
= control target key start
LH: loop header
LB: loop body
LE: loop exit
PB: predicated region body
PF: predicated region fallthrough
CT: control target
= control target key end

     0   :  { %s1631_s0 = inlined_call_operand.vmem [shape: bf16[512,128], index: 0, kind: input, shape index: {}]   ;;  %s1632_s1 = inlined_call_operand.vmem [shape: f32[1,128], index: 1, kind: input, shape index: {}]   ;;  %s1633_s2 = inlined_call_operand.vmem [shape: f32[1,128], index: 2, kind: input, shape index: {}]   ;;  %s1634_s3 = inlined_call_operand.vmem [shape: bf16[512,128], index: 3, kind: output, shape index: {}]  }
   0x1   :  { %v931_v0 = vld [vmem:[%s1631_s0] sm:$0xff]   ;;  %v1218_v4 = vld [vmem:[%s1631_s0 + $0x8] sm:$0xff]   ;;  %v1219_v5 = vld [vmem:[%s1631_s0 + $0x10] sm:$0xff]  }
   0x2   :  { %v1306_v1 = vld [vmem:[%s1632_s1] ss:$0 sm:$0xff]  ;;  %v932_v2 = vunpack.c.l.bf16 %v931_v0  ;;  %v933_v3 = vunpack.c.h.bf16 %v931_v0  ;;  %v1220_v6 = vld [vmem:[%s1631_s0 + $0x18] sm:$0xff]   ;;  %v936_v8 = vunpack.c.l.bf16 %v1218_v4  ;;  %v937_v9 = vunpack.c.h.bf16 %v1218_v4  ;;  %v1222_v35 = vld [vmem:[%s1631_s0 + $0x28] sm:$0xff]  }
   0x3   :  { %v1320_v7 = vld [vmem:[%s1633_s2] ss:$0 sm:$0xff]  ;;  %v940_v10 = vunpack.c.l.bf16 %v1219_v5  ;;  %v941_v11 = vunpack.c.h.bf16 %v1219_v5  ;;  %v944_v14 = vunpack.c.l.bf16 %v1220_v6  ;;  %v945_v15 = vunpack.c.h.bf16 %v1220_v6  ;;  %v1223_v48 = vld [vmem:[%s1631_s0 + $0x30] sm:$0xff]   ;;  %v1224_v4 = vld [vmem:[%s1631_s0 + $0x38] sm:$0xff]  }
   0x4   :  { %v149_v12 = vmul.f32 %v932_v2, %v1306_v1  ;;  %v150_v13 = vmul.f32 %v933_v3, %v1306_v1  ;;  %v151_v16 = vmul.f32 %v936_v8, %v1306_v1  ;;  %v152_v17 = vmul.f32 %v937_v9, %v1306_v1  ;;  %v1221_v34 = vld [vmem:[%s1631_s0 + $0x20] sm:$0xff]  }
   0x5   :  { %v153_v18 = vmul.f32 %v940_v10, %v1306_v1  ;;  %v154_v19 = vmul.f32 %v941_v11, %v1306_v1  ;;  %v155_v22 = vmul.f32 %v944_v14, %v1306_v1  ;;  %v156_v23 = vmul.f32 %v945_v15, %v1306_v1  ;;  %v1225_v15 = vld [vmem:[%s1631_s0 + $0x40] sm:$0xff]  }
   0x6   :  { %v220_v20 = vadd.f32 %v1320_v7, %v149_v12  ;;  %v221_v21 = vadd.f32 %v1320_v7, %v150_v13  ;;  %v222_v24 = vadd.f32 %v1320_v7, %v151_v16  ;;  %v223_v25 = vadd.f32 %v1320_v7, %v152_v17 }
   0x7   :  { %v224_v26 = vadd.f32 %v1320_v7, %v153_v18  ;;  %v225_v27 = vadd.f32 %v1320_v7, %v154_v19  ;;  %v226_v42 = vadd.f32 %v1320_v7, %v155_v22  ;;  %v227_v43 = vadd.f32 %v1320_v7, %v156_v23 }
   0x8   :  { %vm284_vm0 = vcmp.gt.f32.partialorder %v220_v20, 0.0  ;;  %vm285_vm1 = vcmp.gt.f32.partialorder %v221_v21, 0.0  ;;  %v348_v28 = vmul.f32 0.2, %v220_v20  ;;  %v349_v29 = vmul.f32 0.2, %v221_v21 }
   0x9   :  { %vm286_vm2 = vcmp.gt.f32.partialorder %v222_v24, 0.0  ;;  %vm287_vm3 = vcmp.gt.f32.partialorder %v223_v25, 0.0  ;;  %v350_v30 = vmul.f32 0.2, %v222_v24  ;;  %v351_v31 = vmul.f32 0.2, %v223_v25 }
   0xa   :  { %v412_v32 = vsel %vm284_vm0, %v220_v20, %v348_v28  ;;  %v413_v33 = vsel %vm285_vm1, %v221_v21, %v349_v29  ;;  %vm288_vm4 = vcmp.gt.f32.partialorder %v224_v26, 0.0  ;;  %vm289_vm5 = vcmp.gt.f32.partialorder %v225_v27, 0.0 }
   0xb   :  { %v1061_v36 = vpack.c.bf16 %v413_v33, %v412_v32  ;;  %v414_v37 = vsel %vm286_vm2, %v222_v24, %v350_v30  ;;  %v415_v38 = vsel %vm287_vm3, %v223_v25, %v351_v31  ;;  %v352_v39 = vmul.f32 0.2, %v224_v26 }
   0xc   :  { %v1066_v40 = vpack.c.bf16 %v415_v38, %v414_v37  ;;  %v353_v41 = vmul.f32 0.2, %v225_v27  ;;  %v948_v45 = vunpack.c.l.bf16 %v1221_v34  ;;  %v949_v46 = vunpack.c.h.bf16 %v1221_v34 }
   0xd   :  { %1062 = vst [vmem:[%s1634_s3] sm:$0xff] %v1061_v36   ;;  %v416_v44 = vsel %vm288_vm4, %v224_v26, %v352_v39  ;;  %v952_v47 = vunpack.c.l.bf16 %v1222_v35  ;;  %vm290_vm6 = vcmp.gt.f32.partialorder %v226_v42, 0.0  ;;  %vm291_vm7 = vcmp.gt.f32.partialorder %v227_v43, 0.0  ;;  %v1226_v26 = vld [vmem:[%s1631_s0 + $0x48] sm:$0xff]  }
   0xe   :  { %1249 = vst [vmem:[%s1634_s3 + $0x8] sm:$0xff] %v1066_v40   ;;  %v417_v49 = vsel %vm289_vm5, %v225_v27, %v353_v41  ;;  %v354_v50 = vmul.f32 0.2, %v226_v42  ;;  %v355_v52 = vmul.f32 0.2, %v227_v43  ;;  %v157_v53 = vmul.f32 %v948_v45, %v1306_v1  ;;  %v1227_v27 = vld [vmem:[%s1631_s0 + $0x50] sm:$0xff]  }
   0xf   :  { %v1071_v51 = vpack.c.bf16 %v417_v49, %v416_v44  ;;  %v158_v54 = vmul.f32 %v949_v46, %v1306_v1  ;;  %v953_v56 = vunpack.c.h.bf16 %v1222_v35  ;;  %v159_v57 = vmul.f32 %v952_v47, %v1306_v1 }
  0x10   :  { %v418_v55 = vsel %vm290_vm6, %v226_v42, %v354_v50  ;;  %v956_v58 = vunpack.c.l.bf16 %v1223_v48  ;;  %v419_v59 = vsel %vm291_vm7, %v227_v43, %v355_v52  ;;  %v228_v60 = vadd.f32 %v1320_v7, %v157_v53 }
  0x11   :  { %1250 = vst [vmem:[%s1634_s3 + $0x10] sm:$0xff] %v1071_v51   ;;  %v229_v61 = vadd.f32 %v1320_v7, %v158_v54  ;;  %v957_v62 = vunpack.c.h.bf16 %v1223_v48  ;;  %v1076_v63 = vpack.c.bf16 %v419_v59, %v418_v55  ;;  %v160_v0 = vmul.f32 %v953_v56, %v1306_v1  ;;  %v1228_v55 = vld [vmem:[%s1631_s0 + $0x58] sm:$0xff]  }
  0x12   :  { %v230_v2 = vadd.f32 %v1320_v7, %v159_v57  ;;  %v161_v3 = vmul.f32 %v956_v58, %v1306_v1  ;;  %vm292_vm8 = vcmp.gt.f32.partialorder %v228_v60, 0.0  ;;  %v356_v5 = vmul.f32 0.2, %v228_v60 }
  0x13   :  { %vm293_vm9 = vcmp.gt.f32.partialorder %v229_v61, 0.0  ;;  %v357_v6 = vmul.f32 0.2, %v229_v61  ;;  %1251 = vst [vmem:[%s1634_s3 + $0x18] sm:$0xff] %v1076_v63   ;;  %v231_v8 = vadd.f32 %v1320_v7, %v160_v0  ;;  %v162_v10 = vmul.f32 %v957_v62, %v1306_v1 }
  0x14   :  { %vm294_vm10 = vcmp.gt.f32.partialorder %v230_v2, 0.0  ;;  %v358_v9 = vmul.f32 0.2, %v230_v2  ;;  %v420_v11 = vsel %vm292_vm8, %v228_v60, %v356_v5  ;;  %v232_v13 = vadd.f32 %v1320_v7, %v161_v3  ;;  %v1229_v60 = vld [vmem:[%s1631_s0 + $0x60] sm:$0xff]  }
  0x15   :  { %v421_v12 = vsel %vm293_vm9, %v229_v61, %v357_v6  ;;  %v960_v14 = vunpack.c.l.bf16 %v1224_v4  ;;  %vm295_vm11 = vcmp.gt.f32.partialorder %v231_v8, 0.0  ;;  %v359_v17 = vmul.f32 0.2, %v231_v8 }
  0x16   :  { %v1081_v16 = vpack.c.bf16 %v421_v12, %v420_v11  ;;  %v422_v18 = vsel %vm294_vm10, %v230_v2, %v358_v9  ;;  %v233_v19 = vadd.f32 %v1320_v7, %v162_v10  ;;  %vm296_vm12 = vcmp.gt.f32.partialorder %v232_v13, 0.0  ;;  %v1230_v9 = vld [vmem:[%s1631_s0 + $0x68] sm:$0xff]  }
  0x17   :  { %v360_v20 = vmul.f32 0.2, %v232_v13  ;;  %v961_v21 = vunpack.c.h.bf16 %v1224_v4  ;;  %v423_v22 = vsel %vm295_vm11, %v231_v8, %v359_v17  ;;  %v163_v23 = vmul.f32 %v960_v14, %v1306_v1 }
  0x18   :  { %1252 = vst [vmem:[%s1634_s3 + $0x20] sm:$0xff] %v1081_v16   ;;  %v964_v24 = vunpack.c.l.bf16 %v1225_v15  ;;  %v965_v25 = vunpack.c.h.bf16 %v1225_v15  ;;  %v1086_v28 = vpack.c.bf16 %v423_v22, %v422_v18  ;;  %vm297_vm13 = vcmp.gt.f32.partialorder %v233_v19, 0.0 }
  0x19   :  { %v361_v29 = vmul.f32 0.2, %v233_v19  ;;  %v424_v30 = vsel %vm296_vm12, %v232_v13, %v360_v20  ;;  %v164_v31 = vmul.f32 %v961_v21, %v1306_v1  ;;  %v234_v32 = vadd.f32 %v1320_v7, %v163_v23 }
  0x1a   :  { %v165_v33 = vmul.f32 %v964_v24, %v1306_v1  ;;  %v166_v34 = vmul.f32 %v965_v25, %v1306_v1  ;;  %1253 = vst [vmem:[%s1634_s3 + $0x28] sm:$0xff] %v1086_v28   ;;  %v968_v36 = vunpack.c.l.bf16 %v1226_v26  ;;  %v969_v37 = vunpack.c.h.bf16 %v1226_v26  ;;  %v1231_v28 = vld [vmem:[%s1631_s0 + $0x70] sm:$0xff]  }
  0x1b   :  { %v425_v35 = vsel %vm297_vm13, %v233_v19, %v361_v29  ;;  %v972_v38 = vunpack.c.l.bf16 %v1227_v27  ;;  %v235_v40 = vadd.f32 %v1320_v7, %v164_v31  ;;  %vm298_vm14 = vcmp.gt.f32.partialorder %v234_v32, 0.0 }
  0x1c   :  { %v1091_v39 = vpack.c.bf16 %v425_v35, %v424_v30  ;;  %v362_v41 = vmul.f32 0.2, %v234_v32  ;;  %v236_v42 = vadd.f32 %v1320_v7, %v165_v33  ;;  %v237_v43 = vadd.f32 %v1320_v7, %v166_v34 }
  0x1d   :  { %v167_v44 = vmul.f32 %v968_v36, %v1306_v1  ;;  %v168_v45 = vmul.f32 %v969_v37, %v1306_v1  ;;  %vm299_vm15 = vcmp.gt.f32.partialorder %v235_v40, 0.0  ;;  %v363_v46 = vmul.f32 0.2, %v235_v40  ;;  %v1232_v37 = vld [vmem:[%s1631_s0 + $0x78] sm:$0xff]  }
  0x1e   :  { %1254 = vst [vmem:[%s1634_s3 + $0x30] sm:$0xff] %v1091_v39   ;;  %v426_v47 = vsel %vm298_vm14, %v234_v32, %v362_v41  ;;  %v973_v48 = vunpack.c.h.bf16 %v1227_v27  ;;  %vm300_vm0 = vcmp.gt.f32.partialorder %v236_v42, 0.0  ;;  %vm301_vm1 = vcmp.gt.f32.partialorder %v237_v43, 0.0 }
  0x1f   :  { %v364_v49 = vmul.f32 0.2, %v236_v42  ;;  %v365_v50 = vmul.f32 0.2, %v237_v43  ;;  %v427_v51 = vsel %vm299_vm15, %v235_v40, %v363_v46  ;;  %v238_v52 = vadd.f32 %v1320_v7, %v167_v44 }
  0x20   :  { %v239_v53 = vadd.f32 %v1320_v7, %v168_v45  ;;  %v169_v54 = vmul.f32 %v972_v38, %v1306_v1  ;;  %v1096_v56 = vpack.c.bf16 %v427_v51, %v426_v47  ;;  %v170_v59 = vmul.f32 %v973_v48, %v1306_v1 }
  0x21   :  { %v428_v57 = vsel %vm300_vm0, %v236_v42, %v364_v49  ;;  %v429_v58 = vsel %vm301_vm1, %v237_v43, %v365_v50  ;;  %vm302_vm2 = vcmp.gt.f32.partialorder %v238_v52, 0.0  ;;  %v366_v62 = vmul.f32 0.2, %v238_v52  ;;  %v1233_v42 = vld [vmem:[%s1631_s0 + $0x80] sm:$0xff]   ;;  %v1234_v50 = vld [vmem:[%s1631_s0 + $0x88] sm:$0xff]  }
  0x22   :  { %v1101_v61 = vpack.c.bf16 %v429_v58, %v428_v57  ;;  %vm303_vm3 = vcmp.gt.f32.partialorder %v239_v53, 0.0  ;;  %1255 = vst [vmem:[%s1634_s3 + $0x38] sm:$0xff] %v1096_v56   ;;  %v367_v63 = vmul.f32 0.2, %v239_v53  ;;  %v240_v0 = vadd.f32 %v1320_v7, %v169_v54 }
  0x23   :  { %v241_v2 = vadd.f32 %v1320_v7, %v170_v59  ;;  %v976_v3 = vunpack.c.l.bf16 %v1228_v55  ;;  %v430_v4 = vsel %vm302_vm2, %v238_v52, %v366_v62  ;;  %v977_v5 = vunpack.c.h.bf16 %v1228_v55 }
  0x24   :  { %1256 = vst [vmem:[%s1634_s3 + $0x40] sm:$0xff] %v1101_v61   ;;  %v980_v6 = vunpack.c.l.bf16 %v1229_v60  ;;  %v981_v8 = vunpack.c.h.bf16 %v1229_v60  ;;  %v431_v10 = vsel %vm303_vm3, %v239_v53, %v367_v63  ;;  %vm304_vm4 = vcmp.gt.f32.partialorder %v240_v0, 0.0 }
  0x25   :  { %vm305_vm5 = vcmp.gt.f32.partialorder %v241_v2, 0.0  ;;  %v368_v11 = vmul.f32 0.2, %v240_v0  ;;  %v1106_v12 = vpack.c.bf16 %v431_v10, %v430_v4  ;;  %v369_v13 = vmul.f32 0.2, %v241_v2 }
  0x26   :  { %v171_v14 = vmul.f32 %v976_v3, %v1306_v1  ;;  %v172_v15 = vmul.f32 %v977_v5, %v1306_v1  ;;  %v173_v17 = vmul.f32 %v980_v6, %v1306_v1  ;;  %v174_v18 = vmul.f32 %v981_v8, %v1306_v1 }
  0x27   :  { %v432_v16 = vsel %vm304_vm4, %v240_v0, %v368_v11  ;;  %v984_v19 = vunpack.c.l.bf16 %v1230_v9  ;;  %1257 = vst [vmem:[%s1634_s3 + $0x48] sm:$0xff] %v1106_v12   ;;  %v433_v20 = vsel %vm305_vm5, %v241_v2, %v369_v13  ;;  %v985_v23 = vunpack.c.h.bf16 %v1230_v9 }
  0x28   :  { %v242_v21 = vadd.f32 %v1320_v7, %v171_v14  ;;  %v243_v22 = vadd.f32 %v1320_v7, %v172_v15  ;;  %v1111_v24 = vpack.c.bf16 %v433_v20, %v432_v16  ;;  %v244_v25 = vadd.f32 %v1320_v7, %v173_v17  ;;  %v1235_v15 = vld [vmem:[%s1631_s0 + $0x90] sm:$0xff]   ;;  %v1236_v20 = vld [vmem:[%s1631_s0 + $0x98] sm:$0xff]  }
  0x29   :  { %v245_v26 = vadd.f32 %v1320_v7, %v174_v18  ;;  %v175_v27 = vmul.f32 %v984_v19, %v1306_v1  ;;  %v176_v35 = vmul.f32 %v985_v23, %v1306_v1  ;;  %v988_v41 = vunpack.c.l.bf16 %v1231_v28 }
  0x2a   :  { %vm306_vm6 = vcmp.gt.f32.partialorder %v242_v21, 0.0  ;;  %vm307_vm7 = vcmp.gt.f32.partialorder %v243_v22, 0.0  ;;  %v370_v29 = vmul.f32 0.2, %v242_v21  ;;  %v371_v30 = vmul.f32 0.2, %v243_v22 }
  0x2b   :  { %1258 = vst [vmem:[%s1634_s3 + $0x50] sm:$0xff] %v1111_v24   ;;  %vm308_vm8 = vcmp.gt.f32.partialorder %v244_v25, 0.0  ;;  %vm309_vm9 = vcmp.gt.f32.partialorder %v245_v26, 0.0  ;;  %v372_v31 = vmul.f32 0.2, %v244_v25  ;;  %v246_v36 = vadd.f32 %v1320_v7, %v175_v27 }
  0x2c   :  { %v373_v32 = vmul.f32 0.2, %v245_v26  ;;  %v434_v33 = vsel %vm306_vm6, %v242_v21, %v370_v29  ;;  %v435_v34 = vsel %vm307_vm7, %v243_v22, %v371_v30  ;;  %v247_v44 = vadd.f32 %v1320_v7, %v176_v35  ;;  %v1237_v21 = vld [vmem:[%s1631_s0 + $0xa0] sm:$0xff]  }
  0x2d   :  { %v1116_v38 = vpack.c.bf16 %v435_v34, %v434_v33  ;;  %v436_v39 = vsel %vm308_vm8, %v244_v25, %v372_v31  ;;  %vm310_vm10 = vcmp.gt.f32.partialorder %v246_v36, 0.0  ;;  %v374_v45 = vmul.f32 0.2, %v246_v36 }
  0x2e   :  { %v437_v40 = vsel %vm309_vm9, %v245_v26, %v373_v32  ;;  %v989_v46 = vunpack.c.h.bf16 %v1231_v28  ;;  %v177_v47 = vmul.f32 %v988_v41, %v1306_v1  ;;  %v992_v48 = vunpack.c.l.bf16 %v1232_v37 }
  0x2f   :  { %v1121_v43 = vpack.c.bf16 %v437_v40, %v436_v39  ;;  %1259 = vst [vmem:[%s1634_s3 + $0x58] sm:$0xff] %v1116_v38   ;;  %v993_v49 = vunpack.c.h.bf16 %v1232_v37  ;;  %vm311_vm11 = vcmp.gt.f32.partialorder %v247_v44, 0.0  ;;  %v375_v51 = vmul.f32 0.2, %v247_v44  ;;  %v1238_v40 = vld [vmem:[%s1631_s0 + $0xa8] sm:$0xff]  }
  0x30   :  { %v438_v52 = vsel %vm310_vm10, %v246_v36, %v374_v45  ;;  %v996_v53 = vunpack.c.l.bf16 %v1233_v42  ;;  %v178_v54 = vmul.f32 %v989_v46, %v1306_v1  ;;  %v248_v55 = vadd.f32 %v1320_v7, %v177_v47 }
  0x31   :  { %1260 = vst [vmem:[%s1634_s3 + $0x60] sm:$0xff] %v1121_v43   ;;  %v179_v56 = vmul.f32 %v992_v48, %v1306_v1  ;;  %v180_v57 = vmul.f32 %v993_v49, %v1306_v1  ;;  %v439_v58 = vsel %vm311_vm11, %v247_v44, %v375_v51  ;;  %v997_v59 = vunpack.c.h.bf16 %v1233_v42 }
  0x32   :  { %v181_v60 = vmul.f32 %v996_v53, %v1306_v1  ;;  %v1000_v61 = vunpack.c.l.bf16 %v1234_v50  ;;  %v1126_v62 = vpack.c.bf16 %v439_v58, %v438_v52  ;;  %v249_v63 = vadd.f32 %v1320_v7, %v178_v54 }
  0x33   :  { %vm312_vm12 = vcmp.gt.f32.partialorder %v248_v55, 0.0  ;;  %v376_v0 = vmul.f32 0.2, %v248_v55  ;;  %v250_v2 = vadd.f32 %v1320_v7, %v179_v56  ;;  %v251_v3 = vadd.f32 %v1320_v7, %v180_v57 }
  0x34   :  { %v182_v4 = vmul.f32 %v997_v59, %v1306_v1  ;;  %v252_v5 = vadd.f32 %v1320_v7, %v181_v60  ;;  %1261 = vst [vmem:[%s1634_s3 + $0x68] sm:$0xff] %v1126_v62   ;;  %vm313_vm13 = vcmp.gt.f32.partialorder %v249_v63, 0.0  ;;  %v377_v6 = vmul.f32 0.2, %v249_v63 }
  0x35   :  { %v440_v8 = vsel %vm312_vm12, %v248_v55, %v376_v0  ;;  %v1001_v9 = vunpack.c.h.bf16 %v1234_v50  ;;  %vm314_vm14 = vcmp.gt.f32.partialorder %v250_v2, 0.0  ;;  %vm315_vm15 = vcmp.gt.f32.partialorder %v251_v3, 0.0  ;;  %v1239_v0 = vld [vmem:[%s1631_s0 + $0xb0] sm:$0xff]  }
  0x36   :  { %v378_v10 = vmul.f32 0.2, %v250_v2  ;;  %v379_v11 = vmul.f32 0.2, %v251_v3  ;;  %v441_v12 = vsel %vm313_vm13, %v249_v63, %v377_v6  ;;  %v253_v13 = vadd.f32 %v1320_v7, %v182_v4 }
  0x37   :  { %vm316_vm0 = vcmp.gt.f32.partialorder %v252_v5, 0.0  ;;  %v380_v14 = vmul.f32 0.2, %v252_v5  ;;  %v1131_v16 = vpack.c.bf16 %v441_v12, %v440_v8  ;;  %v183_v19 = vmul.f32 %v1000_v61, %v1306_v1 }
  0x38   :  { %v442_v17 = vsel %vm314_vm14, %v250_v2, %v378_v10  ;;  %v443_v18 = vsel %vm315_vm15, %v251_v3, %v379_v11  ;;  %vm317_vm1 = vcmp.gt.f32.partialorder %v253_v13, 0.0  ;;  %v381_v23 = vmul.f32 0.2, %v253_v13  ;;  %v1240_v2 = vld [vmem:[%s1631_s0 + $0xb8] sm:$0xff]  }
  0x39   :  { %v1136_v22 = vpack.c.bf16 %v443_v18, %v442_v17  ;;  %v444_v24 = vsel %vm316_vm0, %v252_v5, %v380_v14  ;;  %1262 = vst [vmem:[%s1634_s3 + $0x70] sm:$0xff] %v1131_v16   ;;  %v184_v25 = vmul.f32 %v1001_v9, %v1306_v1  ;;  %v254_v26 = vadd.f32 %v1320_v7, %v183_v19  ;;  %v1241_v18 = vld [vmem:[%s1631_s0 + $0xc0] sm:$0xff]  }
  0x3a   :  { %v1004_v27 = vunpack.c.l.bf16 %v1235_v15  ;;  %v1005_v28 = vunpack.c.h.bf16 %v1235_v15  ;;  %v445_v29 = vsel %vm317_vm1, %v253_v13, %v381_v23  ;;  %v1008_v30 = vunpack.c.l.bf16 %v1236_v20 }
  0x3b   :  { %1263 = vst [vmem:[%s1634_s3 + $0x78] sm:$0xff] %v1136_v22   ;;  %v1009_v31 = vunpack.c.h.bf16 %v1236_v20  ;;  %v1012_v32 = vunpack.c.l.bf16 %v1237_v21  ;;  %v1141_v33 = vpack.c.bf16 %v445_v29, %v444_v24  ;;  %v255_v34 = vadd.f32 %v1320_v7, %v184_v25 }
  0x3c   :  { %vm318_vm2 = vcmp.gt.f32.partialorder %v254_v26, 0.0  ;;  %v382_v35 = vmul.f32 0.2, %v254_v26  ;;  %v185_v36 = vmul.f32 %v1004_v27, %v1306_v1  ;;  %v186_v37 = vmul.f32 %v1005_v28, %v1306_v1 }
  0x3d   :  { %v187_v38 = vmul.f32 %v1008_v30, %v1306_v1  ;;  %v188_v39 = vmul.f32 %v1009_v31, %v1306_v1  ;;  %1264 = vst [vmem:[%s1634_s3 + $0x80] sm:$0xff] %v1141_v33   ;;  %vm319_vm3 = vcmp.gt.f32.partialorder %v255_v34, 0.0  ;;  %v383_v41 = vmul.f32 0.2, %v255_v34 }
  0x3e   :  { %v446_v42 = vsel %vm318_vm2, %v254_v26, %v382_v35  ;;  %v1013_v43 = vunpack.c.h.bf16 %v1237_v21  ;;  %v256_v44 = vadd.f32 %v1320_v7, %v185_v36  ;;  %v257_v45 = vadd.f32 %v1320_v7, %v186_v37  ;;  %v1242_v36 = vld [vmem:[%s1631_s0 + $0xc8] sm:$0xff]  }
  0x3f   :  { %v258_v46 = vadd.f32 %v1320_v7, %v187_v38  ;;  %v259_v47 = vadd.f32 %v1320_v7, %v188_v39  ;;  %v447_v48 = vsel %vm319_vm3, %v255_v34, %v383_v41  ;;  %v189_v49 = vmul.f32 %v1012_v32, %v1306_v1 }
  0x40   :  { %v190_v50 = vmul.f32 %v1013_v43, %v1306_v1  ;;  %v1016_v51 = vunpack.c.l.bf16 %v1238_v40  ;;  %v1146_v52 = vpack.c.bf16 %v447_v48, %v446_v42  ;;  %vm320_vm4 = vcmp.gt.f32.partialorder %v256_v44, 0.0  ;;  %v1243_v42 = vld [vmem:[%s1631_s0 + $0xd0] sm:$0xff]  }
  0x41   :  { %vm321_vm5 = vcmp.gt.f32.partialorder %v257_v45, 0.0  ;;  %v384_v53 = vmul.f32 0.2, %v256_v44  ;;  %v385_v54 = vmul.f32 0.2, %v257_v45  ;;  %vm322_vm6 = vcmp.gt.f32.partialorder %v258_v46, 0.0 }
  0x42   :  { %vm323_vm7 = vcmp.gt.f32.partialorder %v259_v47, 0.0  ;;  %v386_v55 = vmul.f32 0.2, %v258_v46  ;;  %1265 = vst [vmem:[%s1634_s3 + $0x88] sm:$0xff] %v1146_v52   ;;  %v387_v57 = vmul.f32 0.2, %v259_v47  ;;  %v260_v58 = vadd.f32 %v1320_v7, %v189_v49 }
  0x43   :  { %v448_v56 = vsel %vm320_vm4, %v256_v44, %v384_v53  ;;  %v261_v59 = vadd.f32 %v1320_v7, %v190_v50  ;;  %v449_v60 = vsel %vm321_vm5, %v257_v45, %v385_v54  ;;  %v1017_v62 = vunpack.c.h.bf16 %v1238_v40 }
  0x44   :  { %v450_v61 = vsel %vm322_vm6, %v258_v46, %v386_v55  ;;  %v191_v63 = vmul.f32 %v1016_v51, %v1306_v1  ;;  %v1151_v3 = vpack.c.bf16 %v449_v60, %v448_v56  ;;  %v451_v4 = vsel %vm323_vm7, %v259_v47, %v387_v57  ;;  %v1244_v55 = vld [vmem:[%s1631_s0 + $0xd8] sm:$0xff]  }
  0x45   :  { %vm324_vm8 = vcmp.gt.f32.partialorder %v260_v58, 0.0  ;;  %vm325_vm9 = vcmp.gt.f32.partialorder %v261_v59, 0.0  ;;  %v1156_v5 = vpack.c.bf16 %v451_v4, %v450_v61  ;;  %v388_v6 = vmul.f32 0.2, %v260_v58 }
  0x46   :  { %v389_v8 = vmul.f32 0.2, %v261_v59  ;;  %v192_v9 = vmul.f32 %v1017_v62, %v1306_v1  ;;  %1266 = vst [vmem:[%s1634_s3 + $0x90] sm:$0xff] %v1151_v3   ;;  %v262_v10 = vadd.f32 %v1320_v7, %v191_v63  ;;  %v1020_v11 = vunpack.c.l.bf16 %v1239_v0 }
  0x47   :  { %v1021_v12 = vunpack.c.h.bf16 %v1239_v0  ;;  %v1024_v13 = vunpack.c.l.bf16 %v1240_v2  ;;  %1267 = vst [vmem:[%s1634_s3 + $0x98] sm:$0xff] %v1156_v5   ;;  %v452_v14 = vsel %vm324_vm8, %v260_v58, %v388_v6  ;;  %v1025_v17 = vunpack.c.h.bf16 %v1240_v2 }
  0x48   :  { %v453_v15 = vsel %vm325_vm9, %v261_v59, %v389_v8  ;;  %v263_v16 = vadd.f32 %v1320_v7, %v192_v9  ;;  %vm326_vm10 = vcmp.gt.f32.partialorder %v262_v10, 0.0  ;;  %v390_v20 = vmul.f32 0.2, %v262_v10 }
  0x49   :  { %v1161_v19 = vpack.c.bf16 %v453_v15, %v452_v14  ;;  %v193_v21 = vmul.f32 %v1020_v11, %v1306_v1  ;;  %v194_v23 = vmul.f32 %v1021_v12, %v1306_v1  ;;  %v195_v24 = vmul.f32 %v1024_v13, %v1306_v1  ;;  %v1246_v14 = vld [vmem:[%s1631_s0 + $0xe8] sm:$0xff]  }
  0x4a   :  { %vm327_vm11 = vcmp.gt.f32.partialorder %v263_v16, 0.0  ;;  %v391_v22 = vmul.f32 0.2, %v263_v16  ;;  %v454_v25 = vsel %vm326_vm10, %v262_v10, %v390_v20  ;;  %v196_v27 = vmul.f32 %v1025_v17, %v1306_v1  ;;  %v1245_v10 = vld [vmem:[%s1631_s0 + $0xe0] sm:$0xff]  }
  0x4b   :  { %1268 = vst [vmem:[%s1634_s3 + $0xa0] sm:$0xff] %v1161_v19   ;;  %v264_v26 = vadd.f32 %v1320_v7, %v193_v21  ;;  %v1028_v28 = vunpack.c.l.bf16 %v1241_v18  ;;  %v265_v30 = vadd.f32 %v1320_v7, %v194_v23  ;;  %v266_v31 = vadd.f32 %v1320_v7, %v195_v24 }
  0x4c   :  { %v455_v29 = vsel %vm327_vm11, %v263_v16, %v391_v22  ;;  %v1029_v32 = vunpack.c.h.bf16 %v1241_v18  ;;  %v267_v35 = vadd.f32 %v1320_v7, %v196_v27  ;;  %v1032_v46 = vunpack.c.l.bf16 %v1242_v36 }
  0x4d   :  { %v1166_v33 = vpack.c.bf16 %v455_v29, %v454_v25  ;;  %vm328_vm12 = vcmp.gt.f32.partialorder %v264_v26, 0.0  ;;  %v392_v34 = vmul.f32 0.2, %v264_v26  ;;  %vm329_vm13 = vcmp.gt.f32.partialorder %v265_v30, 0.0 }
  0x4e   :  { %v393_v37 = vmul.f32 0.2, %v265_v30  ;;  %vm330_vm14 = vcmp.gt.f32.partialorder %v266_v31, 0.0  ;;  %v394_v38 = vmul.f32 0.2, %v266_v31  ;;  %vm331_vm15 = vcmp.gt.f32.partialorder %v267_v35, 0.0 }
  0x4f   :  { %1269 = vst [vmem:[%s1634_s3 + $0xa8] sm:$0xff] %v1166_v33   ;;  %v456_v39 = vsel %vm328_vm12, %v264_v26, %v392_v34  ;;  %v395_v40 = vmul.f32 0.2, %v267_v35  ;;  %v197_v41 = vmul.f32 %v1028_v28, %v1306_v1  ;;  %v198_v45 = vmul.f32 %v1029_v32, %v1306_v1 }
  0x50   :  { %v457_v43 = vsel %vm329_vm13, %v265_v30, %v393_v37  ;;  %v458_v44 = vsel %vm330_vm14, %v266_v31, %v394_v38  ;;  %v1033_v50 = vunpack.c.h.bf16 %v1242_v36  ;;  %v199_v53 = vmul.f32 %v1032_v46, %v1306_v1  ;;  %v1247_v30 = vld [vmem:[%s1631_s0 + $0xf0] sm:$0xff]  }
  0x51   :  { %v1171_v47 = vpack.c.bf16 %v457_v43, %v456_v39  ;;  %v459_v48 = vsel %vm331_vm15, %v267_v35, %v395_v40  ;;  %v268_v49 = vadd.f32 %v1320_v7, %v197_v41  ;;  %v269_v52 = vadd.f32 %v1320_v7, %v198_v45 }
  0x52   :  { %v1176_v51 = vpack.c.bf16 %v459_v48, %v458_v44  ;;  %v1036_v54 = vunpack.c.l.bf16 %v1243_v42  ;;  %v200_v57 = vmul.f32 %v1033_v50, %v1306_v1  ;;  %v1037_v58 = vunpack.c.h.bf16 %v1243_v42  ;;  %v1248_v44 = vld [vmem:[%s1631_s0 + $0xf8] sm:$0xff]  }
  0x53   :  { %1270 = vst [vmem:[%s1634_s3 + $0xb0] sm:$0xff] %v1171_v47   ;;  %vm332_vm0 = vcmp.gt.f32.partialorder %v268_v49, 0.0  ;;  %v396_v56 = vmul.f32 0.2, %v268_v49  ;;  %vm333_vm1 = vcmp.gt.f32.partialorder %v269_v52, 0.0  ;;  %v270_v60 = vadd.f32 %v1320_v7, %v199_v53 }
  0x54   :  { %1271 = vst [vmem:[%s1634_s3 + $0xb8] sm:$0xff] %v1176_v51   ;;  %v397_v59 = vmul.f32 0.2, %v269_v52  ;;  %v201_v61 = vmul.f32 %v1036_v54, %v1306_v1  ;;  %v271_v63 = vadd.f32 %v1320_v7, %v200_v57  ;;  %v202_v0 = vmul.f32 %v1037_v58, %v1306_v1 }
  0x55   :  { %v460_v62 = vsel %vm332_vm0, %v268_v49, %v396_v56  ;;  %v1040_v2 = vunpack.c.l.bf16 %v1244_v55  ;;  %vm334_vm2 = vcmp.gt.f32.partialorder %v270_v60, 0.0  ;;  %v398_v4 = vmul.f32 0.2, %v270_v60 }
  0x56   :  { %v461_v3 = vsel %vm333_vm1, %v269_v52, %v397_v59  ;;  %v272_v5 = vadd.f32 %v1320_v7, %v201_v61  ;;  %vm335_vm3 = vcmp.gt.f32.partialorder %v271_v63, 0.0  ;;  %v399_v8 = vmul.f32 0.2, %v271_v63 }
  0x57   :  { %v1181_v6 = vpack.c.bf16 %v461_v3, %v460_v62  ;;  %v273_v9 = vadd.f32 %v1320_v7, %v202_v0  ;;  %v462_v11 = vsel %vm334_vm2, %v270_v60, %v398_v4  ;;  %v1041_v13 = vunpack.c.h.bf16 %v1244_v55 }
  0x58   :  { %vm336_vm4 = vcmp.gt.f32.partialorder %v272_v5, 0.0  ;;  %v400_v12 = vmul.f32 0.2, %v272_v5  ;;  %v463_v15 = vsel %vm335_vm3, %v271_v63, %v399_v8  ;;  %v203_v17 = vmul.f32 %v1040_v2, %v1306_v1 }
  0x59   :  { %1272 = vst [vmem:[%s1634_s3 + $0xc0] sm:$0xff] %v1181_v6   ;;  %vm337_vm5 = vcmp.gt.f32.partialorder %v273_v9, 0.0  ;;  %v401_v16 = vmul.f32 0.2, %v273_v9  ;;  %v1186_v18 = vpack.c.bf16 %v463_v15, %v462_v11  ;;  %v204_v20 = vmul.f32 %v1041_v13, %v1306_v1 }
  0x5a   :  { %v464_v19 = vsel %vm336_vm4, %v272_v5, %v400_v12  ;;  %v1044_v21 = vunpack.c.l.bf16 %v1245_v10  ;;  %v274_v23 = vadd.f32 %v1320_v7, %v203_v17  ;;  %v1045_v24 = vunpack.c.h.bf16 %v1245_v10 }
  0x5b   :  { %v465_v22 = vsel %vm337_vm5, %v273_v9, %v401_v16  ;;  %v1048_v25 = vunpack.c.l.bf16 %v1246_v14  ;;  %1273 = vst [vmem:[%s1634_s3 + $0xc8] sm:$0xff] %v1186_v18   ;;  %v275_v27 = vadd.f32 %v1320_v7, %v204_v20  ;;  %v1049_v29 = vunpack.c.h.bf16 %v1246_v14 }
  0x5c   :  { %v1191_v26 = vpack.c.bf16 %v465_v22, %v464_v19  ;;  %v205_v28 = vmul.f32 %v1044_v21, %v1306_v1  ;;  %vm338_vm6 = vcmp.gt.f32.partialorder %v274_v23, 0.0  ;;  %v402_v31 = vmul.f32 0.2, %v274_v23 }
  0x5d   :  { %v206_v32 = vmul.f32 %v1045_v24, %v1306_v1  ;;  %v207_v33 = vmul.f32 %v1048_v25, %v1306_v1  ;;  %vm339_vm7 = vcmp.gt.f32.partialorder %v275_v27, 0.0  ;;  %v403_v34 = vmul.f32 0.2, %v275_v27 }
  0x5e   :  { %1274 = vst [vmem:[%s1634_s3 + $0xd0] sm:$0xff] %v1191_v26   ;;  %v276_v35 = vadd.f32 %v1320_v7, %v205_v28  ;;  %v208_v36 = vmul.f32 %v1049_v29, %v1306_v1  ;;  %v466_v37 = vsel %vm338_vm6, %v274_v23, %v402_v31  ;;  %v1052_v40 = vunpack.c.l.bf16 %v1247_v30 }
  0x5f   :  { %v277_v38 = vadd.f32 %v1320_v7, %v206_v32  ;;  %v278_v39 = vadd.f32 %v1320_v7, %v207_v33  ;;  %v467_v41 = vsel %vm339_vm7, %v275_v27, %v403_v34  ;;  %v1053_v51 = vunpack.c.h.bf16 %v1247_v30 }
  0x60   :  { %vm340_vm8 = vcmp.gt.f32.partialorder %v276_v35, 0.0  ;;  %v404_v42 = vmul.f32 0.2, %v276_v35  ;;  %v279_v43 = vadd.f32 %v1320_v7, %v208_v36  ;;  %v1196_v45 = vpack.c.bf16 %v467_v41, %v466_v37 }
  0x61   :  { %vm341_vm9 = vcmp.gt.f32.partialorder %v277_v38, 0.0  ;;  %v405_v46 = vmul.f32 0.2, %v277_v38  ;;  %vm342_vm10 = vcmp.gt.f32.partialorder %v278_v39, 0.0  ;;  %v406_v48 = vmul.f32 0.2, %v278_v39 }
  0x62   :  { %v468_v47 = vsel %vm340_vm8, %v276_v35, %v404_v42  ;;  %vm343_vm11 = vcmp.gt.f32.partialorder %v279_v43, 0.0  ;;  %v407_v49 = vmul.f32 0.2, %v279_v43  ;;  %1275 = vst [vmem:[%s1634_s3 + $0xd8] sm:$0xff] %v1196_v45   ;;  %v209_v52 = vmul.f32 %v1052_v40, %v1306_v1 }
  0x63   :  { %v469_v50 = vsel %vm341_vm9, %v277_v38, %v405_v46  ;;  %v1056_v53 = vunpack.c.l.bf16 %v1248_v44  ;;  %v470_v55 = vsel %vm342_vm10, %v278_v39, %v406_v48  ;;  %v1057_v57 = vunpack.c.h.bf16 %v1248_v44 }
  0x64   :  { %v1201_v54 = vpack.c.bf16 %v469_v50, %v468_v47  ;;  %v471_v56 = vsel %vm343_vm11, %v279_v43, %v407_v49  ;;  %v210_v59 = vmul.f32 %v1053_v51, %v1306_v1  ;;  %v280_v60 = vadd.f32 %v1320_v7, %v209_v52 }
  0x65   :  { %v1206_v58 = vpack.c.bf16 %v471_v56, %v470_v55  ;;  %v211_v61 = vmul.f32 %v1056_v53, %v1306_v1  ;;  %v212_v62 = vmul.f32 %v1057_v57, %v1306_v1 }
  0x66   :  { %1276 = vst [vmem:[%s1634_s3 + $0xe0] sm:$0xff] %v1201_v54   ;;  %v281_v63 = vadd.f32 %v1320_v7, %v210_v59  ;;  %vm344_vm12 = vcmp.gt.f32.partialorder %v280_v60, 0.0  ;;  %v408_v0 = vmul.f32 0.2, %v280_v60 }
  0x67   :  { %1277 = vst [vmem:[%s1634_s3 + $0xe8] sm:$0xff] %v1206_v58   ;;  %v282_v2 = vadd.f32 %v1320_v7, %v211_v61  ;;  %v283_v3 = vadd.f32 %v1320_v7, %v212_v62 }
  0x68   :  { %vm345_vm13 = vcmp.gt.f32.partialorder %v281_v63, 0.0  ;;  %v409_v4 = vmul.f32 0.2, %v281_v63  ;;  %v472_v5 = vsel %vm344_vm12, %v280_v60, %v408_v0 }
  0x69   :  { %vm346_vm14 = vcmp.gt.f32.partialorder %v282_v2, 0.0  ;;  %vm347_vm15 = vcmp.gt.f32.partialorder %v283_v3, 0.0  ;;  %v410_v6 = vmul.f32 0.2, %v282_v2  ;;  %v411_v8 = vmul.f32 0.2, %v283_v3 }
  0x6a   :  { %v473_v1 = vsel %vm345_vm13, %v281_v63, %v409_v4 }
  0x6b   :  { %v1211_v9 = vpack.c.bf16 %v473_v1, %v472_v5  ;;  %v474_v10 = vsel %vm346_vm14, %v282_v2, %v410_v6  ;;  %v475_v11 = vsel %vm347_vm15, %v283_v3, %v411_v8 }
  0x6c   :  { %v1216_v12 = vpack.c.bf16 %v475_v11, %v474_v10 }
  0x6d   :  { %1278 = vst [vmem:[%s1634_s3 + $0xf0] sm:$0xff] %v1211_v9  }
  0x6e   :  { %1279 = vst [vmem:[%s1634_s3 + $0xf8] sm:$0xff] %v1216_v12  }

// kernel: discriminator_forward.11
= control target key start
LH: loop header
LB: loop body
LE: loop exit
PB: predicated region body
PF: predicated region fallthrough
CT: control target
= control target key end

     0   :  { %vm473_vm0 = vcmask 1040384   ;;  %vm475_vm1 = vcmask 1041408   ;;  %s878_s1 = inlined_call_operand.vmem [shape: bf16[256,128], index: 1, kind: input, shape index: {}]   ;;  %s879_s0 = inlined_call_operand.vmem [shape: bf16[128,256], index: 0, kind: input, shape index: {}]   ;;  %s880_s2 = inlined_call_operand.vmem [shape: bf16[128,128], index: 2, kind: output, shape index: {0}]   ;;  %s881_s3 = inlined_call_operand.vmem [shape: f32[8,128], index: 3, kind: output, shape index: {1}]  }
   0x1   :  { %v677_v0 = vld [vmem:[%s878_s1 + $0x40] sm:$0xff]   ;;  %v679_v2 = vld [vmem:[%s878_s1 + $0x48] sm:$0xff]   ;;  %v681_v4 = vld [vmem:[%s878_s1 + $0x50] sm:$0xff]  }
   0x2   :  { %v678_v1 = vld [vmem:[%s878_s1] sm:$0xff]   ;;  %597 = vmatprep.subr.bf16.mxu0 %v677_v0  ;;  %661 = vmatprep.subr.bf16.mxu1 %v677_v0  ;;  %v680_v3 = vld [vmem:[%s878_s1 + $0x8] sm:$0xff]   ;;  %v682_v5 = vld [vmem:[%s878_s1 + $0x10] sm:$0xff]  }
   0x3   :  { %598 = vmatpush3.bf16.msra.mxu0 %v678_v1  ;;  %669 = vmatpush3.bf16.msra.mxu1 %v678_v1  ;;  %v683_v6 = vld [vmem:[%s878_s1 + $0x58] sm:$0xff]   ;;  %v685_v8 = vld [vmem:[%s878_s1 + $0x60] sm:$0xff]   ;;  %v687_v10 = vld [vmem:[%s878_s1 + $0x68] sm:$0xff]  }
   0x4   :  { %599 = vmatprep.subr.bf16.mxu0 %v679_v2  ;;  %662 = vmatprep.subr.bf16.mxu1 %v679_v2  ;;  %v684_v7 = vld [vmem:[%s878_s1 + $0x18] sm:$0xff]   ;;  %v686_v9 = vld [vmem:[%s878_s1 + $0x20] sm:$0xff]   ;;  %v688_v12 = vld [vmem:[%s878_s1 + $0x28] sm:$0xff]  }
   0x5   :  { %v695_v11 = vld [vmem:[%s879_s0 + $0x4] ss:$8 sps:$4 sm:$0xff]   ;;  %v689_v14 = vld [vmem:[%s878_s1 + $0x70] sm:$0xff]   ;;  %v691_v16 = vld [vmem:[%s878_s1 + $0x78] sm:$0xff]  }
   0x6   :  { %v701_v13 = vld [vmem:[%s879_s0 + $0x44] ss:$8 sps:$4 sm:$0xff]   ;;  %270 = vmatprep.mubr.bf16.mxu0 %v695_v11  ;;  %v690_v15 = vld [vmem:[%s878_s1 + $0x30] sm:$0xff]   ;;  %v692_v17 = vld [vmem:[%s878_s1 + $0x38] sm:$0xff]  }
   0x7   :  { %600 = vmatpush3.bf16.msra.mxu0 %v680_v3  ;;  %670 = vmatpush3.bf16.msra.mxu1 %v680_v3  ;;  %v693_v18 = vld [vmem:[%s879_s0] ss:$8 sps:$4 sm:$0xff]   ;;  %v696_v20 = vld [vmem:[%s879_s0 + $0x14] ss:$8 sps:$4 sm:$0xff]   ;;  %v698_v22 = vld [vmem:[%s879_s0 + $0x10] ss:$8 sps:$4 sm:$0xff]  }
   0x8   :  { %601 = vmatprep.subr.bf16.mxu0 %v681_v4  ;;  %663 = vmatprep.subr.bf16.mxu1 %v681_v4  ;;  %v699_v19 = vld [vmem:[%s879_s0 + $0x40] ss:$8 sps:$4 sm:$0xff]   ;;  %v705_v21 = vld [vmem:[%s879_s0 + $0x54] ss:$8 sps:$4 sm:$0xff]   ;;  %v707_v23 = vld [vmem:[%s879_s0 + $0x50] ss:$8 sps:$4 sm:$0xff]  }
   0x9   :  { %302 = vmatprep.mubr.bf16.mxu1 %v701_v13  ;;  %v702_v24 = vld [vmem:[%s879_s0 + $0x24] ss:$8 sps:$4 sm:$0xff]   ;;  %v704_v26 = vld [vmem:[%s879_s0 + $0x20] ss:$8 sps:$4 sm:$0xff]   ;;  %v708_v28 = vld [vmem:[%s879_s0 + $0x34] ss:$8 sps:$4 sm:$0xff]  }
   0xa   :  { %v711_v25 = vld [vmem:[%s879_s0 + $0x64] ss:$8 sps:$4 sm:$0xff]   ;;  %v713_v27 = vld [vmem:[%s879_s0 + $0x60] ss:$8 sps:$4 sm:$0xff]   ;;  %v714_v29 = vld [vmem:[%s879_s0 + $0x74] ss:$8 sps:$4 sm:$0xff]  }
   0xb   :  { %602 = vmatpush3.bf16.msra.mxu0 %v682_v5  ;;  %671 = vmatpush3.bf16.msra.mxu1 %v682_v5  ;;  %v710_v30 = vld [vmem:[%s879_s0 + $0x30] ss:$8 sps:$4 sm:$0xff]  }
   0xc   :  { %603 = vmatprep.subr.bf16.mxu0 %v683_v6  ;;  %664 = vmatprep.subr.bf16.mxu1 %v683_v6  ;;  %v716_v31 = vld [vmem:[%s879_s0 + $0x70] ss:$8 sps:$4 sm:$0xff]  }
   0xf   :  { %604 = vmatpush3.bf16.msra.mxu0 %v684_v7  ;;  %672 = vmatpush3.bf16.msra.mxu1 %v684_v7 }
  0x10   :  { %605 = vmatprep.subr.bf16.mxu0 %v685_v8  ;;  %665 = vmatprep.subr.bf16.mxu1 %v685_v8 }
  0x13   :  { %606 = vmatpush3.bf16.msra.mxu0 %v686_v9  ;;  %673 = vmatpush3.bf16.msra.mxu1 %v686_v9 }
  0x14   :  { %607 = vmatprep.subr.bf16.mxu0 %v687_v10  ;;  %666 = vmatprep.subr.bf16.mxu1 %v687_v10 }
  0x17   :  { %608 = vmatpush3.bf16.msra.mxu0 %v688_v12  ;;  %674 = vmatpush3.bf16.msra.mxu1 %v688_v12 }
  0x18   :  { %609 = vmatprep.subr.bf16.mxu0 %v689_v14  ;;  %667 = vmatprep.subr.bf16.mxu1 %v689_v14 }
  0x1b   :  { %610 = vmatpush3.bf16.msra.mxu0 %v690_v15  ;;  %675 = vmatpush3.bf16.msra.mxu1 %v690_v15 }
  0x1c   :  { %611 = vmatprep.subr.bf16.mxu0 %v691_v16  ;;  %668 = vmatprep.subr.bf16.mxu1 %v691_v16 }
  0x1f   :  { %612 = vmatpush3.bf16.msra.mxu0 %v692_v17  ;;  %676 = vmatpush3.bf16.msra.mxu1 %v692_v17 }
  0x22   :  { %271 = vmatmul.mubr.bf16.vlgmr.msra.gmra.mrb[0].mxu0 %v693_v18  ;;  %303 = vmatmul.mubr.bf16.vlgmr.msra.gmra.mrb[0].mxu1 %v699_v19 }
  0x23   :  { %278 = vmatprep.mubr.bf16.mxu0 %v696_v20  ;;  %310 = vmatprep.mubr.bf16.mxu1 %v705_v21 }
  0x2a   :  { %279 = vmatmul.mubr.bf16.gmra.mrb[4].mxu0 %v698_v22  ;;  %311 = vmatmul.mubr.bf16.gmra.mrb[4].mxu1 %v707_v23 }
  0x2b   :  { %286 = vmatprep.mubr.bf16.mxu0 %v702_v24  ;;  %318 = vmatprep.mubr.bf16.mxu1 %v711_v25 }
  0x32   :  { %287 = vmatmul.mubr.bf16.gmra.mrb[8].mxu0 %v704_v26  ;;  %319 = vmatmul.mubr.bf16.gmra.mrb[8].mxu1 %v713_v27 }
  0x33   :  { %294 = vmatprep.mubr.bf16.mxu0 %v708_v28  ;;  %326 = vmatprep.mubr.bf16.mxu1 %v714_v29 }
  0x3a   :  { %295 = vmatmul.mubr.bf16.gmra.mrb[12].mxu0 %v710_v30  ;;  %327 = vmatmul.mubr.bf16.gmra.mrb[12].mxu1 %v716_v31 }
  0xf5   :  { %v613_v32 = vpop.f32.mrb[0].mxu0  ;;  %v637_v33 = vpop.f32.mrb[0].mxu1 }
  0xf6   :  { %v614_v34 = vpop.f32.mrb[1].mxu0  ;;  %v638_v35 = vpop.f32.mrb[1].mxu1 }
  0xf7   :  { %v615_v36 = vadd.f32 %v614_v34, %v613_v32  ;;  %v616_v37 = vpop.f32.mrb[2].mxu0  ;;  %v833_v38 = vadd.f32 %v638_v35, %v637_v33  ;;  %v640_v39 = vpop.f32.mrb[2].mxu1 }
  0xf8   :  { %v617_v40 = vpop.f32.mrb[3].mxu0  ;;  %v641_v41 = vpop.f32.mrb[3].mxu1 }
  0xf9   :  { %v618_v42 = vadd.f32 %v617_v40, %v616_v37  ;;  %v835_v43 = vadd.f32 %v641_v41, %v640_v39  ;;  %v436_v44 = vmul.f32 %v615_v36, %v615_v36 }
  0xfb   :  { %v553_v45 = vpack.c.bf16 %v618_v42, %v615_v36  ;;  %v415_v46 = vadd.f32 %v618_v42, %v615_v36  ;;  %v437_v47 = vmul.f32 %v618_v42, %v618_v42  ;;  %v573_v48 = vpack.c.bf16 %v835_v43, %v833_v38 }
  0xfd   :  { %554 = vst [vmem:[%s880_s2] sm:$0xff] %v553_v45   ;;  %v452_v49 = vadd.f32 %v437_v47, %v436_v44  ;;  %v619_v50 = vpop.f32.mrb[4].mxu0  ;;  %593 = vst [vmem:[%s880_s2 + $0x20] sm:$0xff] %v573_v48   ;;  %v643_v51 = vpop.f32.mrb[4].mxu1  ;;  %v444_v47 = vmul.f32 %v833_v38, %v833_v38 }
  0xfe   :  { %v620_v52 = vpop.f32.mrb[5].mxu0  ;;  %v644_v53 = vpop.f32.mrb[5].mxu1 }
  0xff   :  { %v621_v54 = vadd.f32 %v620_v52, %v619_v50  ;;  %v622_v55 = vpop.f32.mrb[6].mxu0  ;;  %v845_v56 = vadd.f32 %v644_v53, %v643_v51  ;;  %v646_v57 = vpop.f32.mrb[6].mxu1  ;;  %v445_v50 = vmul.f32 %v835_v43, %v835_v43 }
 0x100   :  { %v623_v58 = vpop.f32.mrb[7].mxu0  ;;  %v647_v59 = vpop.f32.mrb[7].mxu1 }
 0x101   :  { %v416_v60 = vadd.f32 %v621_v54, %v415_v46  ;;  %v438_v61 = vmul.f32 %v621_v54, %v621_v54  ;;  %v624_v62 = vadd.f32 %v623_v58, %v622_v55  ;;  %v648_v63 = vadd.f32 %v647_v59, %v646_v57 }
 0x102   :  { %v446_v53 = vmul.f32 %v845_v56, %v845_v56 }
 0x103   :  { %v453_v0 = vadd.f32 %v452_v49, %v438_v61  ;;  %v558_v1 = vpack.c.bf16 %v624_v62, %v621_v54  ;;  %v417_v2 = vadd.f32 %v624_v62, %v416_v60  ;;  %v439_v3 = vmul.f32 %v624_v62, %v624_v62 }
 0x104   :  { %v578_v4 = vpack.c.bf16 %v648_v63, %v845_v56  ;;  %v447_v57 = vmul.f32 %v648_v63, %v648_v63 }
 0x105   :  { %590 = vst [vmem:[%s880_s2 + $0x8] sm:$0xff] %v558_v1   ;;  %v454_v5 = vadd.f32 %v453_v0, %v439_v3  ;;  %v625_v6 = vpop.f32.mrb[8].mxu0  ;;  %v649_v7 = vpop.f32.mrb[8].mxu1 }
 0x106   :  { %v626_v8 = vpop.f32.mrb[9].mxu0  ;;  %594 = vst [vmem:[%s880_s2 + $0x28] sm:$0xff] %v578_v4   ;;  %v650_v9 = vpop.f32.mrb[9].mxu1 }
 0x107   :  { %v627_v10 = vadd.f32 %v626_v8, %v625_v6  ;;  %v628_v11 = vpop.f32.mrb[10].mxu0  ;;  %v651_v12 = vadd.f32 %v650_v9, %v649_v7  ;;  %v652_v13 = vpop.f32.mrb[10].mxu1 }
 0x108   :  { %v629_v14 = vpop.f32.mrb[11].mxu0  ;;  %v653_v15 = vpop.f32.mrb[11].mxu1 }
 0x109   :  { %v418_v16 = vadd.f32 %v627_v10, %v417_v2  ;;  %v440_v17 = vmul.f32 %v627_v10, %v627_v10  ;;  %v630_v18 = vadd.f32 %v629_v14, %v628_v11  ;;  %v654_v19 = vadd.f32 %v653_v15, %v652_v13 }
 0x10a   :  { %v448_v60 = vmul.f32 %v651_v12, %v651_v12 }
 0x10b   :  { %v455_v20 = vadd.f32 %v454_v5, %v440_v17  ;;  %v563_v21 = vpack.c.bf16 %v630_v18, %v627_v10  ;;  %v419_v22 = vadd.f32 %v630_v18, %v418_v16  ;;  %v441_v23 = vmul.f32 %v630_v18, %v630_v18 }
 0x10c   :  { %v583_v24 = vpack.c.bf16 %v654_v19, %v651_v12  ;;  %v449_v1 = vmul.f32 %v654_v19, %v654_v19 }
 0x10d   :  { %591 = vst [vmem:[%s880_s2 + $0x10] sm:$0xff] %v563_v21   ;;  %v456_v25 = vadd.f32 %v455_v20, %v441_v23  ;;  %v631_v26 = vpop.f32.mrb[12].mxu0  ;;  %v655_v27 = vpop.f32.mrb[12].mxu1 }
 0x10e   :  { %v632_v28 = vpop.f32.mrb[13].mxu0  ;;  %595 = vst [vmem:[%s880_s2 + $0x30] sm:$0xff] %v583_v24   ;;  %v656_v29 = vpop.f32.mrb[13].mxu1 }
 0x10f   :  { %v633_v30 = vadd.f32 %v632_v28, %v631_v26  ;;  %v634_v31 = vpop.f32.mrb[14].mxu0  ;;  %v657_v32 = vadd.f32 %v656_v29, %v655_v27  ;;  %v658_v33 = vpop.f32.mrb[14].mxu1 }
 0x110   :  { %v635_v34 = vpop.f32.mrb[15].mxu0  ;;  %v659_v35 = vpop.f32.mrb[15].mxu1 }
 0x111   :  { %v420_v36 = vadd.f32 %v633_v30, %v419_v22  ;;  %v442_v37 = vmul.f32 %v633_v30, %v633_v30  ;;  %v636_v39 = vadd.f32 %v635_v34, %v634_v31  ;;  %v660_v40 = vadd.f32 %v659_v35, %v658_v33 }
 0x112   :  { %v450_v2 = vmul.f32 %v657_v32, %v657_v32 }
 0x113   :  { %v457_v41 = vadd.f32 %v456_v25, %v442_v37  ;;  %v568_v42 = vpack.c.bf16 %v636_v39, %v633_v30  ;;  %v421_v44 = vadd.f32 %v636_v39, %v420_v36  ;;  %v443_v45 = vmul.f32 %v636_v39, %v636_v39 }
 0x114   :  { %v588_v46 = vpack.c.bf16 %v660_v40, %v657_v32  ;;  %v451_v6 = vmul.f32 %v660_v40, %v660_v40 }
 0x115   :  { %592 = vst [vmem:[%s880_s2 + $0x18] sm:$0xff] %v568_v42   ;;  %v422_v48 = vadd.f32 %v833_v38, %v421_v44  ;;  %v458_v49 = vadd.f32 %v457_v41, %v443_v45 }
 0x116   :  { %596 = vst [vmem:[%s880_s2 + $0x38] sm:$0xff] %v588_v46  }
 0x117   :  { %v423_v51 = vadd.f32 %v835_v43, %v422_v48  ;;  %v459_v52 = vadd.f32 %v458_v49, %v444_v47 }
 0x119   :  { %v460_v54 = vadd.f32 %v459_v52, %v445_v50  ;;  %v424_v55 = vadd.f32 %v845_v56, %v423_v51 }
 0x11b   :  { %v425_v58 = vadd.f32 %v648_v63, %v424_v55  ;;  %v461_v38 = vadd.f32 %v460_v54, %v446_v53 }
 0x11d   :  { %v426_v59 = vadd.f32 %v651_v12, %v425_v58  ;;  %v462_v61 = vadd.f32 %v461_v38, %v447_v57 }
 0x11f   :  { %v463_v62 = vadd.f32 %v462_v61, %v448_v60  ;;  %v427_v0 = vadd.f32 %v654_v19, %v426_v59 }
 0x121   :  { %v464_v3 = vadd.f32 %v463_v62, %v449_v1  ;;  %v428_v4 = vadd.f32 %v657_v32, %v427_v0 }
 0x123   :  { %v465_v43 = vadd.f32 %v464_v3, %v450_v2  ;;  %v429_v5 = vadd.f32 %v660_v40, %v428_v4 }
 0x125   :  { %v430_v7 = vrot.slane %v429_v5, 4  ;;  %v466_v8 = vadd.f32 %v465_v43, %v451_v6 }
 0x127   :  { %v431_v9 = vadd.f32 %v430_v7, %v429_v5  ;;  %v467_v10 = vrot.slane %v466_v8, 4 }
 0x129   :  { %v432_v56 = vrot.slane %v431_v9, 2  ;;  %v468_v11 = vadd.f32 %v467_v10, %v466_v8 }
 0x12b   :  { %v433_v63 = vadd.f32 %v432_v56, %v431_v9  ;;  %v469_v13 = vrot.slane %v468_v11, 2 }
 0x12d   :  { %v434_v14 = vrot.slane %v433_v63, 1  ;;  %v470_v12 = vadd.f32 %v469_v13, %v468_v11 }
 0x12f   :  { %v471_v15 = vrot.slane %v470_v12, 1  ;;  %v435_v16 = vadd.f32 %v434_v14, %v433_v63 }
 0x131   :  { %v472_v17 = vadd.f32 %v471_v15, %v470_v12 }
 0x133   :  { %v474_v18 = vsel %vm473_vm0, %v435_v16, %v472_v17 }
 0x134   :  { %v476_v19 = vsel %vm475_vm1, %v474_v18, 0.0 }
 0x135   :  { %477 = vst [vmem:[%s881_s3] sm:$0xff] %v476_v19 }

// kernel: discriminator_forward.12
= control target key start
LH: loop header
LB: loop body
LE: loop exit
PB: predicated region body
PF: predicated region fallthrough
CT: control target
= control target key end

     0   :  { %s455_s0 = inlined_call_operand.vmem [shape: bf16[128,128], index: 0, kind: input, shape index: {}]   ;;  %s456_s1 = inlined_call_operand.vmem [shape: f32[1,128], index: 1, kind: input, shape index: {}]   ;;  %s457_s2 = inlined_call_operand.vmem [shape: f32[1,128], index: 2, kind: input, shape index: {}]   ;;  %s458_s3 = inlined_call_operand.vmem [shape: bf16[128,128], index: 3, kind: output, shape index: {}]  }
   0x1   :  { %v259_v0 = vld [vmem:[%s455_s0] sm:$0xff]   ;;  %v330_v4 = vld [vmem:[%s455_s0 + $0x8] sm:$0xff]   ;;  %v331_v5 = vld [vmem:[%s455_s0 + $0x10] sm:$0xff]  }
   0x2   :  { %v370_v1 = vld [vmem:[%s456_s1] ss:$0 sm:$0xff]  ;;  %v260_v2 = vunpack.c.l.bf16 %v259_v0  ;;  %v261_v3 = vunpack.c.h.bf16 %v259_v0  ;;  %v332_v6 = vld [vmem:[%s455_s0 + $0x18] sm:$0xff]   ;;  %v264_v8 = vunpack.c.l.bf16 %v330_v4  ;;  %v265_v9 = vunpack.c.h.bf16 %v330_v4  ;;  %v334_v35 = vld [vmem:[%s455_s0 + $0x28] sm:$0xff]  }
   0x3   :  { %v384_v7 = vld [vmem:[%s457_s2] ss:$0 sm:$0xff]  ;;  %v268_v10 = vunpack.c.l.bf16 %v331_v5  ;;  %v269_v11 = vunpack.c.h.bf16 %v331_v5  ;;  %v272_v14 = vunpack.c.l.bf16 %v332_v6  ;;  %v273_v15 = vunpack.c.h.bf16 %v332_v6  ;;  %v335_v48 = vld [vmem:[%s455_s0 + $0x30] sm:$0xff]   ;;  %v336_v4 = vld [vmem:[%s455_s0 + $0x38] sm:$0xff]  }
   0x4   :  { %v53_v12 = vmul.f32 %v260_v2, %v370_v1  ;;  %v54_v13 = vmul.f32 %v261_v3, %v370_v1  ;;  %v55_v16 = vmul.f32 %v264_v8, %v370_v1  ;;  %v56_v17 = vmul.f32 %v265_v9, %v370_v1  ;;  %v333_v34 = vld [vmem:[%s455_s0 + $0x20] sm:$0xff]  }
   0x5   :  { %v57_v18 = vmul.f32 %v268_v10, %v370_v1  ;;  %v58_v19 = vmul.f32 %v269_v11, %v370_v1  ;;  %v59_v22 = vmul.f32 %v272_v14, %v370_v1  ;;  %v60_v23 = vmul.f32 %v273_v15, %v370_v1 }
   0x6   :  { %v76_v20 = vadd.f32 %v384_v7, %v53_v12  ;;  %v77_v21 = vadd.f32 %v384_v7, %v54_v13  ;;  %v78_v24 = vadd.f32 %v384_v7, %v55_v16  ;;  %v79_v25 = vadd.f32 %v384_v7, %v56_v17 }
   0x7   :  { %v80_v26 = vadd.f32 %v384_v7, %v57_v18  ;;  %v81_v27 = vadd.f32 %v384_v7, %v58_v19  ;;  %v82_v42 = vadd.f32 %v384_v7, %v59_v22  ;;  %v83_v43 = vadd.f32 %v384_v7, %v60_v23 }
   0x8   :  { %vm92_vm0 = vcmp.gt.f32.partialorder %v76_v20, 0.0  ;;  %vm93_vm1 = vcmp.gt.f32.partialorder %v77_v21, 0.0  ;;  %v108_v28 = vmul.f32 0.2, %v76_v20  ;;  %v109_v29 = vmul.f32 0.2, %v77_v21 }
   0x9   :  { %vm94_vm2 = vcmp.gt.f32.partialorder %v78_v24, 0.0  ;;  %vm95_vm3 = vcmp.gt.f32.partialorder %v79_v25, 0.0  ;;  %v110_v30 = vmul.f32 0.2, %v78_v24  ;;  %v111_v31 = vmul.f32 0.2, %v79_v25 }
   0xa   :  { %v124_v32 = vsel %vm92_vm0, %v76_v20, %v108_v28  ;;  %v125_v33 = vsel %vm93_vm1, %v77_v21, %v109_v29  ;;  %vm96_vm4 = vcmp.gt.f32.partialorder %v80_v26, 0.0  ;;  %vm97_vm5 = vcmp.gt.f32.partialorder %v81_v27, 0.0 }
   0xb   :  { %v293_v36 = vpack.c.bf16 %v125_v33, %v124_v32  ;;  %v126_v37 = vsel %vm94_vm2, %v78_v24, %v110_v30  ;;  %v127_v38 = vsel %vm95_vm3, %v79_v25, %v111_v31  ;;  %v112_v39 = vmul.f32 0.2, %v80_v26 }
   0xc   :  { %v298_v40 = vpack.c.bf16 %v127_v38, %v126_v37  ;;  %v113_v41 = vmul.f32 0.2, %v81_v27  ;;  %v276_v45 = vunpack.c.l.bf16 %v333_v34  ;;  %v277_v46 = vunpack.c.h.bf16 %v333_v34 }
   0xd   :  { %294 = vst [vmem:[%s458_s3] sm:$0xff] %v293_v36   ;;  %v128_v44 = vsel %vm96_vm4, %v80_v26, %v112_v39  ;;  %v280_v47 = vunpack.c.l.bf16 %v334_v35  ;;  %vm98_vm6 = vcmp.gt.f32.partialorder %v82_v42, 0.0  ;;  %vm99_vm7 = vcmp.gt.f32.partialorder %v83_v43, 0.0 }
   0xe   :  { %337 = vst [vmem:[%s458_s3 + $0x8] sm:$0xff] %v298_v40   ;;  %v129_v49 = vsel %vm97_vm5, %v81_v27, %v113_v41  ;;  %v114_v50 = vmul.f32 0.2, %v82_v42  ;;  %v115_v52 = vmul.f32 0.2, %v83_v43  ;;  %v61_v53 = vmul.f32 %v276_v45, %v370_v1 }
   0xf   :  { %v303_v51 = vpack.c.bf16 %v129_v49, %v128_v44  ;;  %v62_v54 = vmul.f32 %v277_v46, %v370_v1  ;;  %v281_v56 = vunpack.c.h.bf16 %v334_v35  ;;  %v63_v57 = vmul.f32 %v280_v47, %v370_v1 }
  0x10   :  { %v130_v55 = vsel %vm98_vm6, %v82_v42, %v114_v50  ;;  %v284_v58 = vunpack.c.l.bf16 %v335_v48  ;;  %v131_v59 = vsel %vm99_vm7, %v83_v43, %v115_v52  ;;  %v84_v60 = vadd.f32 %v384_v7, %v61_v53 }
  0x11   :  { %338 = vst [vmem:[%s458_s3 + $0x10] sm:$0xff] %v303_v51   ;;  %v85_v61 = vadd.f32 %v384_v7, %v62_v54  ;;  %v285_v62 = vunpack.c.h.bf16 %v335_v48  ;;  %v308_v63 = vpack.c.bf16 %v131_v59, %v130_v55  ;;  %v64_v0 = vmul.f32 %v281_v56, %v370_v1 }
  0x12   :  { %v86_v2 = vadd.f32 %v384_v7, %v63_v57  ;;  %v65_v3 = vmul.f32 %v284_v58, %v370_v1  ;;  %vm100_vm8 = vcmp.gt.f32.partialorder %v84_v60, 0.0  ;;  %v116_v5 = vmul.f32 0.2, %v84_v60 }
  0x13   :  { %vm101_vm9 = vcmp.gt.f32.partialorder %v85_v61, 0.0  ;;  %v117_v6 = vmul.f32 0.2, %v85_v61  ;;  %339 = vst [vmem:[%s458_s3 + $0x18] sm:$0xff] %v308_v63   ;;  %v87_v8 = vadd.f32 %v384_v7, %v64_v0  ;;  %v66_v10 = vmul.f32 %v285_v62, %v370_v1 }
  0x14   :  { %vm102_vm10 = vcmp.gt.f32.partialorder %v86_v2, 0.0  ;;  %v118_v9 = vmul.f32 0.2, %v86_v2  ;;  %v132_v11 = vsel %vm100_vm8, %v84_v60, %v116_v5  ;;  %v88_v13 = vadd.f32 %v384_v7, %v65_v3 }
  0x15   :  { %v133_v12 = vsel %vm101_vm9, %v85_v61, %v117_v6  ;;  %v288_v14 = vunpack.c.l.bf16 %v336_v4  ;;  %vm103_vm11 = vcmp.gt.f32.partialorder %v87_v8, 0.0  ;;  %v119_v16 = vmul.f32 0.2, %v87_v8 }
  0x16   :  { %v313_v15 = vpack.c.bf16 %v133_v12, %v132_v11  ;;  %v134_v17 = vsel %vm102_vm10, %v86_v2, %v118_v9  ;;  %v89_v18 = vadd.f32 %v384_v7, %v66_v10  ;;  %vm104_vm12 = vcmp.gt.f32.partialorder %v88_v13, 0.0 }
  0x17   :  { %v120_v19 = vmul.f32 0.2, %v88_v13  ;;  %v289_v20 = vunpack.c.h.bf16 %v336_v4  ;;  %v135_v21 = vsel %vm103_vm11, %v87_v8, %v119_v16  ;;  %v67_v22 = vmul.f32 %v288_v14, %v370_v1 }
  0x18   :  { %340 = vst [vmem:[%s458_s3 + $0x20] sm:$0xff] %v313_v15   ;;  %v318_v23 = vpack.c.bf16 %v135_v21, %v134_v17  ;;  %vm105_vm13 = vcmp.gt.f32.partialorder %v89_v18, 0.0  ;;  %v121_v24 = vmul.f32 0.2, %v89_v18 }
  0x19   :  { %v136_v25 = vsel %vm104_vm12, %v88_v13, %v120_v19  ;;  %v68_v26 = vmul.f32 %v289_v20, %v370_v1  ;;  %v90_v27 = vadd.f32 %v384_v7, %v67_v22 }
  0x1a   :  { %341 = vst [vmem:[%s458_s3 + $0x28] sm:$0xff] %v318_v23   ;;  %v137_v28 = vsel %vm105_vm13, %v89_v18, %v121_v24 }
  0x1b   :  { %v323_v29 = vpack.c.bf16 %v137_v28, %v136_v25  ;;  %v91_v30 = vadd.f32 %v384_v7, %v68_v26  ;;  %vm106_vm14 = vcmp.gt.f32.partialorder %v90_v27, 0.0  ;;  %v122_v31 = vmul.f32 0.2, %v90_v27 }
  0x1d   :  { %342 = vst [vmem:[%s458_s3 + $0x30] sm:$0xff] %v323_v29   ;;  %vm107_vm15 = vcmp.gt.f32.partialorder %v91_v30, 0.0  ;;  %v123_v32 = vmul.f32 0.2, %v91_v30  ;;  %v138_v33 = vsel %vm106_vm14, %v90_v27, %v122_v31 }
  0x1f   :  { %v139_v1 = vsel %vm107_vm15, %v91_v30, %v123_v32 }
  0x20   :  { %v328_v34 = vpack.c.bf16 %v139_v1, %v138_v33 }
  0x22   :  { %343 = vst [vmem:[%s458_s3 + $0x38] sm:$0xff] %v328_v34  }

// kernel: discriminator_forward.14
= control target key start
LH: loop header
LB: loop body
LE: loop exit
PB: predicated region body
PF: predicated region fallthrough
CT: control target
= control target key end

     0   :  { %s148_s0 = inlined_call_operand.vmem [shape: bf16[32,128], index: 0, kind: input, shape index: {}]   ;;  %s149_s1 = inlined_call_operand.vmem [shape: f32[1,128], index: 1, kind: input, shape index: {}]   ;;  %s150_s2 = inlined_call_operand.vmem [shape: f32[1,128], index: 2, kind: input, shape index: {}]   ;;  %s151_s3 = inlined_call_operand.vmem [shape: bf16[32,128], index: 3, kind: output, shape index: {}]  }
   0x1   :  { %v91_v0 = vld [vmem:[%s148_s0] sm:$0xff]   ;;  %v108_v4 = vld [vmem:[%s148_s0 + $0x8] sm:$0xff]  }
   0x2   :  { %v80_v1 = vld [vmem:[%s149_s1] ss:$0 sm:$0xff]  ;;  %v92_v2 = vunpack.c.l.bf16 %v91_v0  ;;  %v93_v3 = vunpack.c.h.bf16 %v91_v0  ;;  %v96_v6 = vunpack.c.l.bf16 %v108_v4  ;;  %v97_v7 = vunpack.c.h.bf16 %v108_v4 }
   0x3   :  { %v81_v5 = vld [vmem:[%s150_s2] ss:$0 sm:$0xff] }
   0x4   :  { %v29_v8 = vmul.f32 %v92_v2, %v80_v1  ;;  %v30_v9 = vmul.f32 %v93_v3, %v80_v1  ;;  %v31_v10 = vmul.f32 %v96_v6, %v80_v1  ;;  %v32_v11 = vmul.f32 %v97_v7, %v80_v1 }
   0x6   :  { %v40_v12 = vadd.f32 %v81_v5, %v29_v8  ;;  %v41_v13 = vadd.f32 %v81_v5, %v30_v9  ;;  %v42_v14 = vadd.f32 %v81_v5, %v31_v10  ;;  %v43_v15 = vadd.f32 %v81_v5, %v32_v11 }
   0x8   :  { %vm44_vm0 = vcmp.gt.f32.partialorder %v40_v12, 0.0  ;;  %vm45_vm1 = vcmp.gt.f32.partialorder %v41_v13, 0.0  ;;  %v48_v16 = vmul.f32 0.2, %v40_v12  ;;  %v49_v17 = vmul.f32 0.2, %v41_v13 }
   0x9   :  { %vm46_vm2 = vcmp.gt.f32.partialorder %v42_v14, 0.0  ;;  %vm47_vm3 = vcmp.gt.f32.partialorder %v43_v15, 0.0  ;;  %v50_v18 = vmul.f32 0.2, %v42_v14  ;;  %v51_v19 = vmul.f32 0.2, %v43_v15 }
   0xa   :  { %v52_v20 = vsel %vm44_vm0, %v40_v12, %v48_v16  ;;  %v53_v21 = vsel %vm45_vm1, %v41_v13, %v49_v17 }
   0xb   :  { %v101_v22 = vpack.c.bf16 %v53_v21, %v52_v20  ;;  %v54_v23 = vsel %vm46_vm2, %v42_v14, %v50_v18  ;;  %v55_v24 = vsel %vm47_vm3, %v43_v15, %v51_v19 }
   0xc   :  { %v106_v25 = vpack.c.bf16 %v55_v24, %v54_v23 }
   0xd   :  { %102 = vst [vmem:[%s151_s3] sm:$0xff] %v101_v22  }
   0xe   :  { %109 = vst [vmem:[%s151_s3 + $0x8] sm:$0xff] %v106_v25  }

// kernel: discriminator_forward.13
= control target key start
LH: loop header
LB: loop body
LE: loop exit
PB: predicated region body
PF: predicated region fallthrough
CT: control target
= control target key end

     0   :  { %vm458_vm0 = vcmask 1040384   ;;  %vm460_vm1 = vcmask 1041408   ;;  %s779_s1 = inlined_call_operand.vmem [shape: bf16[512,128], index: 1, kind: input, shape index: {}]   ;;  %s780_s0 = inlined_call_operand.vmem [shape: bf16[32,512], index: 0, kind: input, shape index: {}]   ;;  %s781_s2 = inlined_call_operand.vmem [shape: bf16[32,128], index: 2, kind: output, shape index: {0}]   ;;  %s782_s3 = inlined_call_operand.vmem [shape: f32[8,128], index: 3, kind: output, shape index: {1}]  }
   0x1   :  { %v586_v0 = vld [vmem:[%s779_s1 + $0x40] sm:$0xff]   ;;  %v590_v4 = vld [vmem:[%s779_s1 + $0x48] sm:$0xff]   ;;  %v594_v8 = vld [vmem:[%s779_s1 + $0x50] sm:$0xff]  }
   0x2   :  { %v587_v1 = vld [vmem:[%s779_s1 + $0xc0] sm:$0xff]   ;;  %530 = vmatprep.subr.bf16.mxu0 %v586_v0  ;;  %v591_v5 = vld [vmem:[%s779_s1 + $0xc8] sm:$0xff]   ;;  %v595_v9 = vld [vmem:[%s779_s1 + $0xd0] sm:$0xff]  }
   0x3   :  { %v588_v2 = vld [vmem:[%s779_s1] sm:$0xff]   ;;  %558 = vmatprep.subr.bf16.mxu1 %v587_v1  ;;  %v592_v6 = vld [vmem:[%s779_s1 + $0x8] sm:$0xff]   ;;  %v596_v10 = vld [vmem:[%s779_s1 + $0x10] sm:$0xff]  }
   0x4   :  { %v589_v3 = vld [vmem:[%s779_s1 + $0x80] sm:$0xff]   ;;  %531 = vmatpush3.bf16.msra.mxu0 %v588_v2  ;;  %v593_v7 = vld [vmem:[%s779_s1 + $0x88] sm:$0xff]   ;;  %v597_v11 = vld [vmem:[%s779_s1 + $0x90] sm:$0xff]  }
   0x5   :  { %559 = vmatpush3.bf16.msra.mxu1 %v589_v3  ;;  %532 = vmatprep.subr.bf16.mxu0 %v590_v4  ;;  %v598_v12 = vld [vmem:[%s779_s1 + $0x58] sm:$0xff]   ;;  %v602_v16 = vld [vmem:[%s779_s1 + $0x60] sm:$0xff]   ;;  %v606_v20 = vld [vmem:[%s779_s1 + $0x68] sm:$0xff]  }
   0x6   :  { %560 = vmatprep.subr.bf16.mxu1 %v591_v5  ;;  %v599_v13 = vld [vmem:[%s779_s1 + $0xd8] sm:$0xff]   ;;  %v603_v17 = vld [vmem:[%s779_s1 + $0xe0] sm:$0xff]   ;;  %v607_v21 = vld [vmem:[%s779_s1 + $0xe8] sm:$0xff]  }
   0x7   :  { %v600_v14 = vld [vmem:[%s779_s1 + $0x18] sm:$0xff]   ;;  %v604_v18 = vld [vmem:[%s779_s1 + $0x20] sm:$0xff]   ;;  %v608_v22 = vld [vmem:[%s779_s1 + $0x28] sm:$0xff]  }
   0x8   :  { %533 = vmatpush3.bf16.msra.mxu0 %v592_v6  ;;  %v601_v15 = vld [vmem:[%s779_s1 + $0x98] sm:$0xff]   ;;  %v605_v19 = vld [vmem:[%s779_s1 + $0xa0] sm:$0xff]   ;;  %v609_v23 = vld [vmem:[%s779_s1 + $0xa8] sm:$0xff]  }
   0x9   :  { %561 = vmatpush3.bf16.msra.mxu1 %v593_v7  ;;  %534 = vmatprep.subr.bf16.mxu0 %v594_v8  ;;  %v610_v24 = vld [vmem:[%s779_s1 + $0x70] sm:$0xff]   ;;  %v614_v28 = vld [vmem:[%s779_s1 + $0x78] sm:$0xff]  }
   0xa   :  { %562 = vmatprep.subr.bf16.mxu1 %v595_v9  ;;  %v611_v25 = vld [vmem:[%s779_s1 + $0xf0] sm:$0xff]   ;;  %v615_v29 = vld [vmem:[%s779_s1 + $0xf8] sm:$0xff]  }
   0xb   :  { %v612_v26 = vld [vmem:[%s779_s1 + $0x30] sm:$0xff]   ;;  %v616_v30 = vld [vmem:[%s779_s1 + $0x38] sm:$0xff]  }
   0xc   :  { %535 = vmatpush3.bf16.msra.mxu0 %v596_v10  ;;  %v613_v27 = vld [vmem:[%s779_s1 + $0xb0] sm:$0xff]   ;;  %v617_v31 = vld [vmem:[%s779_s1 + $0xb8] sm:$0xff]  }
   0xd   :  { %563 = vmatpush3.bf16.msra.mxu1 %v597_v11  ;;  %536 = vmatprep.subr.bf16.mxu0 %v598_v12  ;;  %v618_v32 = vld [vmem:[%s780_s0] ss:$16 sps:$4 sm:$0xff]   ;;  %v620_v33 = vld [vmem:[%s780_s0 + $0x4] ss:$16 sps:$4 sm:$0xff]   ;;  %v621_v34 = vld [vmem:[%s780_s0 + $0x8] ss:$16 sps:$4 sm:$0xff]  }
   0xe   :  { %564 = vmatprep.subr.bf16.mxu1 %v599_v13  ;;  %v623_v35 = vld [vmem:[%s780_s0 + $0xc] ss:$16 sps:$4 sm:$0xff]   ;;  %350 = vmatprep.mubr.bf16.mxu0 %v620_v33  ;;  %v624_v36 = vld [vmem:[%s780_s0 + $0x24] ss:$16 sps:$4 sm:$0xff]   ;;  %v628_v38 = vld [vmem:[%s780_s0 + $0x20] ss:$16 sps:$4 sm:$0xff]  }
   0xf   :  { %399 = vmatprep.mubr.bf16.mxu1 %v623_v35  ;;  %v626_v37 = vld [vmem:[%s780_s0 + $0x2c] ss:$16 sps:$4 sm:$0xff]   ;;  %v629_v39 = vld [vmem:[%s780_s0 + $0x28] ss:$16 sps:$4 sm:$0xff]  }
  0x10   :  { %537 = vmatpush3.bf16.msra.mxu0 %v600_v14 }
  0x11   :  { %565 = vmatpush3.bf16.msra.mxu1 %v601_v15  ;;  %538 = vmatprep.subr.bf16.mxu0 %v602_v16 }
  0x12   :  { %566 = vmatprep.subr.bf16.mxu1 %v603_v17 }
  0x14   :  { %539 = vmatpush3.bf16.msra.mxu0 %v604_v18 }
  0x15   :  { %567 = vmatpush3.bf16.msra.mxu1 %v605_v19  ;;  %540 = vmatprep.subr.bf16.mxu0 %v606_v20 }
  0x16   :  { %568 = vmatprep.subr.bf16.mxu1 %v607_v21 }
  0x18   :  { %541 = vmatpush3.bf16.msra.mxu0 %v608_v22 }
  0x19   :  { %569 = vmatpush3.bf16.msra.mxu1 %v609_v23  ;;  %542 = vmatprep.subr.bf16.mxu0 %v610_v24 }
  0x1a   :  { %570 = vmatprep.subr.bf16.mxu1 %v611_v25 }
  0x1c   :  { %543 = vmatpush3.bf16.msra.mxu0 %v612_v26 }
  0x1d   :  { %571 = vmatpush3.bf16.msra.mxu1 %v613_v27  ;;  %544 = vmatprep.subr.bf16.mxu0 %v614_v28 }
  0x1e   :  { %572 = vmatprep.subr.bf16.mxu1 %v615_v29 }
  0x20   :  { %545 = vmatpush3.bf16.msra.mxu0 %v616_v30 }
  0x21   :  { %573 = vmatpush3.bf16.msra.mxu1 %v617_v31 }
  0x23   :  { %351 = vmatmul.mubr.bf16.vlgmr.msra.gmra.mrb[0].mxu0 %v618_v32 }
  0x24   :  { %400 = vmatmul.mubr.bf16.vlgmr.msra.gmra.mrb[0].mxu1 %v621_v34  ;;  %358 = vmatprep.mubr.bf16.mxu0 %v624_v36 }
  0x25   :  { %407 = vmatprep.mubr.bf16.mxu1 %v626_v37 }
  0x2b   :  { %359 = vmatmul.mubr.bf16.gmra.mrb[4].mxu0 %v628_v38 }
  0x2c   :  { %408 = vmatmul.mubr.bf16.gmra.mrb[4].mxu1 %v629_v39 }
  0xf6   :  { %v546_v40 = vpop.f32.mrb[0].mxu0 }
  0xf7   :  { %v574_v41 = vpop.f32.mrb[0].mxu1  ;;  %v547_v42 = vpop.f32.mrb[1].mxu0 }
  0xf8   :  { %v548_v43 = vadd.f32 %v547_v42, %v546_v40  ;;  %v575_v44 = vpop.f32.mrb[1].mxu1  ;;  %v549_v45 = vpop.f32.mrb[2].mxu0 }
  0xf9   :  { %v576_v46 = vadd.f32 %v575_v44, %v574_v41  ;;  %v577_v47 = vpop.f32.mrb[2].mxu1  ;;  %v550_v48 = vpop.f32.mrb[3].mxu0 }
  0xfa   :  { %v551_v49 = vadd.f32 %v550_v48, %v549_v45  ;;  %v578_v50 = vpop.f32.mrb[3].mxu1 }
  0xfb   :  { %v402_v51 = vadd.f32 %v576_v46, %v548_v43  ;;  %v579_v52 = vadd.f32 %v578_v50, %v577_v47 }
  0xfd   :  { %v405_v53 = vadd.f32 %v579_v52, %v551_v49  ;;  %v445_v55 = vmul.f32 %v402_v51, %v402_v51 }
  0xfe   :  { %v552_v54 = vpop.f32.mrb[4].mxu0 }
  0xff   :  { %v522_v56 = vpack.c.bf16 %v405_v53, %v402_v51  ;;  %v436_v57 = vadd.f32 %v405_v53, %v402_v51  ;;  %v446_v58 = vmul.f32 %v405_v53, %v405_v53  ;;  %v580_v59 = vpop.f32.mrb[4].mxu1  ;;  %v553_v60 = vpop.f32.mrb[5].mxu0 }
 0x100   :  { %v554_v61 = vadd.f32 %v553_v60, %v552_v54  ;;  %v581_v62 = vpop.f32.mrb[5].mxu1  ;;  %v555_v63 = vpop.f32.mrb[6].mxu0 }
 0x101   :  { %523 = vst [vmem:[%s781_s2] sm:$0xff] %v522_v56   ;;  %v449_v0 = vadd.f32 %v446_v58, %v445_v55  ;;  %v582_v1 = vadd.f32 %v581_v62, %v580_v59  ;;  %v583_v2 = vpop.f32.mrb[6].mxu1  ;;  %v556_v3 = vpop.f32.mrb[7].mxu0 }
 0x102   :  { %v557_v4 = vadd.f32 %v556_v3, %v555_v63  ;;  %v584_v5 = vpop.f32.mrb[7].mxu1 }
 0x103   :  { %v410_v6 = vadd.f32 %v582_v1, %v554_v61  ;;  %v585_v7 = vadd.f32 %v584_v5, %v583_v2 }
 0x105   :  { %v437_v8 = vadd.f32 %v436_v57, %v410_v6  ;;  %v447_v9 = vmul.f32 %v410_v6, %v410_v6  ;;  %v413_v10 = vadd.f32 %v585_v7, %v557_v4 }
 0x107   :  { %v450_v11 = vadd.f32 %v449_v0, %v447_v9  ;;  %v527_v12 = vpack.c.bf16 %v413_v10, %v410_v6  ;;  %v438_v13 = vadd.f32 %v437_v8, %v413_v10  ;;  %v448_v14 = vmul.f32 %v413_v10, %v413_v10 }
 0x109   :  { %529 = vst [vmem:[%s781_s2 + $0x8] sm:$0xff] %v527_v12   ;;  %v439_v15 = vrot.slane %v438_v13, 4  ;;  %v451_v16 = vadd.f32 %v450_v11, %v448_v14 }
 0x10b   :  { %v440_v17 = vadd.f32 %v439_v15, %v438_v13  ;;  %v452_v18 = vrot.slane %v451_v16, 4 }
 0x10d   :  { %v441_v19 = vrot.slane %v440_v17, 2  ;;  %v453_v20 = vadd.f32 %v452_v18, %v451_v16 }
 0x10f   :  { %v442_v21 = vadd.f32 %v441_v19, %v440_v17  ;;  %v454_v22 = vrot.slane %v453_v20, 2 }
 0x111   :  { %v443_v23 = vrot.slane %v442_v21, 1  ;;  %v455_v24 = vadd.f32 %v454_v22, %v453_v20 }
 0x113   :  { %v456_v25 = vrot.slane %v455_v24, 1  ;;  %v444_v26 = vadd.f32 %v443_v23, %v442_v21 }
 0x115   :  { %v457_v27 = vadd.f32 %v456_v25, %v455_v24 }
 0x117   :  { %v459_v28 = vsel %vm458_vm0, %v444_v26, %v457_v27 }
 0x118   :  { %v461_v29 = vsel %vm460_vm1, %v459_v28, 0.0 }
 0x119   :  { %462 = vst [vmem:[%s782_s3] sm:$0xff] %v461_v29 }

// kernel: discriminator_forward.15
= control target key start
LH: loop header
LB: loop body
LE: loop exit
PB: predicated region body
PF: predicated region fallthrough
CT: control target
= control target key end

     0   :  { %s1223_s1 = inlined_call_operand.vmem [shape: bf16[1024,128], index: 1, kind: input, shape index: {}]   ;;  %s1224_s0 = inlined_call_operand.vmem [shape: bf16[16,1024], index: 0, kind: input, shape index: {}]   ;;  %s1225_s2 = inlined_call_operand.vmem [shape: f32[16,128], index: 2, kind: output, shape index: {}]  }
   0x1   :  { %v914_v0 = vld [vmem:[%s1223_s1 + $0x40] sm:$0xff]   ;;  %v918_v4 = vld [vmem:[%s1223_s1 + $0x48] sm:$0xff]   ;;  %v922_v8 = vld [vmem:[%s1223_s1 + $0x50] sm:$0xff]  }
   0x2   :  { %v915_v1 = vld [vmem:[%s1223_s1 + $0xc0] sm:$0xff]   ;;  %826 = vmatprep.subr.bf16.mxu0 %v914_v0  ;;  %v919_v5 = vld [vmem:[%s1223_s1 + $0xc8] sm:$0xff]   ;;  %v923_v9 = vld [vmem:[%s1223_s1 + $0xd0] sm:$0xff]  }
   0x3   :  { %v916_v2 = vld [vmem:[%s1223_s1] sm:$0xff]   ;;  %848 = vmatprep.subr.bf16.mxu1 %v915_v1  ;;  %v920_v6 = vld [vmem:[%s1223_s1 + $0x8] sm:$0xff]   ;;  %v924_v10 = vld [vmem:[%s1223_s1 + $0x10] sm:$0xff]  }
   0x4   :  { %v917_v3 = vld [vmem:[%s1223_s1 + $0x80] sm:$0xff]   ;;  %827 = vmatpush3.bf16.msra.mxu0 %v916_v2  ;;  %v921_v7 = vld [vmem:[%s1223_s1 + $0x88] sm:$0xff]   ;;  %v925_v11 = vld [vmem:[%s1223_s1 + $0x90] sm:$0xff]  }
   0x5   :  { %849 = vmatpush3.bf16.msra.mxu1 %v917_v3  ;;  %828 = vmatprep.subr.bf16.mxu0 %v918_v4  ;;  %v926_v12 = vld [vmem:[%s1223_s1 + $0x58] sm:$0xff]   ;;  %v930_v16 = vld [vmem:[%s1223_s1 + $0x60] sm:$0xff]   ;;  %v934_v20 = vld [vmem:[%s1223_s1 + $0x68] sm:$0xff]  }
   0x6   :  { %850 = vmatprep.subr.bf16.mxu1 %v919_v5  ;;  %v927_v13 = vld [vmem:[%s1223_s1 + $0xd8] sm:$0xff]   ;;  %v931_v17 = vld [vmem:[%s1223_s1 + $0xe0] sm:$0xff]   ;;  %v935_v21 = vld [vmem:[%s1223_s1 + $0xe8] sm:$0xff]  }
   0x7   :  { %v928_v14 = vld [vmem:[%s1223_s1 + $0x18] sm:$0xff]   ;;  %v932_v18 = vld [vmem:[%s1223_s1 + $0x20] sm:$0xff]   ;;  %v936_v22 = vld [vmem:[%s1223_s1 + $0x28] sm:$0xff]  }
   0x8   :  { %829 = vmatpush3.bf16.msra.mxu0 %v920_v6  ;;  %v929_v15 = vld [vmem:[%s1223_s1 + $0x98] sm:$0xff]   ;;  %v933_v19 = vld [vmem:[%s1223_s1 + $0xa0] sm:$0xff]   ;;  %v937_v23 = vld [vmem:[%s1223_s1 + $0xa8] sm:$0xff]  }
   0x9   :  { %851 = vmatpush3.bf16.msra.mxu1 %v921_v7  ;;  %830 = vmatprep.subr.bf16.mxu0 %v922_v8  ;;  %v938_v24 = vld [vmem:[%s1223_s1 + $0x70] sm:$0xff]   ;;  %v942_v28 = vld [vmem:[%s1223_s1 + $0x78] sm:$0xff]   ;;  %v12_v32 = vld [vmem:[%s1224_s0] sm:$0xff] }
   0xa   :  { %852 = vmatprep.subr.bf16.mxu1 %v923_v9  ;;  %v939_v25 = vld [vmem:[%s1223_s1 + $0xf0] sm:$0xff]   ;;  %v943_v29 = vld [vmem:[%s1223_s1 + $0xf8] sm:$0xff]   ;;  %v16_v33 = vld [vmem:[%s1224_s0 + $0x20] sm:$0xff] }
   0xb   :  { %v940_v26 = vld [vmem:[%s1223_s1 + $0x30] sm:$0xff]   ;;  %v944_v30 = vld [vmem:[%s1223_s1 + $0x38] sm:$0xff]   ;;  %v13_v34 = vld [vmem:[%s1224_s0 + $0x8] sm:$0xff]  ;;  %v754_v35 = vcombine.low %v12_v32, %v16_v33  ;;  %v755_v36 = vcombine.high %v12_v32, %v16_v33 }
   0xc   :  { %831 = vmatpush3.bf16.msra.mxu0 %v924_v10  ;;  %v941_v27 = vld [vmem:[%s1223_s1 + $0xb0] sm:$0xff]   ;;  %v945_v31 = vld [vmem:[%s1223_s1 + $0xb8] sm:$0xff]   ;;  %v17_v37 = vld [vmem:[%s1224_s0 + $0x28] sm:$0xff] }
   0xd   :  { %853 = vmatpush3.bf16.msra.mxu1 %v925_v11  ;;  %832 = vmatprep.subr.bf16.mxu0 %v926_v12  ;;  %v756_v38 = vcombine.low %v13_v34, %v17_v37  ;;  %v757_v39 = vcombine.high %v13_v34, %v17_v37  ;;  %v946_v40 = vld [vmem:[%s1223_s1 + $0x140] sm:$0xff]   ;;  %v950_v44 = vld [vmem:[%s1223_s1 + $0x148] sm:$0xff]   ;;  %v954_v48 = vld [vmem:[%s1223_s1 + $0x150] sm:$0xff]  }
   0xe   :  { %854 = vmatprep.subr.bf16.mxu1 %v927_v13  ;;  %604 = vmatprep.mubr.bf16.mxu0 %v755_v36  ;;  %v947_v41 = vld [vmem:[%s1223_s1 + $0x1c0] sm:$0xff]   ;;  %v951_v45 = vld [vmem:[%s1223_s1 + $0x1c8] sm:$0xff]   ;;  %v955_v49 = vld [vmem:[%s1223_s1 + $0x1d0] sm:$0xff]  }
   0xf   :  { %645 = vmatprep.mubr.bf16.mxu1 %v757_v39  ;;  %v948_v42 = vld [vmem:[%s1223_s1 + $0x100] sm:$0xff]   ;;  %v952_v46 = vld [vmem:[%s1223_s1 + $0x108] sm:$0xff]   ;;  %v956_v50 = vld [vmem:[%s1223_s1 + $0x110] sm:$0xff]  }
  0x10   :  { %833 = vmatpush3.bf16.msra.mxu0 %v928_v14  ;;  %v949_v43 = vld [vmem:[%s1223_s1 + $0x180] sm:$0xff]   ;;  %v953_v47 = vld [vmem:[%s1223_s1 + $0x188] sm:$0xff]   ;;  %v957_v51 = vld [vmem:[%s1223_s1 + $0x190] sm:$0xff]  }
  0x11   :  { %855 = vmatpush3.bf16.msra.mxu1 %v929_v15  ;;  %834 = vmatprep.subr.bf16.mxu0 %v930_v16  ;;  %v958_v52 = vld [vmem:[%s1223_s1 + $0x158] sm:$0xff]   ;;  %v962_v56 = vld [vmem:[%s1223_s1 + $0x160] sm:$0xff]   ;;  %v966_v60 = vld [vmem:[%s1223_s1 + $0x168] sm:$0xff]  }
  0x12   :  { %856 = vmatprep.subr.bf16.mxu1 %v931_v17  ;;  %v959_v53 = vld [vmem:[%s1223_s1 + $0x1d8] sm:$0xff]   ;;  %v963_v57 = vld [vmem:[%s1223_s1 + $0x1e0] sm:$0xff]   ;;  %v967_v61 = vld [vmem:[%s1223_s1 + $0x1e8] sm:$0xff]  }
  0x13   :  { %v960_v54 = vld [vmem:[%s1223_s1 + $0x118] sm:$0xff]   ;;  %v964_v58 = vld [vmem:[%s1223_s1 + $0x120] sm:$0xff]   ;;  %v968_v62 = vld [vmem:[%s1223_s1 + $0x128] sm:$0xff]  }
  0x14   :  { %835 = vmatpush3.bf16.msra.mxu0 %v932_v18  ;;  %v961_v55 = vld [vmem:[%s1223_s1 + $0x198] sm:$0xff]   ;;  %v965_v59 = vld [vmem:[%s1223_s1 + $0x1a0] sm:$0xff]   ;;  %v969_v63 = vld [vmem:[%s1223_s1 + $0x1a8] sm:$0xff]  }
  0x15   :  { %857 = vmatpush3.bf16.msra.mxu1 %v933_v19  ;;  %836 = vmatprep.subr.bf16.mxu0 %v934_v20  ;;  %v970_v0 = vld [vmem:[%s1223_s1 + $0x170] sm:$0xff]   ;;  %v974_v4 = vld [vmem:[%s1223_s1 + $0x178] sm:$0xff]  }
  0x16   :  { %858 = vmatprep.subr.bf16.mxu1 %v935_v21  ;;  %v971_v1 = vld [vmem:[%s1223_s1 + $0x1f0] sm:$0xff]   ;;  %v975_v5 = vld [vmem:[%s1223_s1 + $0x1f8] sm:$0xff]  }
  0x17   :  { %v972_v2 = vld [vmem:[%s1223_s1 + $0x130] sm:$0xff]   ;;  %v976_v6 = vld [vmem:[%s1223_s1 + $0x138] sm:$0xff]  }
  0x18   :  { %837 = vmatpush3.bf16.msra.mxu0 %v936_v22  ;;  %v973_v3 = vld [vmem:[%s1223_s1 + $0x1b0] sm:$0xff]   ;;  %v977_v7 = vld [vmem:[%s1223_s1 + $0x1b8] sm:$0xff]  }
  0x19   :  { %859 = vmatpush3.bf16.msra.mxu1 %v937_v23  ;;  %838 = vmatprep.subr.bf16.mxu0 %v938_v24  ;;  %v14_v8 = vld [vmem:[%s1224_s0 + $0x10] sm:$0xff]  ;;  %v15_v12 = vld [vmem:[%s1224_s0 + $0x18] sm:$0xff] }
  0x1a   :  { %860 = vmatprep.subr.bf16.mxu1 %v939_v25  ;;  %v18_v9 = vld [vmem:[%s1224_s0 + $0x30] sm:$0xff]  ;;  %v19_v13 = vld [vmem:[%s1224_s0 + $0x38] sm:$0xff] }
  0x1b   :  { %v758_v10 = vcombine.low %v14_v8, %v18_v9  ;;  %v759_v11 = vcombine.high %v14_v8, %v18_v9  ;;  %v760_v14 = vcombine.low %v15_v12, %v19_v13  ;;  %v761_v15 = vcombine.high %v15_v12, %v19_v13 }
  0x1c   :  { %839 = vmatpush3.bf16.msra.mxu0 %v940_v26 }
  0x1d   :  { %861 = vmatpush3.bf16.msra.mxu1 %v941_v27  ;;  %840 = vmatprep.subr.bf16.mxu0 %v942_v28 }
  0x1e   :  { %862 = vmatprep.subr.bf16.mxu1 %v943_v29 }
  0x20   :  { %841 = vmatpush3.bf16.msra.mxu0 %v944_v30 }
  0x21   :  { %863 = vmatpush3.bf16.msra.mxu1 %v945_v31  ;;  %870 = vmatprep.subr.bf16.mxu0 %v946_v40 }
  0x22   :  { %892 = vmatprep.subr.bf16.mxu1 %v947_v41 }
  0x23   :  { %605 = vmatmul.mubr.bf16.vlgmr.msra.gmra.mrb[0].mxu0 %v754_v35 }
  0x24   :  { %646 = vmatmul.mubr.bf16.vlgmr.msra.gmra.mrb[0].mxu1 %v756_v38  ;;  %871 = vmatpush3.bf16.msra.mxu0 %v948_v42 }
  0x25   :  { %893 = vmatpush3.bf16.msra.mxu1 %v949_v43  ;;  %872 = vmatprep.subr.bf16.mxu0 %v950_v44 }
  0x26   :  { %894 = vmatprep.subr.bf16.mxu1 %v951_v45  ;;  %686 = vmatprep.mubr.bf16.mxu0 %v759_v11 }
  0x27   :  { %727 = vmatprep.mubr.bf16.mxu1 %v761_v15 }
  0x28   :  { %873 = vmatpush3.bf16.msra.mxu0 %v952_v46 }
  0x29   :  { %895 = vmatpush3.bf16.msra.mxu1 %v953_v47  ;;  %874 = vmatprep.subr.bf16.mxu0 %v954_v48 }
  0x2a   :  { %896 = vmatprep.subr.bf16.mxu1 %v955_v49 }
  0x2c   :  { %875 = vmatpush3.bf16.msra.mxu0 %v956_v50 }
  0x2d   :  { %897 = vmatpush3.bf16.msra.mxu1 %v957_v51  ;;  %876 = vmatprep.subr.bf16.mxu0 %v958_v52 }
  0x2e   :  { %898 = vmatprep.subr.bf16.mxu1 %v959_v53 }
  0x30   :  { %877 = vmatpush3.bf16.msra.mxu0 %v960_v54 }
  0x31   :  { %899 = vmatpush3.bf16.msra.mxu1 %v961_v55  ;;  %878 = vmatprep.subr.bf16.mxu0 %v962_v56 }
  0x32   :  { %900 = vmatprep.subr.bf16.mxu1 %v963_v57 }
  0x34   :  { %879 = vmatpush3.bf16.msra.mxu0 %v964_v58 }
  0x35   :  { %901 = vmatpush3.bf16.msra.mxu1 %v965_v59  ;;  %880 = vmatprep.subr.bf16.mxu0 %v966_v60 }
  0x36   :  { %902 = vmatprep.subr.bf16.mxu1 %v967_v61 }
  0x38   :  { %881 = vmatpush3.bf16.msra.mxu0 %v968_v62 }
  0x39   :  { %903 = vmatpush3.bf16.msra.mxu1 %v969_v63  ;;  %882 = vmatprep.subr.bf16.mxu0 %v970_v0 }
  0x3a   :  { %904 = vmatprep.subr.bf16.mxu1 %v971_v1 }
  0x3c   :  { %883 = vmatpush3.bf16.msra.mxu0 %v972_v2 }
  0x3d   :  { %905 = vmatpush3.bf16.msra.mxu1 %v973_v3  ;;  %884 = vmatprep.subr.bf16.mxu0 %v974_v4 }
  0x3e   :  { %906 = vmatprep.subr.bf16.mxu1 %v975_v5 }
  0x40   :  { %885 = vmatpush3.bf16.msra.mxu0 %v976_v6 }
  0x41   :  { %907 = vmatpush3.bf16.msra.mxu1 %v977_v7 }
  0x43   :  { %687 = vmatmul.mubr.bf16.vlgmr.msra.gmra.mrb[4].mxu0 %v758_v10 }
  0x44   :  { %728 = vmatmul.mubr.bf16.vlgmr.msra.gmra.mrb[4].mxu1 %v760_v14 }
  0xf6   :  { %v842_v16 = vpop.f32.mrb[0].mxu0 }
  0xf7   :  { %v864_v17 = vpop.f32.mrb[0].mxu1  ;;  %v843_v18 = vpop.f32.mrb[1].mxu0 }
  0xf8   :  { %v844_v19 = vadd.f32 %v843_v18, %v842_v16  ;;  %v865_v20 = vpop.f32.mrb[1].mxu1  ;;  %v845_v21 = vpop.f32.mrb[2].mxu0 }
  0xf9   :  { %v866_v22 = vadd.f32 %v865_v20, %v864_v17  ;;  %v867_v23 = vpop.f32.mrb[2].mxu1  ;;  %v846_v24 = vpop.f32.mrb[3].mxu0 }
  0xfa   :  { %v847_v25 = vadd.f32 %v846_v24, %v845_v21  ;;  %v868_v26 = vpop.f32.mrb[3].mxu1 }
  0xfb   :  { %v648_v27 = vadd.f32 %v866_v22, %v844_v19  ;;  %v869_v28 = vadd.f32 %v868_v26, %v867_v23 }
  0xfd   :  { %v651_v29 = vadd.f32 %v869_v28, %v847_v25 }
 0x116   :  { %v886_v30 = vpop.f32.mrb[4].mxu0 }
 0x117   :  { %v908_v31 = vpop.f32.mrb[4].mxu1  ;;  %v887_v32 = vpop.f32.mrb[5].mxu0 }
 0x118   :  { %v888_v33 = vadd.f32 %v887_v32, %v886_v30  ;;  %v909_v34 = vpop.f32.mrb[5].mxu1  ;;  %v889_v35 = vpop.f32.mrb[6].mxu0 }
 0x119   :  { %v910_v36 = vadd.f32 %v909_v34, %v908_v31  ;;  %v911_v37 = vpop.f32.mrb[6].mxu1  ;;  %v890_v38 = vpop.f32.mrb[7].mxu0 }
 0x11a   :  { %v689_v39 = vadd.f32 %v888_v33, %v648_v27  ;;  %v891_v40 = vadd.f32 %v890_v38, %v889_v35  ;;  %v912_v41 = vpop.f32.mrb[7].mxu1 }
 0x11b   :  { %v913_v42 = vadd.f32 %v912_v41, %v911_v37 }
 0x11c   :  { %v730_v43 = vadd.f32 %v910_v36, %v689_v39  ;;  %v692_v44 = vadd.f32 %v891_v40, %v651_v29 }
 0x11e   :  { %v736_v45 = vsub.f32 0.0, %v730_v43  ;;  %v733_v46 = vadd.f32 %v913_v42, %v692_v44 }
 0x120   :  { %v738_v47 = vmul.f32 1.442695, %v736_v45  ;;  %v737_v48 = vsub.f32 0.0, %v733_v46 }
 0x122   :  { %978 = vpow2.f32 %v738_v47  ;;  %v740_v49 = vmul.f32 1.442695, %v737_v48 }
 0x124   :  { %980 = vpow2.f32 %v740_v49 }
 0x12c   :  { %v979_v50 = vpop.eup %978 }
 0x12d   :  { %v742_v51 = vadd.f32 1.0, %v979_v50 }
 0x12e   :  { %v981_v52 = vpop.eup %980 }
 0x12f   :  { %982 = vrcp.f32 %v742_v51  ;;  %v743_v53 = vadd.f32 1.0, %v981_v52 }
 0x131   :  { %984 = vrcp.f32 %v743_v53 }
 0x139   :  { %v983_v54 = vpop.eup %982 }
 0x13a   :  { %748 = vst [vmem:[%s1225_s2] sm:$0xff] %v983_v54 }
 0x13b   :  { %v985_v55 = vpop.eup %984 }
 0x13c   :  { %749 = vst [vmem:[%s1225_s2 + $0x8] sm:$0xff] %v985_v55 }

</bundles_post_ra>
